<compile_context>
chip_gen: v7x
topology: tpu7x:2x2x1
jax: 0.10.0
libtpu: 0.0.40
codegen_flags: <defaults>
</compile_context>

<pallas_src>
import functools

import jax
import jax.numpy as jnp
from jax.experimental import pallas as pl
from jax.experimental.pallas import tpu as pltpu

HIDDEN_DIM = 128   # module default is 300; lane-aligned H for the demo
DEPTH = 3
TM = 256           # row tile for nodes AND edges (>= 256 to fill the MXU)

ATOM_FEATURE_DIMS = [119, 4, 12, 12, 10, 6, 6, 2, 2]   # ogb get_atom_feature_dims()
BOND_FEATURE_DIMS = [5, 6, 2]                           # ogb get_bond_feature_dims()


def _round_up(n, m):
    return -(-n // m) * m


def _full(*_):
    return (0, 0)


# ----------------------------- Pallas kernels ------------------------------ #

def _mlp_tail(h1, w2_ref, b2_ref, w3_ref, b3_ref):
    """Shared GeomolMLP tail: ReLU -> Linear -> ReLU -> Linear (f32 accumulate)."""
    h1 = jnp.maximum(h1, 0.0).astype(jnp.bfloat16)
    h2 = jnp.dot(h1, w2_ref[...], preferred_element_type=jnp.float32) + b2_ref[...]
    h2 = jnp.maximum(h2, 0.0).astype(jnp.bfloat16)
    return jnp.dot(h2, w3_ref[...], preferred_element_type=jnp.float32) + b3_ref[...]


def mlp3_kernel(x_ref, w1_ref, b1_ref, w2_ref, b2_ref, w3_ref, b3_ref, o_ref):
    """GeomolMLP(num_layers=2): Linear -> ReLU -> Linear -> ReLU -> Linear."""
    h1 = jnp.dot(x_ref[...], w1_ref[...], preferred_element_type=jnp.float32) + b1_ref[...]
    o_ref[...] = _mlp_tail(h1, w2_ref, b2_ref, w3_ref, b3_ref).astype(o_ref.dtype)


def node_update_kernel(h_ref, agg_ref, w1x_ref, w1a_ref, b1_ref,
                       w2_ref, b2_ref, w3_ref, b3_ref, o_ref):
    """node_mlp_2([x || agg]) with the (2H -> H) first layer split per segment."""
    h1 = (jnp.dot(h_ref[...], w1x_ref[...], preferred_element_type=jnp.float32)
          + jnp.dot(agg_ref[...], w1a_ref[...], preferred_element_type=jnp.float32)
          + b1_ref[...])
    o_ref[...] = _mlp_tail(h1, w2_ref, b2_ref, w3_ref, b3_ref).astype(o_ref.dtype)


def edge_msg_agg_kernel(src_ref, dst_ref, e_ref, oh_ref, invdeg_ref,
                        ew1a_ref, ew1b_ref, ew1c_ref, eb1_ref,
                        ew2_ref, eb2_ref, ew3_ref, eb3_ref,
                        mw1x_ref, mw1e_ref, mb1_ref,
                        mw2_ref, mb2_ref, mw3_ref, mb3_ref,
                        e_out_ref, agg_out_ref, acc_ref):
    """Fused per-edge-tile: EdgeModel MLP + NodeModel message MLP + scatter-mean.

    The edge-tile grid axis is a serial reduction; the per-node accumulator sits
    in f32 VMEM scratch, so `msg` never touches HBM.
    """
    k = pl.program_id(0)

    @pl.when(k == 0)
    def _():
        acc_ref[...] = jnp.zeros_like(acc_ref)

    # EdgeModel: MLP([x[row] || x[col] || e]) -- first (3H -> H) layer split.
    h1 = (jnp.dot(src_ref[...], ew1a_ref[...], preferred_element_type=jnp.float32)
          + jnp.dot(dst_ref[...], ew1b_ref[...], preferred_element_type=jnp.float32)
          + jnp.dot(e_ref[...], ew1c_ref[...], preferred_element_type=jnp.float32)
          + eb1_ref[...])
    e_new = _mlp_tail(h1, ew2_ref, eb2_ref, ew3_ref, eb3_ref)
    e_new_bf = e_new.astype(jnp.bfloat16)
    e_out_ref[...] = e_new_bf

    # NodeModel message: MLP([x[row] || e_new]) -- first (2H -> H) layer split.
    m1 = (jnp.dot(src_ref[...], mw1x_ref[...], preferred_element_type=jnp.float32)
          + jnp.dot(e_new_bf, mw1e_ref[...], preferred_element_type=jnp.float32)
          + mb1_ref[...])
    msg = _mlp_tail(m1, mw2_ref, mb2_ref, mw3_ref, mb3_ref).astype(jnp.bfloat16)

    # scatter-add on the MXU: acc[N, H] += onehot_tile[N, TE] @ msg[TE, H]
    acc_ref[...] += jnp.dot(oh_ref[...], msg, preferred_element_type=jnp.float32)

    @pl.when(k == pl.num_programs(0) - 1)
    def _():
        agg_out_ref[...] = (acc_ref[...] * invdeg_ref[...]).astype(agg_out_ref.dtype)


# ------------------------------ pallas wrappers ----------------------------- #

def _mlp_weight_specs(in_dim, H):
    return [pl.BlockSpec((in_dim, H), _full),
            pl.BlockSpec((1, H), _full),
            pl.BlockSpec((H, H), _full),
            pl.BlockSpec((1, H), _full),
            pl.BlockSpec((H, H), _full),
            pl.BlockSpec((1, H), _full)]


def mlp3(x, p, *, tm=TM):
    M, in_dim = x.shape
    H = p['w2'].shape[1]
    Mp = _round_up(M, tm)
    xp = x if Mp == M else jnp.pad(x, ((0, Mp - M), (0, 0)))
    flops = 2 * Mp * H * (in_dim + 2 * H)
    bytes_accessed = 2 * (Mp * in_dim + 2 * Mp * H + in_dim * H + 2 * H * H) + 12 * H
    out = pl.pallas_call(
        mlp3_kernel,
        out_shape=jax.ShapeDtypeStruct((Mp, H), jnp.bfloat16),
        grid_spec=pltpu.PrefetchScalarGridSpec(
            num_scalar_prefetch=0,
            grid=(Mp // tm,),
            in_specs=[pl.BlockSpec((tm, in_dim), lambda i: (i, 0))]
                     + _mlp_weight_specs(in_dim, H),
            out_specs=pl.BlockSpec((tm, H), lambda i: (i, 0))),
        compiler_params=pltpu.CompilerParams(dimension_semantics=("parallel",)),
        cost_estimate=pl.CostEstimate(flops=flops, transcendentals=0,
                                      bytes_accessed=bytes_accessed),
    )(xp, p['w1'][0], p['b1'], p['w2'], p['b2'], p['w3'], p['b3'])
    return out if Mp == M else out[:M]


def node_update(h, agg, p, *, tm=TM):
    M, H = h.shape
    Mp = _round_up(M, tm)
    if Mp != M:
        h = jnp.pad(h, ((0, Mp - M), (0, 0)))
        agg = jnp.pad(agg, ((0, Mp - M), (0, 0)))
    flops = 2 * Mp * H * H * 4
    bytes_accessed = 2 * (3 * Mp * H + 4 * H * H) + 12 * H
    out = pl.pallas_call(
        node_update_kernel,
        out_shape=jax.ShapeDtypeStruct((Mp, H), jnp.bfloat16),
        grid_spec=pltpu.PrefetchScalarGridSpec(
            num_scalar_prefetch=0,
            grid=(Mp // tm,),
            in_specs=[pl.BlockSpec((tm, H), lambda i: (i, 0)),
                      pl.BlockSpec((tm, H), lambda i: (i, 0)),
                      pl.BlockSpec((H, H), _full),
                      pl.BlockSpec((H, H), _full),
                      pl.BlockSpec((1, H), _full),
                      pl.BlockSpec((H, H), _full),
                      pl.BlockSpec((1, H), _full),
                      pl.BlockSpec((H, H), _full),
                      pl.BlockSpec((1, H), _full)],
            out_specs=pl.BlockSpec((tm, H), lambda i: (i, 0))),
        compiler_params=pltpu.CompilerParams(dimension_semantics=("parallel",)),
        cost_estimate=pl.CostEstimate(flops=flops, transcendentals=0,
                                      bytes_accessed=bytes_accessed),
    )(h, agg, p['w1'][0], p['w1'][1], p['b1'], p['w2'], p['b2'], p['w3'], p['b3'])
    return out if Mp == M else out[:M]


def edge_message_aggregate(src, dst, e, onehot, inv_deg, ep, mp, *, te=TM):
    """Fused EdgeModel + message MLP + scatter-mean. Inputs must be pre-padded."""
    Ep, H = e.shape
    Np = onehot.shape[0]
    n_steps = Ep // te
    flops = 2 * Ep * H * H * 9 + 2 * Np * Ep * H
    bytes_accessed = (2 * (3 * Ep * H + Np * Ep + Ep * H + Np * H + 9 * H * H)
                      + 4 * Np + 24 * H)
    edge_tile = pl.BlockSpec((te, H), lambda k: (k, 0))
    hh = lambda: pl.BlockSpec((H, H), _full)
    bias = lambda: pl.BlockSpec((1, H), _full)
    return pl.pallas_call(
        edge_msg_agg_kernel,
        out_shape=(jax.ShapeDtypeStruct((Ep, H), jnp.bfloat16),
                   jax.ShapeDtypeStruct((Np, H), jnp.bfloat16)),
        grid_spec=pltpu.PrefetchScalarGridSpec(
            num_scalar_prefetch=0,
            grid=(n_steps,),
            in_specs=[edge_tile, edge_tile, edge_tile,
                      pl.BlockSpec((Np, te), lambda k: (0, k)),   # one-hot tile
                      pl.BlockSpec((Np, 1), _full),               # inverse degree
                      # edge_model weights (3H first layer split into 3 blocks)
                      hh(), hh(), hh(), bias(), hh(), bias(), hh(), bias(),
                      # node_mlp_1 weights (2H first layer split into 2 blocks)
                      hh(), hh(), bias(), hh(), bias(), hh(), bias()],
            out_specs=(pl.BlockSpec((te, H), lambda k: (k, 0)),
                       pl.BlockSpec((Np, H), lambda k: (0, 0))),
            scratch_shapes=[pltpu.VMEM((Np, H), jnp.float32)]),
        compiler_params=pltpu.CompilerParams(dimension_semantics=("arbitrary",)),
        cost_estimate=pl.CostEstimate(flops=flops, transcendentals=0,
                                      bytes_accessed=bytes_accessed),
    )(src, dst, e, onehot, inv_deg,
      ep['w1'][0], ep['w1'][1], ep['w1'][2], ep['b1'],
      ep['w2'], ep['b2'], ep['w3'], ep['b3'],
      mp['w1'][0], mp['w1'][1], mp['b1'],
      mp['w2'], mp['b2'], mp['w3'], mp['b3'])


# ------------------------------ parameter init ----------------------------- #

def _init_linear(kw, kb, fan_in, fan_out):
    bound = 1.0 / (fan_in ** 0.5)   # torch.nn.Linear default init
    w = jax.random.uniform(kw, (fan_in, fan_out), jnp.float32, -bound, bound)
    b = jax.random.uniform(kb, (1, fan_out), jnp.float32, -bound, bound)
    return w, b


def init_mlp(key, in_dim, h_dim, num_splits=1):
    ks = jax.random.split(key, 6)
    w1, b1 = _init_linear(ks[0], ks[1], in_dim, h_dim)
    w2, b2 = _init_linear(ks[2], ks[3], h_dim, h_dim)
    w3, b3 = _init_linear(ks[4], ks[5], h_dim, h_dim)
    return {'w1': tuple(w.astype(jnp.bfloat16) for w in jnp.split(w1, num_splits, axis=0)),
            'b1': b1,
            'w2': w2.astype(jnp.bfloat16), 'b2': b2,
            'w3': w3.astype(jnp.bfloat16), 'b3': b3}


def init_params(key, H):
    keys = jax.random.split(key, 7)
    atom_emb = [0.1 * jax.random.normal(k, (v, H), jnp.float32)
                for k, v in zip(jax.random.split(keys[0], len(ATOM_FEATURE_DIMS)),
                                ATOM_FEATURE_DIMS)]
    bond_emb = [0.1 * jax.random.normal(k, (v, H), jnp.float32)
                for k, v in zip(jax.random.split(keys[1], len(BOND_FEATURE_DIMS)),
                                BOND_FEATURE_DIMS)]
    return {
        'atom_emb': atom_emb,
        'bond_emb': bond_emb,
        'node_init': init_mlp(keys[2], H, H, num_splits=1),
        'edge_init': init_mlp(keys[3], H, H, num_splits=1),
        'edge_model': init_mlp(keys[4], 3 * H, H, num_splits=3),
        'node_mlp_1': init_mlp(keys[5], 2 * H, H, num_splits=2),
        'node_mlp_2': init_mlp(keys[6], 2 * H, H, num_splits=2),
    }


# -------------------------------- forward ---------------------------------- #

def geomol_gnn_forward(params, x, edge_index, edge_attr, depth=DEPTH):
    N = x.shape[0]
    E = edge_attr.shape[0]
    Np = _round_up(N, TM)
    Ep = _round_up(E, TM)

    # AtomEncoder / BondEncoder: sum of per-feature embedding lookups (JAX glue).
    h = sum(params['atom_emb'][i][x[:, i]] for i in range(len(ATOM_FEATURE_DIMS)))
    e = sum(params['bond_emb'][i][edge_attr[:, i]] for i in range(len(BOND_FEATURE_DIMS)))
    h = jnp.pad(h, ((0, Np - N), (0, 0))).astype(jnp.bfloat16)
    e = jnp.pad(e, ((0, Ep - E), (0, 0))).astype(jnp.bfloat16)

    h = mlp3(h, params['node_init'])
    e = mlp3(e, params['edge_init'])

    row = jnp.pad(edge_index[0], (0, Ep - E), constant_values=0)
    col = jnp.pad(edge_index[1], (0, Ep - E), constant_values=-1)  # padded edges scatter nowhere

    # Dense one-hot (bf16) streamed in tiles on the MXU; inverse degree computed ONCE.
    # TODO(synk): for very large sparse graphs replace the dense [N, E] one-hot
    #             with a sorted segment-sum scatter (O(N*E) memory does not scale).
    onehot = (col[None, :] == jnp.arange(Np, dtype=col.dtype)[:, None]).astype(jnp.bfloat16)
    deg = jnp.sum(onehot.astype(jnp.float32), axis=1, keepdims=True)          # [Np, 1]
    inv_deg = jnp.where(deg > 0, 1.0 / jnp.maximum(deg, 1.0), 0.0)            # [Np, 1]

    for _ in range(depth):
        src = jnp.take(h, row, axis=0, mode='clip')   # x[row], shared by edge + msg MLPs
        dst = jnp.take(h, col, axis=0, mode='clip')   # x[col]
        e, agg = edge_message_aggregate(src, dst, e, onehot, inv_deg,
                                        params['edge_model'], params['node_mlp_1'])
        h = node_update(h, agg, params['node_mlp_2'])

    return h[:N].astype(jnp.float32), e[:E].astype(jnp.float32)


# ---------------------------------- main ------------------------------------ #

if __name__ == "__main__":
    N, E, H = 200, 360, HIDDEN_DIM   # non-multiples of the tile on purpose (cdiv+pad path)
    key = jax.random.PRNGKey(0)
    k_x, k_e, k_ei, k_p = jax.random.split(key, 4)

    x = jnp.stack([jax.random.randint(k, (N,), 0, v, dtype=jnp.int32)
                   for k, v in zip(jax.random.split(k_x, len(ATOM_FEATURE_DIMS)),
                                   ATOM_FEATURE_DIMS)], axis=1)            # [N, 9]
    edge_attr = jnp.stack([jax.random.randint(k, (E,), 0, v, dtype=jnp.int32)
                           for k, v in zip(jax.random.split(k_e, len(BOND_FEATURE_DIMS)),
                                           BOND_FEATURE_DIMS)], axis=1)    # [E, 3]
    edge_index = jax.random.randint(k_ei, (2, E), 0, N, dtype=jnp.int32)   # [2, E]

    params = init_params(k_p, H)

    fwd = jax.jit(functools.partial(geomol_gnn_forward, depth=DEPTH))
    h_out, e_out = fwd(params, x, edge_index, edge_attr)
    jax.block_until_ready((h_out, e_out))

    assert h_out.shape == (N, H) and e_out.shape == (E, H)
    assert h_out.dtype == jnp.float32 and e_out.dtype == jnp.float32
    assert bool(jnp.all(jnp.isfinite(h_out))) and bool(jnp.all(jnp.isfinite(e_out)))
    print("KERNEL_OK")
</pallas_src>

<mosaic_0001>
module attributes {stable_mosaic.version = 11 : i64} {
  func.func @mlp3_kernel(%arg0: i32, %arg1: memref<256x128xbf16, #tpu.memory_space<vmem>>, %arg2: memref<128x128xbf16, #tpu.memory_space<vmem>>, %arg3: memref<1x128xf32, #tpu.memory_space<vmem>>, %arg4: memref<128x128xbf16, #tpu.memory_space<vmem>>, %arg5: memref<1x128xf32, #tpu.memory_space<vmem>>, %arg6: memref<128x128xbf16, #tpu.memory_space<vmem>>, %arg7: memref<1x128xf32, #tpu.memory_space<vmem>>, %arg8: memref<256x128xbf16, #tpu.memory_space<vmem>>) attributes {dimension_semantics = [#tpu.dimension_semantics<parallel>], iteration_bounds = array<i64: 1>, scalar_prefetch = 0 : i64, scratch_operands = 0 : i64, tpu.core_type = #tpu.core_type<tc>, window_params = [{transform_indices = @transform_0, window_bounds = array<i64: 256, 128>}, {pipeline_mode = #tpu.pipeline_mode<synchronous>, transform_indices = @transform_1, window_bounds = array<i64: 128, 128>}, {pipeline_mode = #tpu.pipeline_mode<synchronous>, transform_indices = @transform_2, window_bounds = array<i64: 1, 128>}, {pipeline_mode = #tpu.pipeline_mode<synchronous>, transform_indices = @transform_3, window_bounds = array<i64: 128, 128>}, {pipeline_mode = #tpu.pipeline_mode<synchronous>, transform_indices = @transform_4, window_bounds = array<i64: 1, 128>}, {pipeline_mode = #tpu.pipeline_mode<synchronous>, transform_indices = @transform_5, window_bounds = array<i64: 128, 128>}, {pipeline_mode = #tpu.pipeline_mode<synchronous>, transform_indices = @transform_6, window_bounds = array<i64: 1, 128>}, {transform_indices = @transform_7, window_bounds = array<i64: 256, 128>}]} {
    %c0 = arith.constant 0 : index
    %c0_0 = arith.constant 0 : index
    %0 = vector.load %arg1[%c0, %c0_0] : memref<256x128xbf16, #tpu.memory_space<vmem>>, vector<256x128xbf16>
    %c0_1 = arith.constant 0 : index
    %c0_2 = arith.constant 0 : index
    %1 = vector.load %arg2[%c0_1, %c0_2] : memref<128x128xbf16, #tpu.memory_space<vmem>>, vector<128x128xbf16>
    %cst = arith.constant dense<0.000000e+00> : vector<256x128xf32>
    %2 = tpu.matmul %0, %1, %cst {dimension_numbers = #tpu.dot_dimension_numbers<[1], [0], [0], [1], [0, 0, 1, 1], [], []>} : vector<256x128xbf16>, vector<128x128xbf16>, vector<256x128xf32> -> vector<256x128xf32>
    %c0_3 = arith.constant 0 : index
    %c0_4 = arith.constant 0 : index
    %3 = vector.load %arg3[%c0_3, %c0_4] : memref<1x128xf32, #tpu.memory_space<vmem>>, vector<1x128xf32>
    %4 = vector.broadcast %3 : vector<1x128xf32> to vector<256x128xf32>
    %5 = arith.addf %2, %4 : vector<256x128xf32>
    %cst_5 = arith.constant 0.000000e+00 : f32
    %6 = vector.broadcast %cst_5 : f32 to vector<256x128xf32>
    %7 = arith.maximumf %5, %6 : vector<256x128xf32>
    %8 = arith.truncf %7 : vector<256x128xf32> to vector<256x128xbf16>
    %c0_6 = arith.constant 0 : index
    %c0_7 = arith.constant 0 : index
    %9 = vector.load %arg4[%c0_6, %c0_7] : memref<128x128xbf16, #tpu.memory_space<vmem>>, vector<128x128xbf16>
    %cst_8 = arith.constant dense<0.000000e+00> : vector<256x128xf32>
    %10 = tpu.matmul %8, %9, %cst_8 {dimension_numbers = #tpu.dot_dimension_numbers<[1], [0], [0], [1], [0, 0, 1, 1], [], []>} : vector<256x128xbf16>, vector<128x128xbf16>, vector<256x128xf32> -> vector<256x128xf32>
    %c0_9 = arith.constant 0 : index
    %c0_10 = arith.constant 0 : index
    %11 = vector.load %arg5[%c0_9, %c0_10] : memref<1x128xf32, #tpu.memory_space<vmem>>, vector<1x128xf32>
    %12 = vector.broadcast %11 : vector<1x128xf32> to vector<256x128xf32>
    %13 = arith.addf %10, %12 : vector<256x128xf32>
    %cst_11 = arith.constant 0.000000e+00 : f32
    %14 = vector.broadcast %cst_11 : f32 to vector<256x128xf32>
    %15 = arith.maximumf %13, %14 : vector<256x128xf32>
    %16 = arith.truncf %15 : vector<256x128xf32> to vector<256x128xbf16>
    %c0_12 = arith.constant 0 : index
    %c0_13 = arith.constant 0 : index
    %17 = vector.load %arg6[%c0_12, %c0_13] : memref<128x128xbf16, #tpu.memory_space<vmem>>, vector<128x128xbf16>
    %cst_14 = arith.constant dense<0.000000e+00> : vector<256x128xf32>
    %18 = tpu.matmul %16, %17, %cst_14 {dimension_numbers = #tpu.dot_dimension_numbers<[1], [0], [0], [1], [0, 0, 1, 1], [], []>} : vector<256x128xbf16>, vector<128x128xbf16>, vector<256x128xf32> -> vector<256x128xf32>
    %c0_15 = arith.constant 0 : index
    %c0_16 = arith.constant 0 : index
    %19 = vector.load %arg7[%c0_15, %c0_16] : memref<1x128xf32, #tpu.memory_space<vmem>>, vector<1x128xf32>
    %20 = vector.broadcast %19 : vector<1x128xf32> to vector<256x128xf32>
    %21 = arith.addf %18, %20 : vector<256x128xf32>
    %22 = arith.truncf %21 : vector<256x128xf32> to vector<256x128xbf16>
    %c0_17 = arith.constant 0 : index
    %c0_18 = arith.constant 0 : index
    %23 = vector.load %arg8[%c0_17, %c0_18] : memref<256x128xbf16, #tpu.memory_space<vmem>>, vector<256x128xbf16>
    tpu.vector_store %arg8[%c0_17, %c0_18], %22 {strides = array<i32>} : memref<256x128xbf16, #tpu.memory_space<vmem>>, vector<256x128xbf16>,
    return
  }
  func.func @transform_0(%arg0: i32) -> (i32, i32) {
    %c0_i32 = arith.constant 0 : i32
    %c0_i32_0 = arith.constant 0 : i32
    return %arg0, %c0_i32 : i32, i32
  }
  func.func @transform_1(%arg0: i32) -> (i32, i32) {
    %c0_i32 = arith.constant 0 : i32
    %c0_i32_0 = arith.constant 0 : i32
    %c0_i32_1 = arith.constant 0 : i32
    return %c0_i32, %c0_i32_0 : i32, i32
  }
  func.func @transform_2(%arg0: i32) -> (i32, i32) {
    %c0_i32 = arith.constant 0 : i32
    %c0_i32_0 = arith.constant 0 : i32
    %c0_i32_1 = arith.constant 0 : i32
    return %c0_i32, %c0_i32_0 : i32, i32
  }
  func.func @transform_3(%arg0: i32) -> (i32, i32) {
    %c0_i32 = arith.constant 0 : i32
    %c0_i32_0 = arith.constant 0 : i32
    %c0_i32_1 = arith.constant 0 : i32
    return %c0_i32, %c0_i32_0 : i32, i32
  }
  func.func @transform_4(%arg0: i32) -> (i32, i32) {
    %c0_i32 = arith.constant 0 : i32
    %c0_i32_0 = arith.constant 0 : i32
    %c0_i32_1 = arith.constant 0 : i32
    return %c0_i32, %c0_i32_0 : i32, i32
  }
  func.func @transform_5(%arg0: i32) -> (i32, i32) {
    %c0_i32 = arith.constant 0 : i32
    %c0_i32_0 = arith.constant 0 : i32
    %c0_i32_1 = arith.constant 0 : i32
    return %c0_i32, %c0_i32_0 : i32, i32
  }
  func.func @transform_6(%arg0: i32) -> (i32, i32) {
    %c0_i32 = arith.constant 0 : i32
    %c0_i32_0 = arith.constant 0 : i32
    %c0_i32_1 = arith.constant 0 : i32
    return %c0_i32, %c0_i32_0 : i32, i32
  }
  func.func @transform_7(%arg0: i32) -> (i32, i32) {
    %c0_i32 = arith.constant 0 : i32
    %c0_i32_0 = arith.constant 0 : i32
    return %arg0, %c0_i32 : i32, i32
  }
}

module attributes {stable_mosaic.version = 11 : i64} {
  func.func @mlp3_kernel(%arg0: i32, %arg1: memref<256x128xbf16, #tpu.memory_space<vmem>>, %arg2: memref<128x128xbf16, #tpu.memory_space<vmem>>, %arg3: memref<1x128xf32, #tpu.memory_space<vmem>>, %arg4: memref<128x128xbf16, #tpu.memory_space<vmem>>, %arg5: memref<1x128xf32, #tpu.memory_space<vmem>>, %arg6: memref<128x128xbf16, #tpu.memory_space<vmem>>, %arg7: memref<1x128xf32, #tpu.memory_space<vmem>>, %arg8: memref<256x128xbf16, #tpu.memory_space<vmem>>) attributes {dimension_semantics = [#tpu.dimension_semantics<parallel>], iteration_bounds = array<i64: 2>, scalar_prefetch = 0 : i64, scratch_operands = 0 : i64, tpu.core_type = #tpu.core_type<tc>, window_params = [{transform_indices = @transform_0, window_bounds = array<i64: 256, 128>}, {pipeline_mode = #tpu.pipeline_mode<synchronous>, transform_indices = @transform_1, window_bounds = array<i64: 128, 128>}, {pipeline_mode = #tpu.pipeline_mode<synchronous>, transform_indices = @transform_2, window_bounds = array<i64: 1, 128>}, {pipeline_mode = #tpu.pipeline_mode<synchronous>, transform_indices = @transform_3, window_bounds = array<i64: 128, 128>}, {pipeline_mode = #tpu.pipeline_mode<synchronous>, transform_indices = @transform_4, window_bounds = array<i64: 1, 128>}, {pipeline_mode = #tpu.pipeline_mode<synchronous>, transform_indices = @transform_5, window_bounds = array<i64: 128, 128>}, {pipeline_mode = #tpu.pipeline_mode<synchronous>, transform_indices = @transform_6, window_bounds = array<i64: 1, 128>}, {transform_indices = @transform_7, window_bounds = array<i64: 256, 128>}]} {
    %c0 = arith.constant 0 : index
    %c0_0 = arith.constant 0 : index
    %0 = vector.load %arg1[%c0, %c0_0] : memref<256x128xbf16, #tpu.memory_space<vmem>>, vector<256x128xbf16>
    %c0_1 = arith.constant 0 : index
    %c0_2 = arith.constant 0 : index
    %1 = vector.load %arg2[%c0_1, %c0_2] : memref<128x128xbf16, #tpu.memory_space<vmem>>, vector<128x128xbf16>
    %cst = arith.constant dense<0.000000e+00> : vector<256x128xf32>
    %2 = tpu.matmul %0, %1, %cst {dimension_numbers = #tpu.dot_dimension_numbers<[1], [0], [0], [1], [0, 0, 1, 1], [], []>} : vector<256x128xbf16>, vector<128x128xbf16>, vector<256x128xf32> -> vector<256x128xf32>
    %c0_3 = arith.constant 0 : index
    %c0_4 = arith.constant 0 : index
    %3 = vector.load %arg3[%c0_3, %c0_4] : memref<1x128xf32, #tpu.memory_space<vmem>>, vector<1x128xf32>
    %4 = vector.broadcast %3 : vector<1x128xf32> to vector<256x128xf32>
    %5 = arith.addf %2, %4 : vector<256x128xf32>
    %cst_5 = arith.constant 0.000000e+00 : f32
    %6 = vector.broadcast %cst_5 : f32 to vector<256x128xf32>
    %7 = arith.maximumf %5, %6 : vector<256x128xf32>
    %8 = arith.truncf %7 : vector<256x128xf32> to vector<256x128xbf16>
    %c0_6 = arith.constant 0 : index
    %c0_7 = arith.constant 0 : index
    %9 = vector.load %arg4[%c0_6, %c0_7] : memref<128x128xbf16, #tpu.memory_space<vmem>>, vector<128x128xbf16>
    %cst_8 = arith.constant dense<0.000000e+00> : vector<256x128xf32>
    %10 = tpu.matmul %8, %9, %cst_8 {dimension_numbers = #tpu.dot_dimension_numbers<[1], [0], [0], [1], [0, 0, 1, 1], [], []>} : vector<256x128xbf16>, vector<128x128xbf16>, vector<256x128xf32> -> vector<256x128xf32>
    %c0_9 = arith.constant 0 : index
    %c0_10 = arith.constant 0 : index
    %11 = vector.load %arg5[%c0_9, %c0_10] : memref<1x128xf32, #tpu.memory_space<vmem>>, vector<1x128xf32>
    %12 = vector.broadcast %11 : vector<1x128xf32> to vector<256x128xf32>
    %13 = arith.addf %10, %12 : vector<256x128xf32>
    %cst_11 = arith.constant 0.000000e+00 : f32
    %14 = vector.broadcast %cst_11 : f32 to vector<256x128xf32>
    %15 = arith.maximumf %13, %14 : vector<256x128xf32>
    %16 = arith.truncf %15 : vector<256x128xf32> to vector<256x128xbf16>
    %c0_12 = arith.constant 0 : index
    %c0_13 = arith.constant 0 : index
    %17 = vector.load %arg6[%c0_12, %c0_13] : memref<128x128xbf16, #tpu.memory_space<vmem>>, vector<128x128xbf16>
    %cst_14 = arith.constant dense<0.000000e+00> : vector<256x128xf32>
    %18 = tpu.matmul %16, %17, %cst_14 {dimension_numbers = #tpu.dot_dimension_numbers<[1], [0], [0], [1], [0, 0, 1, 1], [], []>} : vector<256x128xbf16>, vector<128x128xbf16>, vector<256x128xf32> -> vector<256x128xf32>
    %c0_15 = arith.constant 0 : index
    %c0_16 = arith.constant 0 : index
    %19 = vector.load %arg7[%c0_15, %c0_16] : memref<1x128xf32, #tpu.memory_space<vmem>>, vector<1x128xf32>
    %20 = vector.broadcast %19 : vector<1x128xf32> to vector<256x128xf32>
    %21 = arith.addf %18, %20 : vector<256x128xf32>
    %22 = arith.truncf %21 : vector<256x128xf32> to vector<256x128xbf16>
    %c0_17 = arith.constant 0 : index
    %c0_18 = arith.constant 0 : index
    %23 = vector.load %arg8[%c0_17, %c0_18] : memref<256x128xbf16, #tpu.memory_space<vmem>>, vector<256x128xbf16>
    tpu.vector_store %arg8[%c0_17, %c0_18], %22 {strides = array<i32>} : memref<256x128xbf16, #tpu.memory_space<vmem>>, vector<256x128xbf16>,
    return
  }
  func.func @transform_0(%arg0: i32) -> (i32, i32) {
    %c0_i32 = arith.constant 0 : i32
    %c0_i32_0 = arith.constant 0 : i32
    return %arg0, %c0_i32 : i32, i32
  }
  func.func @transform_1(%arg0: i32) -> (i32, i32) {
    %c0_i32 = arith.constant 0 : i32
    %c0_i32_0 = arith.constant 0 : i32
    %c0_i32_1 = arith.constant 0 : i32
    return %c0_i32, %c0_i32_0 : i32, i32
  }
  func.func @transform_2(%arg0: i32) -> (i32, i32) {
    %c0_i32 = arith.constant 0 : i32
    %c0_i32_0 = arith.constant 0 : i32
    %c0_i32_1 = arith.constant 0 : i32
    return %c0_i32, %c0_i32_0 : i32, i32
  }
  func.func @transform_3(%arg0: i32) -> (i32, i32) {
    %c0_i32 = arith.constant 0 : i32
    %c0_i32_0 = arith.constant 0 : i32
    %c0_i32_1 = arith.constant 0 : i32
    return %c0_i32, %c0_i32_0 : i32, i32
  }
  func.func @transform_4(%arg0: i32) -> (i32, i32) {
    %c0_i32 = arith.constant 0 : i32
    %c0_i32_0 = arith.constant 0 : i32
    %c0_i32_1 = arith.constant 0 : i32
    return %c0_i32, %c0_i32_0 : i32, i32
  }
  func.func @transform_5(%arg0: i32) -> (i32, i32) {
    %c0_i32 = arith.constant 0 : i32
    %c0_i32_0 = arith.constant 0 : i32
    %c0_i32_1 = arith.constant 0 : i32
    return %c0_i32, %c0_i32_0 : i32, i32
  }
  func.func @transform_6(%arg0: i32) -> (i32, i32) {
    %c0_i32 = arith.constant 0 : i32
    %c0_i32_0 = arith.constant 0 : i32
    %c0_i32_1 = arith.constant 0 : i32
    return %c0_i32, %c0_i32_0 : i32, i32
  }
  func.func @transform_7(%arg0: i32) -> (i32, i32) {
    %c0_i32 = arith.constant 0 : i32
    %c0_i32_0 = arith.constant 0 : i32
    return %arg0, %c0_i32 : i32, i32
  }
}

module attributes {stable_mosaic.version = 11 : i64} {
  func.func @node_update_kernel(%arg0: i32, %arg1: memref<256x128xbf16, #tpu.memory_space<vmem>>, %arg2: memref<256x128xbf16, #tpu.memory_space<vmem>>, %arg3: memref<128x128xbf16, #tpu.memory_space<vmem>>, %arg4: memref<128x128xbf16, #tpu.memory_space<vmem>>, %arg5: memref<1x128xf32, #tpu.memory_space<vmem>>, %arg6: memref<128x128xbf16, #tpu.memory_space<vmem>>, %arg7: memref<1x128xf32, #tpu.memory_space<vmem>>, %arg8: memref<128x128xbf16, #tpu.memory_space<vmem>>, %arg9: memref<1x128xf32, #tpu.memory_space<vmem>>, %arg10: memref<256x128xbf16, #tpu.memory_space<vmem>>) attributes {dimension_semantics = [#tpu.dimension_semantics<parallel>], iteration_bounds = array<i64: 1>, scalar_prefetch = 0 : i64, scratch_operands = 0 : i64, tpu.core_type = #tpu.core_type<tc>, window_params = [{transform_indices = @transform_0, window_bounds = array<i64: 256, 128>}, {transform_indices = @transform_1, window_bounds = array<i64: 256, 128>}, {pipeline_mode = #tpu.pipeline_mode<synchronous>, transform_indices = @transform_2, window_bounds = array<i64: 128, 128>}, {pipeline_mode = #tpu.pipeline_mode<synchronous>, transform_indices = @transform_3, window_bounds = array<i64: 128, 128>}, {pipeline_mode = #tpu.pipeline_mode<synchronous>, transform_indices = @transform_4, window_bounds = array<i64: 1, 128>}, {pipeline_mode = #tpu.pipeline_mode<synchronous>, transform_indices = @transform_5, window_bounds = array<i64: 128, 128>}, {pipeline_mode = #tpu.pipeline_mode<synchronous>, transform_indices = @transform_6, window_bounds = array<i64: 1, 128>}, {pipeline_mode = #tpu.pipeline_mode<synchronous>, transform_indices = @transform_7, window_bounds = array<i64: 128, 128>}, {pipeline_mode = #tpu.pipeline_mode<synchronous>, transform_indices = @transform_8, window_bounds = array<i64: 1, 128>}, {transform_indices = @transform_9, window_bounds = array<i64: 256, 128>}]} {
    %c0 = arith.constant 0 : index
    %c0_0 = arith.constant 0 : index
    %0 = vector.load %arg1[%c0, %c0_0] : memref<256x128xbf16, #tpu.memory_space<vmem>>, vector<256x128xbf16>
    %c0_1 = arith.constant 0 : index
    %c0_2 = arith.constant 0 : index
    %1 = vector.load %arg3[%c0_1, %c0_2] : memref<128x128xbf16, #tpu.memory_space<vmem>>, vector<128x128xbf16>
    %cst = arith.constant dense<0.000000e+00> : vector<256x128xf32>
    %2 = tpu.matmul %0, %1, %cst {dimension_numbers = #tpu.dot_dimension_numbers<[1], [0], [0], [1], [0, 0, 1, 1], [], []>} : vector<256x128xbf16>, vector<128x128xbf16>, vector<256x128xf32> -> vector<256x128xf32>
    %c0_3 = arith.constant 0 : index
    %c0_4 = arith.constant 0 : index
    %3 = vector.load %arg2[%c0_3, %c0_4] : memref<256x128xbf16, #tpu.memory_space<vmem>>, vector<256x128xbf16>
    %c0_5 = arith.constant 0 : index
    %c0_6 = arith.constant 0 : index
    %4 = vector.load %arg4[%c0_5, %c0_6] : memref<128x128xbf16, #tpu.memory_space<vmem>>, vector<128x128xbf16>
    %cst_7 = arith.constant dense<0.000000e+00> : vector<256x128xf32>
    %5 = tpu.matmul %3, %4, %cst_7 {dimension_numbers = #tpu.dot_dimension_numbers<[1], [0], [0], [1], [0, 0, 1, 1], [], []>} : vector<256x128xbf16>, vector<128x128xbf16>, vector<256x128xf32> -> vector<256x128xf32>
    %6 = arith.addf %2, %5 : vector<256x128xf32>
    %c0_8 = arith.constant 0 : index
    %c0_9 = arith.constant 0 : index
    %7 = vector.load %arg5[%c0_8, %c0_9] : memref<1x128xf32, #tpu.memory_space<vmem>>, vector<1x128xf32>
    %8 = vector.broadcast %7 : vector<1x128xf32> to vector<256x128xf32>
    %9 = arith.addf %6, %8 : vector<256x128xf32>
    %cst_10 = arith.constant 0.000000e+00 : f32
    %10 = vector.broadcast %cst_10 : f32 to vector<256x128xf32>
    %11 = arith.maximumf %9, %10 : vector<256x128xf32>
    %12 = arith.truncf %11 : vector<256x128xf32> to vector<256x128xbf16>
    %c0_11 = arith.constant 0 : index
    %c0_12 = arith.constant 0 : index
    %13 = vector.load %arg6[%c0_11, %c0_12] : memref<128x128xbf16, #tpu.memory_space<vmem>>, vector<128x128xbf16>
    %cst_13 = arith.constant dense<0.000000e+00> : vector<256x128xf32>
    %14 = tpu.matmul %12, %13, %cst_13 {dimension_numbers = #tpu.dot_dimension_numbers<[1], [0], [0], [1], [0, 0, 1, 1], [], []>} : vector<256x128xbf16>, vector<128x128xbf16>, vector<256x128xf32> -> vector<256x128xf32>
    %c0_14 = arith.constant 0 : index
    %c0_15 = arith.constant 0 : index
    %15 = vector.load %arg7[%c0_14, %c0_15] : memref<1x128xf32, #tpu.memory_space<vmem>>, vector<1x128xf32>
    %16 = vector.broadcast %15 : vector<1x128xf32> to vector<256x128xf32>
    %17 = arith.addf %14, %16 : vector<256x128xf32>
    %cst_16 = arith.constant 0.000000e+00 : f32
    %18 = vector.broadcast %cst_16 : f32 to vector<256x128xf32>
    %19 = arith.maximumf %17, %18 : vector<256x128xf32>
    %20 = arith.truncf %19 : vector<256x128xf32> to vector<256x128xbf16>
    %c0_17 = arith.constant 0 : index
    %c0_18 = arith.constant 0 : index
    %21 = vector.load %arg8[%c0_17, %c0_18] : memref<128x128xbf16, #tpu.memory_space<vmem>>, vector<128x128xbf16>
    %cst_19 = arith.constant dense<0.000000e+00> : vector<256x128xf32>
    %22 = tpu.matmul %20, %21, %cst_19 {dimension_numbers = #tpu.dot_dimension_numbers<[1], [0], [0], [1], [0, 0, 1, 1], [], []>} : vector<256x128xbf16>, vector<128x128xbf16>, vector<256x128xf32> -> vector<256x128xf32>
    %c0_20 = arith.constant 0 : index
    %c0_21 = arith.constant 0 : index
    %23 = vector.load %arg9[%c0_20, %c0_21] : memref<1x128xf32, #tpu.memory_space<vmem>>, vector<1x128xf32>
    %24 = vector.broadcast %23 : vector<1x128xf32> to vector<256x128xf32>
    %25 = arith.addf %22, %24 : vector<256x128xf32>
    %26 = arith.truncf %25 : vector<256x128xf32> to vector<256x128xbf16>
    %c0_22 = arith.constant 0 : index
    %c0_23 = arith.constant 0 : index
    %27 = vector.load %arg10[%c0_22, %c0_23] : memref<256x128xbf16, #tpu.memory_space<vmem>>, vector<256x128xbf16>
    tpu.vector_store %arg10[%c0_22, %c0_23], %26 {strides = array<i32>} : memref<256x128xbf16, #tpu.memory_space<vmem>>, vector<256x128xbf16>,
    return
  }
  func.func @transform_0(%arg0: i32) -> (i32, i32) {
    %c0_i32 = arith.constant 0 : i32
    %c0_i32_0 = arith.constant 0 : i32
    return %arg0, %c0_i32 : i32, i32
  }
  func.func @transform_1(%arg0: i32) -> (i32, i32) {
    %c0_i32 = arith.constant 0 : i32
    %c0_i32_0 = arith.constant 0 : i32
    return %arg0, %c0_i32 : i32, i32
  }
  func.func @transform_2(%arg0: i32) -> (i32, i32) {
    %c0_i32 = arith.constant 0 : i32
    %c0_i32_0 = arith.constant 0 : i32
    %c0_i32_1 = arith.constant 0 : i32
    return %c0_i32, %c0_i32_0 : i32, i32
  }
  func.func @transform_3(%arg0: i32) -> (i32, i32) {
    %c0_i32 = arith.constant 0 : i32
    %c0_i32_0 = arith.constant 0 : i32
    %c0_i32_1 = arith.constant 0 : i32
    return %c0_i32, %c0_i32_0 : i32, i32
  }
  func.func @transform_4(%arg0: i32) -> (i32, i32) {
    %c0_i32 = arith.constant 0 : i32
    %c0_i32_0 = arith.constant 0 : i32
    %c0_i32_1 = arith.constant 0 : i32
    return %c0_i32, %c0_i32_0 : i32, i32
  }
  func.func @transform_5(%arg0: i32) -> (i32, i32) {
    %c0_i32 = arith.constant 0 : i32
    %c0_i32_0 = arith.constant 0 : i32
    %c0_i32_1 = arith.constant 0 : i32
    return %c0_i32, %c0_i32_0 : i32, i32
  }
  func.func @transform_6(%arg0: i32) -> (i32, i32) {
    %c0_i32 = arith.constant 0 : i32
    %c0_i32_0 = arith.constant 0 : i32
    %c0_i32_1 = arith.constant 0 : i32
    return %c0_i32, %c0_i32_0 : i32, i32
  }
  func.func @transform_7(%arg0: i32) -> (i32, i32) {
    %c0_i32 = arith.constant 0 : i32
    %c0_i32_0 = arith.constant 0 : i32
    %c0_i32_1 = arith.constant 0 : i32
    return %c0_i32, %c0_i32_0 : i32, i32
  }
  func.func @transform_8(%arg0: i32) -> (i32, i32) {
    %c0_i32 = arith.constant 0 : i32
    %c0_i32_0 = arith.constant 0 : i32
    %c0_i32_1 = arith.constant 0 : i32
    return %c0_i32, %c0_i32_0 : i32, i32
  }
  func.func @transform_9(%arg0: i32) -> (i32, i32) {
    %c0_i32 = arith.constant 0 : i32
    %c0_i32_0 = arith.constant 0 : i32
    return %arg0, %c0_i32 : i32, i32
  }
}

module attributes {stable_mosaic.version = 11 : i64} {
  func.func @edge_msg_agg_kernel(%arg0: i32, %arg1: memref<256x128xbf16, #tpu.memory_space<vmem>>, %arg2: memref<256x128xbf16, #tpu.memory_space<vmem>>, %arg3: memref<256x128xbf16, #tpu.memory_space<vmem>>, %arg4: memref<256x256xbf16, #tpu.memory_space<vmem>>, %arg5: memref<256x1xf32, #tpu.memory_space<vmem>>, %arg6: memref<128x128xbf16, #tpu.memory_space<vmem>>, %arg7: memref<128x128xbf16, #tpu.memory_space<vmem>>, %arg8: memref<128x128xbf16, #tpu.memory_space<vmem>>, %arg9: memref<1x128xf32, #tpu.memory_space<vmem>>, %arg10: memref<128x128xbf16, #tpu.memory_space<vmem>>, %arg11: memref<1x128xf32, #tpu.memory_space<vmem>>, %arg12: memref<128x128xbf16, #tpu.memory_space<vmem>>, %arg13: memref<1x128xf32, #tpu.memory_space<vmem>>, %arg14: memref<128x128xbf16, #tpu.memory_space<vmem>>, %arg15: memref<128x128xbf16, #tpu.memory_space<vmem>>, %arg16: memref<1x128xf32, #tpu.memory_space<vmem>>, %arg17: memref<128x128xbf16, #tpu.memory_space<vmem>>, %arg18: memref<1x128xf32, #tpu.memory_space<vmem>>, %arg19: memref<128x128xbf16, #tpu.memory_space<vmem>>, %arg20: memref<1x128xf32, #tpu.memory_space<vmem>>, %arg21: memref<256x128xbf16, #tpu.memory_space<vmem>>, %arg22: memref<256x128xbf16, #tpu.memory_space<vmem>>, %arg23: memref<256x128xf32, #tpu.memory_space<vmem>>) attributes {dimension_semantics = [#tpu.dimension_semantics<arbitrary>], iteration_bounds = array<i64: 2>, scalar_prefetch = 0 : i64, scratch_operands = 1 : i64, tpu.core_type = #tpu.core_type<tc>, window_params = [{transform_indices = @transform_0, window_bounds = array<i64: 256, 128>}, {transform_indices = @transform_1, window_bounds = array<i64: 256, 128>}, {transform_indices = @transform_2, window_bounds = array<i64: 256, 128>}, {transform_indices = @transform_3, window_bounds = array<i64: 256, 256>}, {pipeline_mode = #tpu.pipeline_mode<synchronous>, transform_indices = @transform_4, window_bounds = array<i64: 256, 1>}, {pipeline_mode = #tpu.pipeline_mode<synchronous>, transform_indices = @transform_5, window_bounds = array<i64: 128, 128>}, {pipeline_mode = #tpu.pipeline_mode<synchronous>, transform_indices = @transform_6, window_bounds = array<i64: 128, 128>}, {pipeline_mode = #tpu.pipeline_mode<synchronous>, transform_indices = @transform_7, window_bounds = array<i64: 128, 128>}, {pipeline_mode = #tpu.pipeline_mode<synchronous>, transform_indices = @transform_8, window_bounds = array<i64: 1, 128>}, {pipeline_mode = #tpu.pipeline_mode<synchronous>, transform_indices = @transform_9, window_bounds = array<i64: 128, 128>}, {pipeline_mode = #tpu.pipeline_mode<synchronous>, transform_indices = @transform_10, window_bounds = array<i64: 1, 128>}, {pipeline_mode = #tpu.pipeline_mode<synchronous>, transform_indices = @transform_11, window_bounds = array<i64: 128, 128>}, {pipeline_mode = #tpu.pipeline_mode<synchronous>, transform_indices = @transform_12, window_bounds = array<i64: 1, 128>}, {pipeline_mode = #tpu.pipeline_mode<synchronous>, transform_indices = @transform_13, window_bounds = array<i64: 128, 128>}, {pipeline_mode = #tpu.pipeline_mode<synchronous>, transform_indices = @transform_14, window_bounds = array<i64: 128, 128>}, {pipeline_mode = #tpu.pipeline_mode<synchronous>, transform_indices = @transform_15, window_bounds = array<i64: 1, 128>}, {pipeline_mode = #tpu.pipeline_mode<synchronous>, transform_indices = @transform_16, window_bounds = array<i64: 128, 128>}, {pipeline_mode = #tpu.pipeline_mode<synchronous>, transform_indices = @transform_17, window_bounds = array<i64: 1, 128>}, {pipeline_mode = #tpu.pipeline_mode<synchronous>, transform_indices = @transform_18, window_bounds = array<i64: 128, 128>}, {pipeline_mode = #tpu.pipeline_mode<synchronous>, transform_indices = @transform_19, window_bounds = array<i64: 1, 128>}, {transform_indices = @transform_20, window_bounds = array<i64: 256, 128>}, {pipeline_mode = #tpu.pipeline_mode<synchronous>, transform_indices = @transform_21, window_bounds = array<i64: 256, 128>}]} {
    %c0_i32 = arith.constant 0 : i32
    %0 = arith.cmpi eq, %arg0, %c0_i32 : i32
    %1 = arith.extui %0 : i1 to i32
    %c0_i32_0 = arith.constant 0 : i32
    %2 = arith.cmpi ne, %1, %c0_i32_0 : i32
    scf.if %2 {
      %cst_60 = arith.constant 0.000000e+00 : f32
      %69 = vector.broadcast %cst_60 : f32 to vector<256x128xf32>
      %c0_61 = arith.constant 0 : index
      %c0_62 = arith.constant 0 : index
      %70 = vector.load %arg23[%c0_61, %c0_62] : memref<256x128xf32, #tpu.memory_space<vmem>>, vector<256x128xf32>
      tpu.vector_store %arg23[%c0_61, %c0_62], %69 {strides = array<i32>} : memref<256x128xf32, #tpu.memory_space<vmem>>, vector<256x128xf32>,
    } else {
    }
    %c0 = arith.constant 0 : index
    %c0_1 = arith.constant 0 : index
    %3 = vector.load %arg1[%c0, %c0_1] : memref<256x128xbf16, #tpu.memory_space<vmem>>, vector<256x128xbf16>
    %c0_2 = arith.constant 0 : index
    %c0_3 = arith.constant 0 : index
    %4 = vector.load %arg6[%c0_2, %c0_3] : memref<128x128xbf16, #tpu.memory_space<vmem>>, vector<128x128xbf16>
    %cst = arith.constant dense<0.000000e+00> : vector<256x128xf32>
    %5 = tpu.matmul %3, %4, %cst {dimension_numbers = #tpu.dot_dimension_numbers<[1], [0], [0], [1], [0, 0, 1, 1], [], []>} : vector<256x128xbf16>, vector<128x128xbf16>, vector<256x128xf32> -> vector<256x128xf32>
    %c0_4 = arith.constant 0 : index
    %c0_5 = arith.constant 0 : index
    %6 = vector.load %arg2[%c0_4, %c0_5] : memref<256x128xbf16, #tpu.memory_space<vmem>>, vector<256x128xbf16>
    %c0_6 = arith.constant 0 : index
    %c0_7 = arith.constant 0 : index
    %7 = vector.load %arg7[%c0_6, %c0_7] : memref<128x128xbf16, #tpu.memory_space<vmem>>, vector<128x128xbf16>
    %cst_8 = arith.constant dense<0.000000e+00> : vector<256x128xf32>
    %8 = tpu.matmul %6, %7, %cst_8 {dimension_numbers = #tpu.dot_dimension_numbers<[1], [0], [0], [1], [0, 0, 1, 1], [], []>} : vector<256x128xbf16>, vector<128x128xbf16>, vector<256x128xf32> -> vector<256x128xf32>
    %9 = arith.addf %5, %8 : vector<256x128xf32>
    %c0_9 = arith.constant 0 : index
    %c0_10 = arith.constant 0 : index
    %10 = vector.load %arg3[%c0_9, %c0_10] : memref<256x128xbf16, #tpu.memory_space<vmem>>, vector<256x128xbf16>
    %c0_11 = arith.constant 0 : index
    %c0_12 = arith.constant 0 : index
    %11 = vector.load %arg8[%c0_11, %c0_12] : memref<128x128xbf16, #tpu.memory_space<vmem>>, vector<128x128xbf16>
    %cst_13 = arith.constant dense<0.000000e+00> : vector<256x128xf32>
    %12 = tpu.matmul %10, %11, %cst_13 {dimension_numbers = #tpu.dot_dimension_numbers<[1], [0], [0], [1], [0, 0, 1, 1], [], []>} : vector<256x128xbf16>, vector<128x128xbf16>, vector<256x128xf32> -> vector<256x128xf32>
    %13 = arith.addf %9, %12 : vector<256x128xf32>
    %c0_14 = arith.constant 0 : index
    %c0_15 = arith.constant 0 : index
    %14 = vector.load %arg9[%c0_14, %c0_15] : memref<1x128xf32, #tpu.memory_space<vmem>>, vector<1x128xf32>
    %15 = vector.broadcast %14 : vector<1x128xf32> to vector<256x128xf32>
    %16 = arith.addf %13, %15 : vector<256x128xf32>
    %cst_16 = arith.constant 0.000000e+00 : f32
    %17 = vector.broadcast %cst_16 : f32 to vector<256x128xf32>
    %18 = arith.maximumf %16, %17 : vector<256x128xf32>
    %19 = arith.truncf %18 : vector<256x128xf32> to vector<256x128xbf16>
    %c0_17 = arith.constant 0 : index
    %c0_18 = arith.constant 0 : index
    %20 = vector.load %arg10[%c0_17, %c0_18] : memref<128x128xbf16, #tpu.memory_space<vmem>>, vector<128x128xbf16>
    %cst_19 = arith.constant dense<0.000000e+00> : vector<256x128xf32>
    %21 = tpu.matmul %19, %20, %cst_19 {dimension_numbers = #tpu.dot_dimension_numbers<[1], [0], [0], [1], [0, 0, 1, 1], [], []>} : vector<256x128xbf16>, vector<128x128xbf16>, vector<256x128xf32> -> vector<256x128xf32>
    %c0_20 = arith.constant 0 : index
    %c0_21 = arith.constant 0 : index
    %22 = vector.load %arg11[%c0_20, %c0_21] : memref<1x128xf32, #tpu.memory_space<vmem>>, vector<1x128xf32>
    %23 = vector.broadcast %22 : vector<1x128xf32> to vector<256x128xf32>
    %24 = arith.addf %21, %23 : vector<256x128xf32>
    %cst_22 = arith.constant 0.000000e+00 : f32
    %25 = vector.broadcast %cst_22 : f32 to vector<256x128xf32>
    %26 = arith.maximumf %24, %25 : vector<256x128xf32>
    %27 = arith.truncf %26 : vector<256x128xf32> to vector<256x128xbf16>
    %c0_23 = arith.constant 0 : index
    %c0_24 = arith.constant 0 : index
    %28 = vector.load %arg12[%c0_23, %c0_24] : memref<128x128xbf16, #tpu.memory_space<vmem>>, vector<128x128xbf16>
    %cst_25 = arith.constant dense<0.000000e+00> : vector<256x128xf32>
    %29 = tpu.matmul %27, %28, %cst_25 {dimension_numbers = #tpu.dot_dimension_numbers<[1], [0], [0], [1], [0, 0, 1, 1], [], []>} : vector<256x128xbf16>, vector<128x128xbf16>, vector<256x128xf32> -> vector<256x128xf32>
    %c0_26 = arith.constant 0 : index
    %c0_27 = arith.constant 0 : index
    %30 = vector.load %arg13[%c0_26, %c0_27] : memref<1x128xf32, #tpu.memory_space<vmem>>, vector<1x128xf32>
    %31 = vector.broadcast %30 : vector<1x128xf32> to vector<256x128xf32>
    %32 = arith.addf %29, %31 : vector<256x128xf32>
    %33 = arith.truncf %32 : vector<256x128xf32> to vector<256x128xbf16>
    %c0_28 = arith.constant 0 : index
    %c0_29 = arith.constant 0 : index
    %34 = vector.load %arg21[%c0_28, %c0_29] : memref<256x128xbf16, #tpu.memory_space<vmem>>, vector<256x128xbf16>
    tpu.vector_store %arg21[%c0_28, %c0_29], %33 {strides = array<i32>} : memref<256x128xbf16, #tpu.memory_space<vmem>>, vector<256x128xbf16>,
    %c0_30 = arith.constant 0 : index
    %c0_31 = arith.constant 0 : index
    %35 = vector.load %arg1[%c0_30, %c0_31] : memref<256x128xbf16, #tpu.memory_space<vmem>>, vector<256x128xbf16>
    %c0_32 = arith.constant 0 : index
    %c0_33 = arith.constant 0 : index
    %36 = vector.load %arg14[%c0_32, %c0_33] : memref<128x128xbf16, #tpu.memory_space<vmem>>, vector<128x128xbf16>
    %cst_34 = arith.constant dense<0.000000e+00> : vector<256x128xf32>
    %37 = tpu.matmul %35, %36, %cst_34 {dimension_numbers = #tpu.dot_dimension_numbers<[1], [0], [0], [1], [0, 0, 1, 1], [], []>} : vector<256x128xbf16>, vector<128x128xbf16>, vector<256x128xf32> -> vector<256x128xf32>
    %c0_35 = arith.constant 0 : index
    %c0_36 = arith.constant 0 : index
    %38 = vector.load %arg15[%c0_35, %c0_36] : memref<128x128xbf16, #tpu.memory_space<vmem>>, vector<128x128xbf16>
    %cst_37 = arith.constant dense<0.000000e+00> : vector<256x128xf32>
    %39 = tpu.matmul %33, %38, %cst_37 {dimension_numbers = #tpu.dot_dimension_numbers<[1], [0], [0], [1], [0, 0, 1, 1], [], []>} : vector<256x128xbf16>, vector<128x128xbf16>, vector<256x128xf32> -> vector<256x128xf32>
    %40 = arith.addf %37, %39 : vector<256x128xf32>
    %c0_38 = arith.constant 0 : index
    %c0_39 = arith.constant 0 : index
    %41 = vector.load %arg16[%c0_38, %c0_39] : memref<1x128xf32, #tpu.memory_space<vmem>>, vector<1x128xf32>
    %42 = vector.broadcast %41 : vector<1x128xf32> to vector<256x128xf32>
    %43 = arith.addf %40, %42 : vector<256x128xf32>
    %cst_40 = arith.constant 0.000000e+00 : f32
    %44 = vector.broadcast %cst_40 : f32 to vector<256x128xf32>
    %45 = arith.maximumf %43, %44 : vector<256x128xf32>
    %46 = arith.truncf %45 : vector<256x128xf32> to vector<256x128xbf16>
    %c0_41 = arith.constant 0 : index
    %c0_42 = arith.constant 0 : index
    %47 = vector.load %arg17[%c0_41, %c0_42] : memref<128x128xbf16, #tpu.memory_space<vmem>>, vector<128x128xbf16>
    %cst_43 = arith.constant dense<0.000000e+00> : vector<256x128xf32>
    %48 = tpu.matmul %46, %47, %cst_43 {dimension_numbers = #tpu.dot_dimension_numbers<[1], [0], [0], [1], [0, 0, 1, 1], [], []>} : vector<256x128xbf16>, vector<128x128xbf16>, vector<256x128xf32> -> vector<256x128xf32>
    %c0_44 = arith.constant 0 : index
    %c0_45 = arith.constant 0 : index
    %49 = vector.load %arg18[%c0_44, %c0_45] : memref<1x128xf32, #tpu.memory_space<vmem>>, vector<1x128xf32>
    %50 = vector.broadcast %49 : vector<1x128xf32> to vector<256x128xf32>
    %51 = arith.addf %48, %50 : vector<256x128xf32>
    %cst_46 = arith.constant 0.000000e+00 : f32
    %52 = vector.broadcast %cst_46 : f32 to vector<256x128xf32>
    %53 = arith.maximumf %51, %52 : vector<256x128xf32>
    %54 = arith.truncf %53 : vector<256x128xf32> to vector<256x128xbf16>
    %c0_47 = arith.constant 0 : index
    %c0_48 = arith.constant 0 : index
    %55 = vector.load %arg19[%c0_47, %c0_48] : memref<128x128xbf16, #tpu.memory_space<vmem>>, vector<128x128xbf16>
    %cst_49 = arith.constant dense<0.000000e+00> : vector<256x128xf32>
    %56 = tpu.matmul %54, %55, %cst_49 {dimension_numbers = #tpu.dot_dimension_numbers<[1], [0], [0], [1], [0, 0, 1, 1], [], []>} : vector<256x128xbf16>, vector<128x128xbf16>, vector<256x128xf32> -> vector<256x128xf32>
    %c0_50 = arith.constant 0 : index
    %c0_51 = arith.constant 0 : index
    %57 = vector.load %arg20[%c0_50, %c0_51] : memref<1x128xf32, #tpu.memory_space<vmem>>, vector<1x128xf32>
    %58 = vector.broadcast %57 : vector<1x128xf32> to vector<256x128xf32>
    %59 = arith.addf %56, %58 : vector<256x128xf32>
    %60 = arith.truncf %59 : vector<256x128xf32> to vector<256x128xbf16>
    %c0_52 = arith.constant 0 : index
    %c0_53 = arith.constant 0 : index
    %61 = vector.load %arg23[%c0_52, %c0_53] : memref<256x128xf32, #tpu.memory_space<vmem>>, vector<256x128xf32>
    %c0_54 = arith.constant 0 : index
    %c0_55 = arith.constant 0 : index
    %62 = vector.load %arg4[%c0_54, %c0_55] : memref<256x256xbf16, #tpu.memory_space<vmem>>, vector<256x256xbf16>
    %cst_56 = arith.constant dense<0.000000e+00> : vector<256x128xf32>
    %63 = tpu.matmul %62, %60, %cst_56 {dimension_numbers = #tpu.dot_dimension_numbers<[1], [0], [0], [1], [0, 0, 1, 1], [], []>} : vector<256x256xbf16>, vector<256x128xbf16>, vector<256x128xf32> -> vector<256x128xf32>
    %64 = arith.addf %61, %63 : vector<256x128xf32>
    %c0_57 = arith.constant 0 : index
    %c0_58 = arith.constant 0 : index
    %65 = vector.load %arg23[%c0_57, %c0_58] : memref<256x128xf32, #tpu.memory_space<vmem>>, vector<256x128xf32>
    tpu.vector_store %arg23[%c0_57, %c0_58], %64 {strides = array<i32>} : memref<256x128xf32, #tpu.memory_space<vmem>>, vector<256x128xf32>,
    %c1_i32 = arith.constant 1 : i32
    %66 = arith.cmpi eq, %arg0, %c1_i32 : i32
    %67 = arith.extui %66 : i1 to i32
    %c0_i32_59 = arith.constant 0 : i32
    %68 = arith.cmpi ne, %67, %c0_i32_59 : i32
    scf.if %68 {
      %c0_60 = arith.constant 0 : index
      %c0_61 = arith.constant 0 : index
      %69 = vector.load %arg23[%c0_60, %c0_61] : memref<256x128xf32, #tpu.memory_space<vmem>>, vector<256x128xf32>
      %c0_62 = arith.constant 0 : index
      %c0_63 = arith.constant 0 : index
      %70 = vector.load %arg5[%c0_62, %c0_63] : memref<256x1xf32, #tpu.memory_space<vmem>>, vector<256x1xf32>
      %71 = vector.broadcast %70 : vector<256x1xf32> to vector<256x128xf32>
      %72 = arith.mulf %69, %71 : vector<256x128xf32>
      %73 = arith.truncf %72 : vector<256x128xf32> to vector<256x128xbf16>
      %c0_64 = arith.constant 0 : index
      %c0_65 = arith.constant 0 : index
      %74 = vector.load %arg22[%c0_64, %c0_65] : memref<256x128xbf16, #tpu.memory_space<vmem>>, vector<256x128xbf16>
      tpu.vector_store %arg22[%c0_64, %c0_65], %73 {strides = array<i32>} : memref<256x128xbf16, #tpu.memory_space<vmem>>, vector<256x128xbf16>,
    } else {
    }
    return
  }
  func.func @transform_0(%arg0: i32) -> (i32, i32) {
    %c0_i32 = arith.constant 0 : i32
    %c0_i32_0 = arith.constant 0 : i32
    return %arg0, %c0_i32 : i32, i32
  }
  func.func @transform_1(%arg0: i32) -> (i32, i32) {
    %c0_i32 = arith.constant 0 : i32
    %c0_i32_0 = arith.constant 0 : i32
    return %arg0, %c0_i32 : i32, i32
  }
  func.func @transform_2(%arg0: i32) -> (i32, i32) {
    %c0_i32 = arith.constant 0 : i32
    %c0_i32_0 = arith.constant 0 : i32
    return %arg0, %c0_i32 : i32, i32
  }
  func.func @transform_3(%arg0: i32) -> (i32, i32) {
    %c0_i32 = arith.constant 0 : i32
    %c0_i32_0 = arith.constant 0 : i32
    return %c0_i32, %arg0 : i32, i32
  }
  func.func @transform_4(%arg0: i32) -> (i32, i32) {
    %c0_i32 = arith.constant 0 : i32
    %c0_i32_0 = arith.constant 0 : i32
    %c0_i32_1 = arith.constant 0 : i32
    return %c0_i32, %c0_i32_0 : i32, i32
  }
  func.func @transform_5(%arg0: i32) -> (i32, i32) {
    %c0_i32 = arith.constant 0 : i32
    %c0_i32_0 = arith.constant 0 : i32
    %c0_i32_1 = arith.constant 0 : i32
    return %c0_i32, %c0_i32_0 : i32, i32
  }
  func.func @transform_6(%arg0: i32) -> (i32, i32) {
    %c0_i32 = arith.constant 0 : i32
    %c0_i32_0 = arith.constant 0 : i32
    %c0_i32_1 = arith.constant 0 : i32
    return %c0_i32, %c0_i32_0 : i32, i32
  }
  func.func @transform_7(%arg0: i32) -> (i32, i32) {
    %c0_i32 = arith.constant 0 : i32
    %c0_i32_0 = arith.constant 0 : i32
    %c0_i32_1 = arith.constant 0 : i32
    return %c0_i32, %c0_i32_0 : i32, i32
  }
  func.func @transform_8(%arg0: i32) -> (i32, i32) {
    %c0_i32 = arith.constant 0 : i32
    %c0_i32_0 = arith.constant 0 : i32
    %c0_i32_1 = arith.constant 0 : i32
    return %c0_i32, %c0_i32_0 : i32, i32
  }
  func.func @transform_9(%arg0: i32) -> (i32, i32) {
    %c0_i32 = arith.constant 0 : i32
    %c0_i32_0 = arith.constant 0 : i32
    %c0_i32_1 = arith.constant 0 : i32
    return %c0_i32, %c0_i32_0 : i32, i32
  }
  func.func @transform_10(%arg0: i32) -> (i32, i32) {
    %c0_i32 = arith.constant 0 : i32
    %c0_i32_0 = arith.constant 0 : i32
    %c0_i32_1 = arith.constant 0 : i32
    return %c0_i32, %c0_i32_0 : i32, i32
  }
  func.func @transform_11(%arg0: i32) -> (i32, i32) {
    %c0_i32 = arith.constant 0 : i32
    %c0_i32_0 = arith.constant 0 : i32
    %c0_i32_1 = arith.constant 0 : i32
    return %c0_i32, %c0_i32_0 : i32, i32
  }
  func.func @transform_12(%arg0: i32) -> (i32, i32) {
    %c0_i32 = arith.constant 0 : i32
    %c0_i32_0 = arith.constant 0 : i32
    %c0_i32_1 = arith.constant 0 : i32
    return %c0_i32, %c0_i32_0 : i32, i32
  }
  func.func @transform_13(%arg0: i32) -> (i32, i32) {
    %c0_i32 = arith.constant 0 : i32
    %c0_i32_0 = arith.constant 0 : i32
    %c0_i32_1 = arith.constant 0 : i32
    return %c0_i32, %c0_i32_0 : i32, i32
  }
  func.func @transform_14(%arg0: i32) -> (i32, i32) {
    %c0_i32 = arith.constant 0 : i32
    %c0_i32_0 = arith.constant 0 : i32
    %c0_i32_1 = arith.constant 0 : i32
    return %c0_i32, %c0_i32_0 : i32, i32
  }
  func.func @transform_15(%arg0: i32) -> (i32, i32) {
    %c0_i32 = arith.constant 0 : i32
    %c0_i32_0 = arith.constant 0 : i32
    %c0_i32_1 = arith.constant 0 : i32
    return %c0_i32, %c0_i32_0 : i32, i32
  }
  func.func @transform_16(%arg0: i32) -> (i32, i32) {
    %c0_i32 = arith.constant 0 : i32
    %c0_i32_0 = arith.constant 0 : i32
    %c0_i32_1 = arith.constant 0 : i32
    return %c0_i32, %c0_i32_0 : i32, i32
  }
  func.func @transform_17(%arg0: i32) -> (i32, i32) {
    %c0_i32 = arith.constant 0 : i32
    %c0_i32_0 = arith.constant 0 : i32
    %c0_i32_1 = arith.constant 0 : i32
    return %c0_i32, %c0_i32_0 : i32, i32
  }
  func.func @transform_18(%arg0: i32) -> (i32, i32) {
    %c0_i32 = arith.constant 0 : i32
    %c0_i32_0 = arith.constant 0 : i32
    %c0_i32_1 = arith.constant 0 : i32
    return %c0_i32, %c0_i32_0 : i32, i32
  }
  func.func @transform_19(%arg0: i32) -> (i32, i32) {
    %c0_i32 = arith.constant 0 : i32
    %c0_i32_0 = arith.constant 0 : i32
    %c0_i32_1 = arith.constant 0 : i32
    return %c0_i32, %c0_i32_0 : i32, i32
  }
  func.func @transform_20(%arg0: i32) -> (i32, i32) {
    %c0_i32 = arith.constant 0 : i32
    %c0_i32_0 = arith.constant 0 : i32
    return %arg0, %c0_i32 : i32, i32
  }
  func.func @transform_21(%arg0: i32) -> (i32, i32) {
    %c0_i32 = arith.constant 0 : i32
    %c0_i32_0 = arith.constant 0 : i32
    %c0_i32_1 = arith.constant 0 : i32
    return %c0_i32, %c0_i32_0 : i32, i32
  }
}

</mosaic_0001>

<bundles_post_ra>
// kernel: geomol_gnn_forward.8
= control target key start
LH: loop header
LB: loop body
LE: loop exit
PB: predicated region body
PF: predicated region fallthrough
CT: control target
= control target key end

     0   :  { %s1916_s1 = inlined_call_operand.vmem [shape: bf16[128,128], index: 1, kind: input, shape index: {}]   ;;  %s1917_s0 = inlined_call_operand.vmem [shape: bf16[256,128], index: 0, kind: input, shape index: {}]   ;;  %s1918_s3 = inlined_call_operand.vmem [shape: bf16[128,128], index: 3, kind: input, shape index: {}]   ;;  %s1919_s5 = inlined_call_operand.vmem [shape: bf16[128,128], index: 5, kind: input, shape index: {}]   ;;  %s1920_s2 = inlined_call_operand.vmem [shape: f32[1,128], index: 2, kind: input, shape index: {}]   ;;  %s1921_s4 = inlined_call_operand.vmem [shape: f32[1,128], index: 4, kind: input, shape index: {}]   ;;  %s1922_s6 = inlined_call_operand.vmem [shape: f32[1,128], index: 6, kind: input, shape index: {}]   ;;  %s1923_s7 = inlined_call_operand.vmem [shape: bf16[256,128], index: 7, kind: output, shape index: {}]  }
   0x1   :  { %v1545_v0 = vld [vmem:[%s1916_s1] sm:$0xff]   ;;  %v1546_v1 = vld [vmem:[%s1916_s1 + $0x8] sm:$0xff]   ;;  %v1547_v2 = vld [vmem:[%s1916_s1 + $0x10] sm:$0xff]  }
   0x2   :  { %1385 = vmatprep.subr.bf16.mxu0 %v1545_v0  ;;  %1529 = vmatprep.subr.bf16.mxu1 %v1545_v0  ;;  %v1548_v3 = vld [vmem:[%s1916_s1 + $0x18] sm:$0xff]   ;;  %v1553_v4 = vld [vmem:[%s1917_s0] sm:$0xff]   ;;  %v1550_v6 = vld [vmem:[%s1916_s1 + $0x28] sm:$0xff]  }
   0x3   :  { %1386 = vmatpush3.bf16.msra.mxu0 %v1545_v0  ;;  %1537 = vmatpush3.bf16.msra.mxu1 %v1545_v0  ;;  %v1549_v5 = vld [vmem:[%s1916_s1 + $0x20] sm:$0xff]   ;;  %v1551_v8 = vld [vmem:[%s1916_s1 + $0x30] sm:$0xff]   ;;  %v1552_v9 = vld [vmem:[%s1916_s1 + $0x38] sm:$0xff]  }
   0x4   :  { %1387 = vmatprep.subr.bf16.mxu0 %v1546_v1  ;;  %1530 = vmatprep.subr.bf16.mxu1 %v1546_v1  ;;  %v1561_v7 = vld [vmem:[%s1917_s0 + $0x40] sm:$0xff]   ;;  %v1554_v10 = vld [vmem:[%s1917_s0 + $0x8] sm:$0xff]   ;;  %v1555_v13 = vld [vmem:[%s1917_s0 + $0x10] sm:$0xff]  }
   0x5   :  { %1401 = vmatprep.mubr.bf16.mxu0 %v1553_v4  ;;  %1417 = vmatprep.mubr.bf16.mxu1 %v1561_v7  ;;  %v1569_v11 = vld [vmem:[%s1918_s3] sm:$0xff]   ;;  %v1562_v12 = vld [vmem:[%s1917_s0 + $0x48] sm:$0xff]   ;;  %v1563_v14 = vld [vmem:[%s1917_s0 + $0x50] sm:$0xff]  }
   0x6   :  { %v1570_v15 = vld [vmem:[%s1918_s3 + $0x8] sm:$0xff]   ;;  %v1571_v16 = vld [vmem:[%s1918_s3 + $0x10] sm:$0xff]   ;;  %v1556_v17 = vld [vmem:[%s1917_s0 + $0x18] sm:$0xff]  }
   0x7   :  { %1388 = vmatpush3.bf16.msra.mxu0 %v1546_v1  ;;  %1538 = vmatpush3.bf16.msra.mxu1 %v1546_v1  ;;  %v1564_v18 = vld [vmem:[%s1917_s0 + $0x58] sm:$0xff]   ;;  %v1557_v19 = vld [vmem:[%s1917_s0 + $0x20] sm:$0xff]   ;;  %v1558_v23 = vld [vmem:[%s1917_s0 + $0x28] sm:$0xff]  }
   0x8   :  { %1389 = vmatprep.subr.bf16.mxu0 %v1547_v2  ;;  %1531 = vmatprep.subr.bf16.mxu1 %v1547_v2  ;;  %v1565_v20 = vld [vmem:[%s1917_s0 + $0x60] sm:$0xff]   ;;  %v1572_v21 = vld [vmem:[%s1918_s3 + $0x18] sm:$0xff]   ;;  %v1566_v24 = vld [vmem:[%s1917_s0 + $0x68] sm:$0xff]  }
   0x9   :  { %v1573_v22 = vld [vmem:[%s1918_s3 + $0x20] sm:$0xff]   ;;  %v1559_v25 = vld [vmem:[%s1917_s0 + $0x30] sm:$0xff]   ;;  %v1574_v27 = vld [vmem:[%s1918_s3 + $0x28] sm:$0xff]  }
   0xa   :  { %v1567_v26 = vld [vmem:[%s1917_s0 + $0x70] sm:$0xff]   ;;  %v1560_v28 = vld [vmem:[%s1917_s0 + $0x38] sm:$0xff]   ;;  %v1577_v32 = vld [vmem:[%s1919_s5] sm:$0xff]  }
   0xb   :  { %1390 = vmatpush3.bf16.msra.mxu0 %v1547_v2  ;;  %1539 = vmatpush3.bf16.msra.mxu1 %v1547_v2  ;;  %v1568_v29 = vld [vmem:[%s1917_s0 + $0x78] sm:$0xff]   ;;  %v1575_v30 = vld [vmem:[%s1918_s3 + $0x30] sm:$0xff]   ;;  %v1578_v33 = vld [vmem:[%s1919_s5 + $0x8] sm:$0xff]  }
   0xc   :  { %1391 = vmatprep.subr.bf16.mxu0 %v1548_v3  ;;  %1532 = vmatprep.subr.bf16.mxu1 %v1548_v3  ;;  %v1576_v31 = vld [vmem:[%s1918_s3 + $0x38] sm:$0xff]   ;;  %v1579_v34 = vld [vmem:[%s1919_s5 + $0x10] sm:$0xff]   ;;  %v1581_v36 = vld [vmem:[%s1919_s5 + $0x20] sm:$0xff]  }
   0xd   :  { %v1580_v35 = vld [vmem:[%s1919_s5 + $0x18] sm:$0xff]   ;;  %v1582_v37 = vld [vmem:[%s1919_s5 + $0x28] sm:$0xff]   ;;  %v1742_v38 = vld [vmem:[%s1920_s2] ss:$0 sm:$0xff] }
   0xf   :  { %1392 = vmatpush3.bf16.msra.mxu0 %v1548_v3  ;;  %1540 = vmatpush3.bf16.msra.mxu1 %v1548_v3 }
  0x10   :  { %1393 = vmatprep.subr.bf16.mxu0 %v1549_v5  ;;  %1533 = vmatprep.subr.bf16.mxu1 %v1549_v5 }
  0x13   :  { %1394 = vmatpush3.bf16.msra.mxu0 %v1549_v5  ;;  %1541 = vmatpush3.bf16.msra.mxu1 %v1549_v5 }
  0x14   :  { %1395 = vmatprep.subr.bf16.mxu0 %v1550_v6  ;;  %1534 = vmatprep.subr.bf16.mxu1 %v1550_v6 }
  0x17   :  { %1396 = vmatpush3.bf16.msra.mxu0 %v1550_v6  ;;  %1542 = vmatpush3.bf16.msra.mxu1 %v1550_v6 }
  0x18   :  { %1397 = vmatprep.subr.bf16.mxu0 %v1551_v8  ;;  %1535 = vmatprep.subr.bf16.mxu1 %v1551_v8 }
  0x1b   :  { %1398 = vmatpush3.bf16.msra.mxu0 %v1551_v8  ;;  %1543 = vmatpush3.bf16.msra.mxu1 %v1551_v8 }
  0x1c   :  { %1399 = vmatprep.subr.bf16.mxu0 %v1552_v9  ;;  %1536 = vmatprep.subr.bf16.mxu1 %v1552_v9 }
  0x1f   :  { %1400 = vmatpush3.bf16.msra.mxu0 %v1552_v9  ;;  %1544 = vmatpush3.bf16.msra.mxu1 %v1552_v9 }
  0x20   :  { %1433 = vmatprep.subr.bf16.mxu1 %v1569_v11  ;;  %1481 = vmatprep.subr.bf16.mxu0 %v1577_v32 }
  0x22   :  { %1402 = vmatmul.mubr.bf16.vlgmr.msra.gmra.mrb[0].mxu0 %v1554_v10  ;;  %1418 = vmatmul.mubr.bf16.vlgmr.msra.gmra.mrb[0].mxu1 %v1562_v12 }
  0x23   :  { %1405 = vmatprep.mubr.bf16.mxu0 %v1555_v13  ;;  %1421 = vmatprep.mubr.bf16.mxu1 %v1563_v14 }
  0x24   :  { %1434 = vmatpush3.bf16.msra.mxu1 %v1569_v11  ;;  %1482 = vmatpush3.bf16.msra.mxu0 %v1577_v32 }
  0x25   :  { %1435 = vmatprep.subr.bf16.mxu1 %v1570_v15  ;;  %1483 = vmatprep.subr.bf16.mxu0 %v1578_v33 }
  0x28   :  { %1436 = vmatpush3.bf16.msra.mxu1 %v1570_v15  ;;  %1484 = vmatpush3.bf16.msra.mxu0 %v1578_v33 }
  0x29   :  { %1437 = vmatprep.subr.bf16.mxu1 %v1571_v16  ;;  %1485 = vmatprep.subr.bf16.mxu0 %v1579_v34 }
  0x2a   :  { %1406 = vmatmul.mubr.bf16.gmra.mrb[4].mxu0 %v1556_v17  ;;  %1422 = vmatmul.mubr.bf16.gmra.mrb[4].mxu1 %v1564_v18 }
  0x2b   :  { %1409 = vmatprep.mubr.bf16.mxu0 %v1557_v19  ;;  %1425 = vmatprep.mubr.bf16.mxu1 %v1565_v20 }
  0x2c   :  { %1438 = vmatpush3.bf16.msra.mxu1 %v1571_v16  ;;  %1486 = vmatpush3.bf16.msra.mxu0 %v1579_v34 }
  0x2d   :  { %1439 = vmatprep.subr.bf16.mxu1 %v1572_v21  ;;  %1487 = vmatprep.subr.bf16.mxu0 %v1580_v35 }
  0x30   :  { %1440 = vmatpush3.bf16.msra.mxu1 %v1572_v21  ;;  %1488 = vmatpush3.bf16.msra.mxu0 %v1580_v35 }
  0x31   :  { %1441 = vmatprep.subr.bf16.mxu1 %v1573_v22  ;;  %1489 = vmatprep.subr.bf16.mxu0 %v1581_v36 }
  0x32   :  { %1410 = vmatmul.mubr.bf16.gmra.mrb[8].mxu0 %v1558_v23  ;;  %1426 = vmatmul.mubr.bf16.gmra.mrb[8].mxu1 %v1566_v24 }
  0x33   :  { %1413 = vmatprep.mubr.bf16.mxu0 %v1559_v25  ;;  %1429 = vmatprep.mubr.bf16.mxu1 %v1567_v26 }
  0x34   :  { %1442 = vmatpush3.bf16.msra.mxu1 %v1573_v22  ;;  %1490 = vmatpush3.bf16.msra.mxu0 %v1581_v36 }
  0x35   :  { %1443 = vmatprep.subr.bf16.mxu1 %v1574_v27  ;;  %1491 = vmatprep.subr.bf16.mxu0 %v1582_v37 }
  0x38   :  { %1444 = vmatpush3.bf16.msra.mxu1 %v1574_v27  ;;  %1492 = vmatpush3.bf16.msra.mxu0 %v1582_v37 }
  0x39   :  { %1445 = vmatprep.subr.bf16.mxu1 %v1575_v30 }
  0x3a   :  { %1414 = vmatmul.mubr.bf16.gmra.mrb[12].mxu0 %v1560_v28  ;;  %1430 = vmatmul.mubr.bf16.gmra.mrb[12].mxu1 %v1568_v29 }
  0x3c   :  { %1446 = vmatpush3.bf16.msra.mxu1 %v1575_v30 }
  0x3d   :  { %1447 = vmatprep.subr.bf16.mxu1 %v1576_v31 }
  0x40   :  { %1448 = vmatpush3.bf16.msra.mxu1 %v1576_v31 }
  0xf5   :  { %v1403_v39 = vpop.f32.mrb[0].mxu0  ;;  %v1419_v40 = vpop.f32.mrb[0].mxu1 }
  0xf6   :  { %v269_v41 = vadd.f32 %v1403_v39, %v1742_v38  ;;  %v260_v42 = vpop.f32.mrb[1].mxu0  ;;  %v333_v43 = vadd.f32 %v1419_v40, %v1742_v38  ;;  %v324_v44 = vpop.f32.mrb[1].mxu1 }
  0xf7   :  { %v261_v45 = vadd.f32 %v1742_v38, %v260_v42  ;;  %v1404_v46 = vpop.f32.mrb[2].mxu0  ;;  %v325_v47 = vadd.f32 %v1742_v38, %v324_v44  ;;  %v1420_v48 = vpop.f32.mrb[2].mxu1 }
  0xf8   :  { %v272_v49 = vadd.f32 %v1404_v46, %v1742_v38  ;;  %v263_v50 = vpop.f32.mrb[3].mxu0  ;;  %v405_v51 = vmax.f32 %v333_v43, 0.0  ;;  %v336_v52 = vadd.f32 %v1420_v48, %v1742_v38  ;;  %v327_v53 = vpop.f32.mrb[3].mxu1  ;;  %v389_v57 = vmax.f32 %v269_v41, 0.0 }
  0xf9   :  { %v264_v54 = vadd.f32 %v1742_v38, %v263_v50  ;;  %v403_v55 = vmax.f32 %v325_v47, 0.0  ;;  %v328_v56 = vadd.f32 %v1742_v38, %v327_v53  ;;  %v387_v60 = vmax.f32 %v261_v45, 0.0 }
  0xfa   :  { %v390_v58 = vmax.f32 %v272_v49, 0.0  ;;  %v406_v59 = vmax.f32 %v336_v52, 0.0 }
  0xfb   :  { %v388_v61 = vmax.f32 %v264_v54, 0.0  ;;  %v404_v62 = vmax.f32 %v328_v56, 0.0 }
  0xfc   :  { %v420_v63 = vpack.c.bf16 %v390_v58, %v389_v57  ;;  %v1752_v0 = vpack.c.bf16 %v406_v59, %v405_v51 }
  0xfd   :  { %v419_v1 = vpack.c.bf16 %v388_v61, %v387_v60  ;;  %v1407_v2 = vpop.f32.mrb[4].mxu0  ;;  %v1754_v3 = vpack.c.bf16 %v404_v62, %v403_v55  ;;  %v1423_v4 = vpop.f32.mrb[4].mxu1 }
  0xfe   :  { %v285_v5 = vadd.f32 %v1407_v2, %v1742_v38  ;;  %v276_v6 = vpop.f32.mrb[5].mxu0  ;;  %v349_v7 = vadd.f32 %v1423_v4, %v1742_v38  ;;  %v340_v8 = vpop.f32.mrb[5].mxu1 }
  0xff   :  { %v277_v9 = vadd.f32 %v1742_v38, %v276_v6  ;;  %v1408_v10 = vpop.f32.mrb[6].mxu0  ;;  %1449 = vmatprep.mubr.bf16.mxu1 %v419_v1  ;;  %v341_v11 = vadd.f32 %v1742_v38, %v340_v8  ;;  %v1424_v12 = vpop.f32.mrb[6].mxu1 }
 0x100   :  { %v288_v13 = vadd.f32 %v1408_v10, %v1742_v38  ;;  %v279_v14 = vpop.f32.mrb[7].mxu0  ;;  %1450 = vmatmul.mubr.bf16.vlgmr.msra.gmra.mrb[16].mxu1 %v420_v63  ;;  %v409_v15 = vmax.f32 %v349_v7, 0.0  ;;  %v352_v16 = vadd.f32 %v1424_v12, %v1742_v38  ;;  %v343_v17 = vpop.f32.mrb[7].mxu1  ;;  %v393_v21 = vmax.f32 %v285_v5, 0.0 }
 0x101   :  { %v280_v18 = vadd.f32 %v1742_v38, %v279_v14  ;;  %v407_v19 = vmax.f32 %v341_v11, 0.0  ;;  %v344_v20 = vadd.f32 %v1742_v38, %v343_v17  ;;  %v391_v24 = vmax.f32 %v277_v9, 0.0 }
 0x102   :  { %v394_v22 = vmax.f32 %v288_v13, 0.0  ;;  %v410_v23 = vmax.f32 %v352_v16, 0.0 }
 0x103   :  { %v392_v25 = vmax.f32 %v280_v18, 0.0  ;;  %v408_v26 = vmax.f32 %v344_v20, 0.0 }
 0x104   :  { %v422_v27 = vpack.c.bf16 %v394_v22, %v393_v21  ;;  %v1764_v28 = vpack.c.bf16 %v410_v23, %v409_v15 }
 0x105   :  { %v421_v29 = vpack.c.bf16 %v392_v25, %v391_v24  ;;  %v1411_v30 = vpop.f32.mrb[8].mxu0  ;;  %v1766_v31 = vpack.c.bf16 %v408_v26, %v407_v19  ;;  %v1427_v32 = vpop.f32.mrb[8].mxu1 }
 0x106   :  { %v301_v33 = vadd.f32 %v1411_v30, %v1742_v38  ;;  %v292_v34 = vpop.f32.mrb[9].mxu0  ;;  %v365_v35 = vadd.f32 %v1427_v32, %v1742_v38  ;;  %v356_v36 = vpop.f32.mrb[9].mxu1 }
 0x107   :  { %v293_v37 = vadd.f32 %v1742_v38, %v292_v34  ;;  %v1412_v39 = vpop.f32.mrb[10].mxu0  ;;  %1453 = vmatprep.mubr.bf16.mxu1 %v421_v29  ;;  %v357_v40 = vadd.f32 %v1742_v38, %v356_v36  ;;  %v1428_v41 = vpop.f32.mrb[10].mxu1 }
 0x108   :  { %v304_v42 = vadd.f32 %v1412_v39, %v1742_v38  ;;  %v295_v43 = vpop.f32.mrb[11].mxu0  ;;  %1454 = vmatmul.mubr.bf16.gmra.mrb[20].mxu1 %v422_v27  ;;  %v413_v44 = vmax.f32 %v365_v35, 0.0  ;;  %v368_v45 = vadd.f32 %v1428_v41, %v1742_v38  ;;  %v359_v46 = vpop.f32.mrb[11].mxu1  ;;  %v397_v50 = vmax.f32 %v301_v33, 0.0 }
 0x109   :  { %v296_v47 = vadd.f32 %v1742_v38, %v295_v43  ;;  %v411_v48 = vmax.f32 %v357_v40, 0.0  ;;  %v360_v49 = vadd.f32 %v1742_v38, %v359_v46  ;;  %v395_v53 = vmax.f32 %v293_v37, 0.0 }
 0x10a   :  { %v398_v51 = vmax.f32 %v304_v42, 0.0  ;;  %v414_v52 = vmax.f32 %v368_v45, 0.0 }
 0x10b   :  { %v396_v54 = vmax.f32 %v296_v47, 0.0  ;;  %v412_v55 = vmax.f32 %v360_v49, 0.0 }
 0x10c   :  { %v424_v56 = vpack.c.bf16 %v398_v51, %v397_v50  ;;  %v432_v57 = vpack.c.bf16 %v414_v52, %v413_v44 }
 0x10d   :  { %v423_v58 = vpack.c.bf16 %v396_v54, %v395_v53  ;;  %v1415_v59 = vpop.f32.mrb[12].mxu0  ;;  %v431_v60 = vpack.c.bf16 %v412_v55, %v411_v48  ;;  %v1431_v61 = vpop.f32.mrb[12].mxu1 }
 0x10e   :  { %v317_v62 = vadd.f32 %v1415_v59, %v1742_v38  ;;  %v308_v63 = vpop.f32.mrb[13].mxu0  ;;  %v381_v1 = vadd.f32 %v1431_v61, %v1742_v38  ;;  %v372_v2 = vpop.f32.mrb[13].mxu1 }
 0x10f   :  { %v309_v4 = vadd.f32 %v1742_v38, %v308_v63  ;;  %v1416_v5 = vpop.f32.mrb[14].mxu0  ;;  %1457 = vmatprep.mubr.bf16.mxu1 %v423_v58  ;;  %v373_v6 = vadd.f32 %v1742_v38, %v372_v2  ;;  %v1432_v7 = vpop.f32.mrb[14].mxu1 }
 0x110   :  { %v320_v8 = vadd.f32 %v1416_v5, %v1742_v38  ;;  %v311_v9 = vpop.f32.mrb[15].mxu0  ;;  %1458 = vmatmul.mubr.bf16.gmra.mrb[24].mxu1 %v424_v56  ;;  %v417_v10 = vmax.f32 %v381_v1, 0.0  ;;  %v384_v11 = vadd.f32 %v1432_v7, %v1742_v38  ;;  %v375_v12 = vpop.f32.mrb[15].mxu1  ;;  %v401_v16 = vmax.f32 %v317_v62, 0.0 }
 0x111   :  { %v312_v13 = vadd.f32 %v1742_v38, %v311_v9  ;;  %v415_v14 = vmax.f32 %v373_v6, 0.0  ;;  %v376_v15 = vadd.f32 %v1742_v38, %v375_v12  ;;  %v399_v19 = vmax.f32 %v309_v4, 0.0  ;;  %v1583_v38 = vld [vmem:[%s1919_s5 + $0x30] sm:$0xff]  }
 0x112   :  { %v402_v17 = vmax.f32 %v320_v8, 0.0  ;;  %v418_v18 = vmax.f32 %v384_v11, 0.0  ;;  %1493 = vmatprep.subr.bf16.mxu0 %v1583_v38 }
 0x113   :  { %v400_v20 = vmax.f32 %v312_v13, 0.0  ;;  %v416_v21 = vmax.f32 %v376_v15, 0.0  ;;  %1494 = vmatpush3.bf16.msra.mxu0 %v1583_v38 }
 0x114   :  { %v426_v22 = vpack.c.bf16 %v402_v17, %v401_v16  ;;  %v434_v23 = vpack.c.bf16 %v418_v18, %v417_v10 }
 0x115   :  { %v425_v24 = vpack.c.bf16 %v400_v20, %v399_v19  ;;  %v433_v25 = vpack.c.bf16 %v416_v21, %v415_v14 }
 0x117   :  { %1461 = vmatprep.mubr.bf16.mxu1 %v425_v24 }
 0x118   :  { %1462 = vmatmul.mubr.bf16.gmra.mrb[28].mxu1 %v426_v22 }
 0x119   :  { %1465 = vmatprep.mubr.bf16.mxu1 %v1754_v3  ;;  %v1584_v3 = vld [vmem:[%s1919_s5 + $0x38] sm:$0xff]  }
 0x11a   :  { %1495 = vmatprep.subr.bf16.mxu0 %v1584_v3 }
 0x11b   :  { %1496 = vmatpush3.bf16.msra.mxu0 %v1584_v3 }
 0x120   :  { %1466 = vmatmul.mubr.bf16.gmra.mrb[32].mxu1 %v1752_v0  ;;  %v1797_v0 = vld [vmem:[%s1921_s4] ss:$0 sm:$0xff] }
 0x121   :  { %1469 = vmatprep.mubr.bf16.mxu1 %v1766_v31 }
 0x128   :  { %1470 = vmatmul.mubr.bf16.gmra.mrb[36].mxu1 %v1764_v28 }
 0x129   :  { %1473 = vmatprep.mubr.bf16.mxu1 %v431_v60 }
 0x130   :  { %1474 = vmatmul.mubr.bf16.gmra.mrb[40].mxu1 %v432_v57 }
 0x131   :  { %1477 = vmatprep.mubr.bf16.mxu1 %v433_v25 }
 0x138   :  { %1478 = vmatmul.mubr.bf16.gmra.mrb[44].mxu1 %v434_v23 }
 0x1d3   :  { %v1451_v26 = vpop.f32.mrb[16].mxu1 }
 0x1d4   :  { %v549_v27 = vadd.f32 %v1451_v26, %v1797_v0  ;;  %v540_v28 = vpop.f32.mrb[17].mxu1 }
 0x1d5   :  { %v541_v29 = vadd.f32 %v1797_v0, %v540_v28  ;;  %v1452_v30 = vpop.f32.mrb[18].mxu1 }
 0x1d6   :  { %v552_v31 = vadd.f32 %v1452_v30, %v1797_v0  ;;  %v543_v32 = vpop.f32.mrb[19].mxu1  ;;  %v669_v34 = vmax.f32 %v549_v27, 0.0 }
 0x1d7   :  { %v544_v33 = vadd.f32 %v1797_v0, %v543_v32  ;;  %v667_v36 = vmax.f32 %v541_v29, 0.0 }
 0x1d8   :  { %v670_v35 = vmax.f32 %v552_v31, 0.0 }
 0x1d9   :  { %v668_v37 = vmax.f32 %v544_v33, 0.0 }
 0x1da   :  { %v700_v39 = vpack.c.bf16 %v670_v35, %v669_v34 }
 0x1db   :  { %v699_v40 = vpack.c.bf16 %v668_v37, %v667_v36  ;;  %v1455_v41 = vpop.f32.mrb[20].mxu1 }
 0x1dc   :  { %v565_v42 = vadd.f32 %v1455_v41, %v1797_v0  ;;  %v556_v43 = vpop.f32.mrb[21].mxu1 }
 0x1dd   :  { %v557_v44 = vadd.f32 %v1797_v0, %v556_v43  ;;  %v1456_v45 = vpop.f32.mrb[22].mxu1  ;;  %1497 = vmatprep.mubr.bf16.mxu0 %v699_v40 }
 0x1de   :  { %v568_v46 = vadd.f32 %v1456_v45, %v1797_v0  ;;  %v559_v47 = vpop.f32.mrb[23].mxu1  ;;  %1498 = vmatmul.mubr.bf16.vlgmr.msra.gmra.mrb[16].mxu0 %v700_v39  ;;  %v673_v49 = vmax.f32 %v565_v42, 0.0 }
 0x1df   :  { %v560_v48 = vadd.f32 %v1797_v0, %v559_v47  ;;  %v671_v51 = vmax.f32 %v557_v44, 0.0 }
 0x1e0   :  { %v674_v50 = vmax.f32 %v568_v46, 0.0 }
 0x1e1   :  { %v672_v52 = vmax.f32 %v560_v48, 0.0 }
 0x1e2   :  { %v702_v53 = vpack.c.bf16 %v674_v50, %v673_v49 }
 0x1e3   :  { %v701_v54 = vpack.c.bf16 %v672_v52, %v671_v51  ;;  %v1459_v55 = vpop.f32.mrb[24].mxu1 }
 0x1e4   :  { %v581_v56 = vadd.f32 %v1459_v55, %v1797_v0  ;;  %v572_v57 = vpop.f32.mrb[25].mxu1 }
 0x1e5   :  { %v573_v58 = vadd.f32 %v1797_v0, %v572_v57  ;;  %v1460_v59 = vpop.f32.mrb[26].mxu1  ;;  %1501 = vmatprep.mubr.bf16.mxu0 %v701_v54 }
 0x1e6   :  { %v584_v60 = vadd.f32 %v1460_v59, %v1797_v0  ;;  %v575_v61 = vpop.f32.mrb[27].mxu1  ;;  %1502 = vmatmul.mubr.bf16.gmra.mrb[20].mxu0 %v702_v53  ;;  %v677_v63 = vmax.f32 %v581_v56, 0.0 }
 0x1e7   :  { %v576_v62 = vadd.f32 %v1797_v0, %v575_v61  ;;  %v675_v2 = vmax.f32 %v573_v58, 0.0 }
 0x1e8   :  { %v678_v1 = vmax.f32 %v584_v60, 0.0 }
 0x1e9   :  { %v676_v4 = vmax.f32 %v576_v62, 0.0 }
 0x1ea   :  { %v704_v5 = vpack.c.bf16 %v678_v1, %v677_v63 }
 0x1eb   :  { %v703_v6 = vpack.c.bf16 %v676_v4, %v675_v2  ;;  %v1463_v7 = vpop.f32.mrb[28].mxu1 }
 0x1ec   :  { %v597_v8 = vadd.f32 %v1463_v7, %v1797_v0  ;;  %v588_v9 = vpop.f32.mrb[29].mxu1 }
 0x1ed   :  { %v589_v10 = vadd.f32 %v1797_v0, %v588_v9  ;;  %v1464_v11 = vpop.f32.mrb[30].mxu1  ;;  %1505 = vmatprep.mubr.bf16.mxu0 %v703_v6 }
 0x1ee   :  { %v600_v12 = vadd.f32 %v1464_v11, %v1797_v0  ;;  %v591_v13 = vpop.f32.mrb[31].mxu1  ;;  %1506 = vmatmul.mubr.bf16.gmra.mrb[24].mxu0 %v704_v5  ;;  %v681_v15 = vmax.f32 %v597_v8, 0.0 }
 0x1ef   :  { %v592_v14 = vadd.f32 %v1797_v0, %v591_v13  ;;  %v679_v17 = vmax.f32 %v589_v10, 0.0 }
 0x1f0   :  { %v682_v16 = vmax.f32 %v600_v12, 0.0 }
 0x1f1   :  { %v680_v18 = vmax.f32 %v592_v14, 0.0 }
 0x1f2   :  { %v706_v19 = vpack.c.bf16 %v682_v16, %v681_v15  ;;  %v1834_v15 = vld [vmem:[%s1922_s6] ss:$0 sm:$0xff] }
 0x1f3   :  { %v705_v20 = vpack.c.bf16 %v680_v18, %v679_v17  ;;  %v1467_v21 = vpop.f32.mrb[32].mxu1 }
 0x1f4   :  { %v613_v22 = vadd.f32 %v1467_v21, %v1797_v0  ;;  %v604_v23 = vpop.f32.mrb[33].mxu1 }
 0x1f5   :  { %v605_v24 = vadd.f32 %v1797_v0, %v604_v23  ;;  %v1468_v25 = vpop.f32.mrb[34].mxu1  ;;  %1509 = vmatprep.mubr.bf16.mxu0 %v705_v20 }
 0x1f6   :  { %v616_v38 = vadd.f32 %v1468_v25, %v1797_v0  ;;  %v607_v3 = vpop.f32.mrb[35].mxu1  ;;  %1510 = vmatmul.mubr.bf16.gmra.mrb[28].mxu0 %v706_v19  ;;  %v685_v27 = vmax.f32 %v613_v22, 0.0 }
 0x1f7   :  { %v608_v26 = vadd.f32 %v1797_v0, %v607_v3  ;;  %v683_v29 = vmax.f32 %v605_v24, 0.0 }
 0x1f8   :  { %v686_v28 = vmax.f32 %v616_v38, 0.0 }
 0x1f9   :  { %v684_v30 = vmax.f32 %v608_v26, 0.0 }
 0x1fa   :  { %v708_v31 = vpack.c.bf16 %v686_v28, %v685_v27 }
 0x1fb   :  { %v707_v32 = vpack.c.bf16 %v684_v30, %v683_v29  ;;  %v1471_v33 = vpop.f32.mrb[36].mxu1 }
 0x1fc   :  { %v629_v34 = vadd.f32 %v1471_v33, %v1797_v0  ;;  %v620_v35 = vpop.f32.mrb[37].mxu1 }
 0x1fd   :  { %v621_v36 = vadd.f32 %v1797_v0, %v620_v35  ;;  %v1472_v37 = vpop.f32.mrb[38].mxu1  ;;  %1513 = vmatprep.mubr.bf16.mxu0 %v707_v32 }
 0x1fe   :  { %v632_v39 = vadd.f32 %v1472_v37, %v1797_v0  ;;  %v623_v40 = vpop.f32.mrb[39].mxu1  ;;  %1514 = vmatmul.mubr.bf16.gmra.mrb[32].mxu0 %v708_v31  ;;  %v689_v42 = vmax.f32 %v629_v34, 0.0 }
 0x1ff   :  { %v624_v41 = vadd.f32 %v1797_v0, %v623_v40  ;;  %v687_v44 = vmax.f32 %v621_v36, 0.0 }
 0x200   :  { %v690_v43 = vmax.f32 %v632_v39, 0.0 }
 0x201   :  { %v688_v45 = vmax.f32 %v624_v41, 0.0 }
 0x202   :  { %v710_v46 = vpack.c.bf16 %v690_v43, %v689_v42 }
 0x203   :  { %v709_v47 = vpack.c.bf16 %v688_v45, %v687_v44  ;;  %v1475_v48 = vpop.f32.mrb[40].mxu1 }
 0x204   :  { %v645_v49 = vadd.f32 %v1475_v48, %v1797_v0  ;;  %v636_v50 = vpop.f32.mrb[41].mxu1 }
 0x205   :  { %v637_v51 = vadd.f32 %v1797_v0, %v636_v50  ;;  %v1476_v52 = vpop.f32.mrb[42].mxu1  ;;  %1517 = vmatprep.mubr.bf16.mxu0 %v709_v47 }
 0x206   :  { %v648_v53 = vadd.f32 %v1476_v52, %v1797_v0  ;;  %v639_v54 = vpop.f32.mrb[43].mxu1  ;;  %1518 = vmatmul.mubr.bf16.gmra.mrb[36].mxu0 %v710_v46  ;;  %v693_v56 = vmax.f32 %v645_v49, 0.0 }
 0x207   :  { %v640_v55 = vadd.f32 %v1797_v0, %v639_v54  ;;  %v691_v58 = vmax.f32 %v637_v51, 0.0 }
 0x208   :  { %v694_v57 = vmax.f32 %v648_v53, 0.0 }
 0x209   :  { %v692_v59 = vmax.f32 %v640_v55, 0.0 }
 0x20a   :  { %v712_v60 = vpack.c.bf16 %v694_v57, %v693_v56 }
 0x20b   :  { %v711_v61 = vpack.c.bf16 %v692_v59, %v691_v58  ;;  %v1479_v62 = vpop.f32.mrb[44].mxu1 }
 0x20c   :  { %v661_v63 = vadd.f32 %v1479_v62, %v1797_v0  ;;  %v652_v1 = vpop.f32.mrb[45].mxu1 }
 0x20d   :  { %v653_v2 = vadd.f32 %v1797_v0, %v652_v1  ;;  %v1480_v4 = vpop.f32.mrb[46].mxu1  ;;  %1521 = vmatprep.mubr.bf16.mxu0 %v711_v61 }
 0x20e   :  { %v664_v5 = vadd.f32 %v1480_v4, %v1797_v0  ;;  %v655_v6 = vpop.f32.mrb[47].mxu1  ;;  %1522 = vmatmul.mubr.bf16.gmra.mrb[40].mxu0 %v712_v60  ;;  %v697_v8 = vmax.f32 %v661_v63, 0.0 }
 0x20f   :  { %v656_v7 = vadd.f32 %v1797_v0, %v655_v6  ;;  %v695_v10 = vmax.f32 %v653_v2, 0.0 }
 0x210   :  { %v698_v9 = vmax.f32 %v664_v5, 0.0 }
 0x211   :  { %v696_v11 = vmax.f32 %v656_v7, 0.0 }
 0x212   :  { %v714_v12 = vpack.c.bf16 %v698_v9, %v697_v8 }
 0x213   :  { %v713_v13 = vpack.c.bf16 %v696_v11, %v695_v10 }
 0x215   :  { %1525 = vmatprep.mubr.bf16.mxu0 %v713_v13 }
 0x216   :  { %1526 = vmatmul.mubr.bf16.gmra.mrb[44].mxu0 %v714_v12 }
 0x2b1   :  { %v1499_v14 = vpop.f32.mrb[16].mxu0 }
 0x2b2   :  { %v820_v16 = vpop.f32.mrb[17].mxu0  ;;  %v829_v18 = vadd.f32 %v1499_v14, %v1834_v15 }
 0x2b3   :  { %v1500_v17 = vpop.f32.mrb[18].mxu0  ;;  %v821_v20 = vadd.f32 %v1834_v15, %v820_v16 }
 0x2b4   :  { %v832_v0 = vadd.f32 %v1500_v17, %v1834_v15  ;;  %v823_v19 = vpop.f32.mrb[19].mxu0 }
 0x2b5   :  { %v824_v21 = vadd.f32 %v1834_v15, %v823_v19 }
 0x2b6   :  { %v1226_v22 = vpack.c.bf16 %v832_v0, %v829_v18 }
 0x2b7   :  { %v1221_v23 = vpack.c.bf16 %v824_v21, %v821_v20 }
 0x2b8   :  { %1298 = vst [vmem:[%s1923_s7 + $0x8] sm:$0xff] %v1226_v22  }
 0x2b9   :  { %1222 = vst [vmem:[%s1923_s7] sm:$0xff] %v1221_v23   ;;  %v1503_v24 = vpop.f32.mrb[20].mxu0 }
 0x2ba   :  { %v836_v25 = vpop.f32.mrb[21].mxu0  ;;  %v845_v3 = vadd.f32 %v1503_v24, %v1834_v15 }
 0x2bb   :  { %v1504_v38 = vpop.f32.mrb[22].mxu0  ;;  %v837_v28 = vadd.f32 %v1834_v15, %v836_v25 }
 0x2bc   :  { %v848_v26 = vadd.f32 %v1504_v38, %v1834_v15  ;;  %v839_v27 = vpop.f32.mrb[23].mxu0 }
 0x2bd   :  { %v840_v29 = vadd.f32 %v1834_v15, %v839_v27 }
 0x2be   :  { %v1236_v30 = vpack.c.bf16 %v848_v26, %v845_v3 }
 0x2bf   :  { %v1231_v31 = vpack.c.bf16 %v840_v29, %v837_v28 }
 0x2c0   :  { %1300 = vst [vmem:[%s1923_s7 + $0x18] sm:$0xff] %v1236_v30  }
 0x2c1   :  { %1299 = vst [vmem:[%s1923_s7 + $0x10] sm:$0xff] %v1231_v31   ;;  %v1507_v32 = vpop.f32.mrb[24].mxu0 }
 0x2c2   :  { %v852_v33 = vpop.f32.mrb[25].mxu0  ;;  %v861_v35 = vadd.f32 %v1507_v32, %v1834_v15 }
 0x2c3   :  { %v1508_v34 = vpop.f32.mrb[26].mxu0  ;;  %v853_v39 = vadd.f32 %v1834_v15, %v852_v33 }
 0x2c4   :  { %v864_v36 = vadd.f32 %v1508_v34, %v1834_v15  ;;  %v855_v37 = vpop.f32.mrb[27].mxu0 }
 0x2c5   :  { %v856_v40 = vadd.f32 %v1834_v15, %v855_v37 }
 0x2c6   :  { %v1246_v41 = vpack.c.bf16 %v864_v36, %v861_v35 }
 0x2c7   :  { %v1241_v42 = vpack.c.bf16 %v856_v40, %v853_v39 }
 0x2c8   :  { %1302 = vst [vmem:[%s1923_s7 + $0x28] sm:$0xff] %v1246_v41  }
 0x2c9   :  { %1301 = vst [vmem:[%s1923_s7 + $0x20] sm:$0xff] %v1241_v42   ;;  %v1511_v43 = vpop.f32.mrb[28].mxu0 }
 0x2ca   :  { %v868_v44 = vpop.f32.mrb[29].mxu0  ;;  %v877_v46 = vadd.f32 %v1511_v43, %v1834_v15 }
 0x2cb   :  { %v1512_v45 = vpop.f32.mrb[30].mxu0  ;;  %v869_v49 = vadd.f32 %v1834_v15, %v868_v44 }
 0x2cc   :  { %v880_v47 = vadd.f32 %v1512_v45, %v1834_v15  ;;  %v871_v48 = vpop.f32.mrb[31].mxu0 }
 0x2cd   :  { %v872_v50 = vadd.f32 %v1834_v15, %v871_v48 }
 0x2ce   :  { %v1256_v51 = vpack.c.bf16 %v880_v47, %v877_v46 }
 0x2cf   :  { %v1251_v52 = vpack.c.bf16 %v872_v50, %v869_v49 }
 0x2d0   :  { %1304 = vst [vmem:[%s1923_s7 + $0x38] sm:$0xff] %v1256_v51  }
 0x2d1   :  { %1303 = vst [vmem:[%s1923_s7 + $0x30] sm:$0xff] %v1251_v52   ;;  %v1515_v53 = vpop.f32.mrb[32].mxu0 }
 0x2d2   :  { %v884_v54 = vpop.f32.mrb[33].mxu0  ;;  %v893_v56 = vadd.f32 %v1515_v53, %v1834_v15 }
 0x2d3   :  { %v1516_v55 = vpop.f32.mrb[34].mxu0  ;;  %v885_v59 = vadd.f32 %v1834_v15, %v884_v54 }
 0x2d4   :  { %v896_v57 = vadd.f32 %v1516_v55, %v1834_v15  ;;  %v887_v58 = vpop.f32.mrb[35].mxu0 }
 0x2d5   :  { %v888_v60 = vadd.f32 %v1834_v15, %v887_v58 }
 0x2d6   :  { %v1266_v61 = vpack.c.bf16 %v896_v57, %v893_v56 }
 0x2d7   :  { %v1261_v62 = vpack.c.bf16 %v888_v60, %v885_v59 }
 0x2d8   :  { %1306 = vst [vmem:[%s1923_s7 + $0x48] sm:$0xff] %v1266_v61  }
 0x2d9   :  { %1305 = vst [vmem:[%s1923_s7 + $0x40] sm:$0xff] %v1261_v62   ;;  %v1519_v63 = vpop.f32.mrb[36].mxu0 }
 0x2da   :  { %v900_v1 = vpop.f32.mrb[37].mxu0  ;;  %v909_v4 = vadd.f32 %v1519_v63, %v1834_v15 }
 0x2db   :  { %v1520_v2 = vpop.f32.mrb[38].mxu0  ;;  %v901_v7 = vadd.f32 %v1834_v15, %v900_v1 }
 0x2dc   :  { %v912_v5 = vadd.f32 %v1520_v2, %v1834_v15  ;;  %v903_v6 = vpop.f32.mrb[39].mxu0 }
 0x2dd   :  { %v904_v8 = vadd.f32 %v1834_v15, %v903_v6 }
 0x2de   :  { %v1276_v9 = vpack.c.bf16 %v912_v5, %v909_v4 }
 0x2df   :  { %v1271_v10 = vpack.c.bf16 %v904_v8, %v901_v7 }
 0x2e0   :  { %1308 = vst [vmem:[%s1923_s7 + $0x58] sm:$0xff] %v1276_v9  }
 0x2e1   :  { %1307 = vst [vmem:[%s1923_s7 + $0x50] sm:$0xff] %v1271_v10   ;;  %v1523_v11 = vpop.f32.mrb[40].mxu0 }
 0x2e2   :  { %v916_v12 = vpop.f32.mrb[41].mxu0  ;;  %v925_v14 = vadd.f32 %v1523_v11, %v1834_v15 }
 0x2e3   :  { %v1524_v13 = vpop.f32.mrb[42].mxu0  ;;  %v917_v18 = vadd.f32 %v1834_v15, %v916_v12 }
 0x2e4   :  { %v928_v16 = vadd.f32 %v1524_v13, %v1834_v15  ;;  %v919_v17 = vpop.f32.mrb[43].mxu0 }
 0x2e5   :  { %v920_v0 = vadd.f32 %v1834_v15, %v919_v17 }
 0x2e6   :  { %v1286_v19 = vpack.c.bf16 %v928_v16, %v925_v14 }
 0x2e7   :  { %v1281_v20 = vpack.c.bf16 %v920_v0, %v917_v18 }
 0x2e8   :  { %1310 = vst [vmem:[%s1923_s7 + $0x68] sm:$0xff] %v1286_v19  }
 0x2e9   :  { %1309 = vst [vmem:[%s1923_s7 + $0x60] sm:$0xff] %v1281_v20   ;;  %v1527_v21 = vpop.f32.mrb[44].mxu0 }
 0x2ea   :  { %v932_v22 = vpop.f32.mrb[45].mxu0  ;;  %v941_v24 = vadd.f32 %v1527_v21, %v1834_v15 }
 0x2eb   :  { %v1528_v23 = vpop.f32.mrb[46].mxu0  ;;  %v933_v3 = vadd.f32 %v1834_v15, %v932_v22 }
 0x2ec   :  { %v944_v25 = vadd.f32 %v1528_v23, %v1834_v15  ;;  %v935_v38 = vpop.f32.mrb[47].mxu0 }
 0x2ed   :  { %v936_v26 = vadd.f32 %v1834_v15, %v935_v38 }
 0x2ee   :  { %v1296_v27 = vpack.c.bf16 %v944_v25, %v941_v24 }
 0x2ef   :  { %v1291_v28 = vpack.c.bf16 %v936_v26, %v933_v3 }
 0x2f0   :  { %1312 = vst [vmem:[%s1923_s7 + $0x78] sm:$0xff] %v1296_v27  }
 0x2f1   :  { %1311 = vst [vmem:[%s1923_s7 + $0x70] sm:$0xff] %v1291_v28  }

// kernel: geomol_gnn_forward.9
= control target key start
LH: loop header
LB: loop body
LE: loop exit
PB: predicated region body
PF: predicated region fallthrough
CT: control target
= control target key end

     0   :  { %s1960_s24 = smov 0   ;;  %s2215_s0 = inlined_call_operand.vmem [shape: bf16[512,128], index: 0, kind: input, shape index: {}]   ;;  %s2216_s1 = inlined_call_operand.vmem [shape: bf16[128,128], index: 1, kind: input, shape index: {}]   ;;  %s2217_s2 = inlined_call_operand.vmem [shape: f32[1,128], index: 2, kind: input, shape index: {}]   ;;  %s2218_s3 = inlined_call_operand.vmem [shape: bf16[128,128], index: 3, kind: input, shape index: {}]   ;;  %s2219_s4 = inlined_call_operand.vmem [shape: f32[1,128], index: 4, kind: input, shape index: {}]   ;;  %s2220_s5 = inlined_call_operand.vmem [shape: bf16[128,128], index: 5, kind: input, shape index: {}]   ;;  %s2221_s6 = inlined_call_operand.vmem [shape: f32[1,128], index: 6, kind: input, shape index: {}]   ;;  %s2222_s7 = inlined_call_operand.vmem [shape: bf16[512,128], index: 7, kind: output, shape index: {}]  }
   0x1 LB: > { %s1419_s25 = sadd.s32 4294967295, %s1918_s24   ;;  %p1423_p0 = scmp.ge.s32.totalorder %s1918_s24, 1  ;;  %s1918_s24 = sphi %s1960_s24, %s17_s24  }
   0x2   : > { %p238_p1 = scmp.lt.s32.totalorder %s1918_s24, 3 }
   0x4   : > { %p239_p2 = pnand %p1423_p0, %p238_p1 }
   0x5   : > { %v1872_v0 = vld [vmem:[%s2216_s1] sm:$0xff] (!%p239_p2)   ;;  %s1424_s28 = sshll.u32 (!%p239_p2), %s1419_s25, 5  ;;  %v1873_v1 = vld [vmem:[%s2216_s1 + $0x8] sm:$0xff] (!%p239_p2)   ;;  %v1874_v2 = vld [vmem:[%s2216_s1 + $0x10] sm:$0xff] (!%p239_p2)  }
   0x6   : > { %242 = sbr.rel (%p239_p2) target bundleno = 758 (0x2f6), region = 48  ;;  %p271_p3 = scmp.lt.s32.totalorder (!%p239_p2), %s1424_s28, 63  ;;  %1704 = vmatprep.subr.bf16.mxu0 (!%p239_p2), %v1872_v0  ;;  %1848 = vmatprep.subr.bf16.mxu1 (!%p239_p2), %v1872_v0  ;;  %v1875_v3 = vld [vmem:[%s2216_s1 + $0x18] sm:$0xff] (!%p239_p2)   ;;  %v1876_v5 = vld [vmem:[%s2216_s1 + $0x20] sm:$0xff] (!%p239_p2)   ;;  %v1877_v6 = vld [vmem:[%s2216_s1 + $0x28] sm:$0xff] (!%p239_p2)  }
   0x7   : > { %1705 = vmatpush3.bf16.msra.mxu0 (!%p239_p2), %v1872_v0  ;;  %1856 = vmatpush3.bf16.msra.mxu1 (!%p239_p2), %v1872_v0  ;;  %v1878_v8 = vld [vmem:[%s2216_s1 + $0x30] sm:$0xff] (!%p239_p2)   ;;  %v1879_v9 = vld [vmem:[%s2216_s1 + $0x38] sm:$0xff] (!%p239_p2)   ;;  %v1896_v12 = vld [vmem:[%s2218_s3] sm:$0xff] (!%p239_p2)  }
   0x8   : > { %1706 = vmatprep.subr.bf16.mxu0 (!%p239_p2), %v1873_v1  ;;  %1849 = vmatprep.subr.bf16.mxu1 (!%p239_p2), %v1873_v1  ;;  %v1897_v15 = vld [vmem:[%s2218_s3 + $0x8] sm:$0xff] (!%p239_p2)   ;;  %v1898_v16 = vld [vmem:[%s2218_s3 + $0x10] sm:$0xff] (!%p239_p2)   ;;  %v1899_v21 = vld [vmem:[%s2218_s3 + $0x18] sm:$0xff] (!%p239_p2)  }
   0x9   : > { %v1900_v22 = vld [vmem:[%s2218_s3 + $0x20] sm:$0xff] (!%p239_p2)   ;;  %v1901_v27 = vld [vmem:[%s2218_s3 + $0x28] sm:$0xff] (!%p239_p2)   ;;  %v1902_v30 = vld [vmem:[%s2218_s3 + $0x30] sm:$0xff] (!%p239_p2)  }
   0xa   : > { %v1903_v31 = vld [vmem:[%s2218_s3 + $0x38] sm:$0xff] (!%p239_p2)   ;;  %v1904_v32 = vld [vmem:[%s2220_s5] sm:$0xff] (!%p239_p2)   ;;  %v1905_v33 = vld [vmem:[%s2220_s5 + $0x8] sm:$0xff] (!%p239_p2)  }
   0xb   : > { %1707 = vmatpush3.bf16.msra.mxu0 (!%p239_p2), %v1873_v1  ;;  %1857 = vmatpush3.bf16.msra.mxu1 (!%p239_p2), %v1873_v1  ;;  %v1906_v34 = vld [vmem:[%s2220_s5 + $0x10] sm:$0xff] (!%p239_p2)   ;;  %v1907_v35 = vld [vmem:[%s2220_s5 + $0x18] sm:$0xff] (!%p239_p2)   ;;  %v1908_v36 = vld [vmem:[%s2220_s5 + $0x20] sm:$0xff] (!%p239_p2)  }
   0xc   : > { %1708 = vmatprep.subr.bf16.mxu0 (!%p239_p2), %v1874_v2  ;;  %1850 = vmatprep.subr.bf16.mxu1 (!%p239_p2), %v1874_v2  ;;  %v1909_v37 = vld [vmem:[%s2220_s5 + $0x28] sm:$0xff] (!%p239_p2)   ;;  %v2063_v38 = vld [vmem:[%s2217_s2] ss:$0 sm:$0xff] (!%p239_p2) }
   0xd   : > { %s2224_s28 = smov (!%p271_p3, %s1424_s28), 63 }
   0xe   : > { %s1425_s10 = sshll.u32 %s2224_s28, 2 }
   0xf   : > { %s1985_s13 = scalar_lea.vmem %s2215_s0, %s1425_s10  ;;  %1709 = vmatpush3.bf16.msra.mxu0 %v1874_v2  ;;  %1858 = vmatpush3.bf16.msra.mxu1 %v1874_v2  ;;  %s2165_s25 = scalar_lea.vmem %s2222_s7, %s1425_s10 }
  0x10   : > { %v1880_v4 = vld [vmem:[%s1985_s13] sm:$0xff]   ;;  %1710 = vmatprep.subr.bf16.mxu0 %v1875_v3  ;;  %1851 = vmatprep.subr.bf16.mxu1 %v1875_v3  ;;  %v1881_v10 = vld [vmem:[%s1985_s13 + $0x8] sm:$0xff]   ;;  %v1882_v13 = vld [vmem:[%s1985_s13 + $0x10] sm:$0xff]  }
  0x11   : > { %1720 = vmatprep.mubr.bf16.mxu0 %v1880_v4  ;;  %v1888_v7 = vld [vmem:[%s1985_s13 + $0x40] sm:$0xff]   ;;  %v1889_v11 = vld [vmem:[%s1985_s13 + $0x48] sm:$0xff]   ;;  %v1890_v14 = vld [vmem:[%s1985_s13 + $0x50] sm:$0xff]  }
  0x12   : > { %1736 = vmatprep.mubr.bf16.mxu1 %v1888_v7  ;;  %v1883_v17 = vld [vmem:[%s1985_s13 + $0x18] sm:$0xff]   ;;  %v1884_v19 = vld [vmem:[%s1985_s13 + $0x20] sm:$0xff]   ;;  %v1885_v23 = vld [vmem:[%s1985_s13 + $0x28] sm:$0xff]  }
  0x13   : > { %1711 = vmatpush3.bf16.msra.mxu0 %v1875_v3  ;;  %1859 = vmatpush3.bf16.msra.mxu1 %v1875_v3  ;;  %v1891_v18 = vld [vmem:[%s1985_s13 + $0x58] sm:$0xff]   ;;  %v1892_v20 = vld [vmem:[%s1985_s13 + $0x60] sm:$0xff]   ;;  %v1893_v24 = vld [vmem:[%s1985_s13 + $0x68] sm:$0xff]  }
  0x14   : > { %1712 = vmatprep.subr.bf16.mxu0 %v1876_v5  ;;  %1852 = vmatprep.subr.bf16.mxu1 %v1876_v5  ;;  %v1886_v25 = vld [vmem:[%s1985_s13 + $0x30] sm:$0xff]   ;;  %v1887_v28 = vld [vmem:[%s1985_s13 + $0x38] sm:$0xff]  }
  0x15   : > { %v1894_v26 = vld [vmem:[%s1985_s13 + $0x70] sm:$0xff]   ;;  %v1895_v29 = vld [vmem:[%s1985_s13 + $0x78] sm:$0xff]  }
  0x17   : > { %1713 = vmatpush3.bf16.msra.mxu0 %v1876_v5  ;;  %1860 = vmatpush3.bf16.msra.mxu1 %v1876_v5 }
  0x18   : > { %1714 = vmatprep.subr.bf16.mxu0 %v1877_v6  ;;  %1853 = vmatprep.subr.bf16.mxu1 %v1877_v6 }
  0x1b   : > { %1715 = vmatpush3.bf16.msra.mxu0 %v1877_v6  ;;  %1861 = vmatpush3.bf16.msra.mxu1 %v1877_v6 }
  0x1c   : > { %1716 = vmatprep.subr.bf16.mxu0 %v1878_v8  ;;  %1854 = vmatprep.subr.bf16.mxu1 %v1878_v8 }
  0x1f   : > { %1717 = vmatpush3.bf16.msra.mxu0 %v1878_v8  ;;  %1862 = vmatpush3.bf16.msra.mxu1 %v1878_v8 }
  0x20   : > { %1718 = vmatprep.subr.bf16.mxu0 %v1879_v9  ;;  %1855 = vmatprep.subr.bf16.mxu1 %v1879_v9 }
  0x23   : > { %1719 = vmatpush3.bf16.msra.mxu0 %v1879_v9  ;;  %1863 = vmatpush3.bf16.msra.mxu1 %v1879_v9 }
  0x24   : > { %1752 = vmatprep.subr.bf16.mxu1 %v1896_v12  ;;  %1800 = vmatprep.subr.bf16.mxu0 %v1904_v32 }
  0x26   : > { %1721 = vmatmul.mubr.bf16.vlgmr.msra.gmra.mrb[0].mxu0 %v1881_v10  ;;  %1737 = vmatmul.mubr.bf16.vlgmr.msra.gmra.mrb[0].mxu1 %v1889_v11 }
  0x27   : > { %1724 = vmatprep.mubr.bf16.mxu0 %v1882_v13  ;;  %1740 = vmatprep.mubr.bf16.mxu1 %v1890_v14 }
  0x28   : > { %1753 = vmatpush3.bf16.msra.mxu1 %v1896_v12  ;;  %1801 = vmatpush3.bf16.msra.mxu0 %v1904_v32 }
  0x29   : > { %1754 = vmatprep.subr.bf16.mxu1 %v1897_v15  ;;  %1802 = vmatprep.subr.bf16.mxu0 %v1905_v33 }
  0x2c   : > { %1755 = vmatpush3.bf16.msra.mxu1 %v1897_v15  ;;  %1803 = vmatpush3.bf16.msra.mxu0 %v1905_v33 }
  0x2d   : > { %1756 = vmatprep.subr.bf16.mxu1 %v1898_v16  ;;  %1804 = vmatprep.subr.bf16.mxu0 %v1906_v34 }
  0x2e   : > { %1725 = vmatmul.mubr.bf16.gmra.mrb[4].mxu0 %v1883_v17  ;;  %1741 = vmatmul.mubr.bf16.gmra.mrb[4].mxu1 %v1891_v18 }
  0x2f   : > { %1728 = vmatprep.mubr.bf16.mxu0 %v1884_v19  ;;  %1744 = vmatprep.mubr.bf16.mxu1 %v1892_v20 }
  0x30   : > { %1757 = vmatpush3.bf16.msra.mxu1 %v1898_v16  ;;  %1805 = vmatpush3.bf16.msra.mxu0 %v1906_v34 }
  0x31   : > { %1758 = vmatprep.subr.bf16.mxu1 %v1899_v21  ;;  %1806 = vmatprep.subr.bf16.mxu0 %v1907_v35 }
  0x34   : > { %1759 = vmatpush3.bf16.msra.mxu1 %v1899_v21  ;;  %1807 = vmatpush3.bf16.msra.mxu0 %v1907_v35 }
  0x35   : > { %1760 = vmatprep.subr.bf16.mxu1 %v1900_v22  ;;  %1808 = vmatprep.subr.bf16.mxu0 %v1908_v36 }
  0x36   : > { %1729 = vmatmul.mubr.bf16.gmra.mrb[8].mxu0 %v1885_v23  ;;  %1745 = vmatmul.mubr.bf16.gmra.mrb[8].mxu1 %v1893_v24 }
  0x37   : > { %1732 = vmatprep.mubr.bf16.mxu0 %v1886_v25  ;;  %1748 = vmatprep.mubr.bf16.mxu1 %v1894_v26 }
  0x38   : > { %1761 = vmatpush3.bf16.msra.mxu1 %v1900_v22  ;;  %1809 = vmatpush3.bf16.msra.mxu0 %v1908_v36 }
  0x39   : > { %1762 = vmatprep.subr.bf16.mxu1 %v1901_v27  ;;  %1810 = vmatprep.subr.bf16.mxu0 %v1909_v37 }
  0x3c   : > { %1763 = vmatpush3.bf16.msra.mxu1 %v1901_v27  ;;  %1811 = vmatpush3.bf16.msra.mxu0 %v1909_v37 }
  0x3d   : > { %1764 = vmatprep.subr.bf16.mxu1 %v1902_v30 }
  0x3e   : > { %1733 = vmatmul.mubr.bf16.gmra.mrb[12].mxu0 %v1887_v28  ;;  %1749 = vmatmul.mubr.bf16.gmra.mrb[12].mxu1 %v1895_v29 }
  0x40   : > { %1765 = vmatpush3.bf16.msra.mxu1 %v1902_v30 }
  0x41   : > { %1766 = vmatprep.subr.bf16.mxu1 %v1903_v31 }
  0x44   : > { %1767 = vmatpush3.bf16.msra.mxu1 %v1903_v31 }
  0xf9   : > { %v1722_v39 = vpop.f32.mrb[0].mxu0  ;;  %v1738_v40 = vpop.f32.mrb[0].mxu1 }
  0xfa   : > { %v525_v41 = vadd.f32 %v1722_v39, %v2063_v38  ;;  %v516_v42 = vpop.f32.mrb[1].mxu0  ;;  %v589_v43 = vadd.f32 %v1738_v40, %v2063_v38  ;;  %v580_v44 = vpop.f32.mrb[1].mxu1 }
  0xfb   : > { %v517_v45 = vadd.f32 %v2063_v38, %v516_v42  ;;  %v1723_v46 = vpop.f32.mrb[2].mxu0  ;;  %v581_v47 = vadd.f32 %v2063_v38, %v580_v44  ;;  %v1739_v48 = vpop.f32.mrb[2].mxu1 }
  0xfc   : > { %v528_v49 = vadd.f32 %v1723_v46, %v2063_v38  ;;  %v519_v50 = vpop.f32.mrb[3].mxu0  ;;  %v661_v51 = vmax.f32 %v589_v43, 0.0  ;;  %v592_v52 = vadd.f32 %v1739_v48, %v2063_v38  ;;  %v583_v53 = vpop.f32.mrb[3].mxu1  ;;  %v645_v57 = vmax.f32 %v525_v41, 0.0 }
  0xfd   : > { %v520_v54 = vadd.f32 %v2063_v38, %v519_v50  ;;  %v659_v55 = vmax.f32 %v581_v47, 0.0  ;;  %v584_v56 = vadd.f32 %v2063_v38, %v583_v53  ;;  %v643_v60 = vmax.f32 %v517_v45, 0.0 }
  0xfe   : > { %v646_v58 = vmax.f32 %v528_v49, 0.0  ;;  %v662_v59 = vmax.f32 %v592_v52, 0.0 }
  0xff   : > { %v644_v61 = vmax.f32 %v520_v54, 0.0  ;;  %v660_v62 = vmax.f32 %v584_v56, 0.0 }
 0x100   : > { %v676_v63 = vpack.c.bf16 %v646_v58, %v645_v57  ;;  %v2073_v0 = vpack.c.bf16 %v662_v59, %v661_v51 }
 0x101   : > { %v675_v1 = vpack.c.bf16 %v644_v61, %v643_v60  ;;  %v1726_v2 = vpop.f32.mrb[4].mxu0  ;;  %v2075_v3 = vpack.c.bf16 %v660_v62, %v659_v55  ;;  %v1742_v4 = vpop.f32.mrb[4].mxu1 }
 0x102   : > { %v541_v5 = vadd.f32 %v1726_v2, %v2063_v38  ;;  %v532_v6 = vpop.f32.mrb[5].mxu0  ;;  %v605_v7 = vadd.f32 %v1742_v4, %v2063_v38  ;;  %v596_v8 = vpop.f32.mrb[5].mxu1 }
 0x103   : > { %v533_v9 = vadd.f32 %v2063_v38, %v532_v6  ;;  %v1727_v10 = vpop.f32.mrb[6].mxu0  ;;  %1768 = vmatprep.mubr.bf16.mxu1 %v675_v1  ;;  %v597_v11 = vadd.f32 %v2063_v38, %v596_v8  ;;  %v1743_v12 = vpop.f32.mrb[6].mxu1 }
 0x104   : > { %v544_v13 = vadd.f32 %v1727_v10, %v2063_v38  ;;  %v535_v14 = vpop.f32.mrb[7].mxu0  ;;  %1769 = vmatmul.mubr.bf16.vlgmr.msra.gmra.mrb[16].mxu1 %v676_v63  ;;  %v665_v15 = vmax.f32 %v605_v7, 0.0  ;;  %v608_v16 = vadd.f32 %v1743_v12, %v2063_v38  ;;  %v599_v17 = vpop.f32.mrb[7].mxu1  ;;  %v649_v21 = vmax.f32 %v541_v5, 0.0 }
 0x105   : > { %v536_v18 = vadd.f32 %v2063_v38, %v535_v14  ;;  %v663_v19 = vmax.f32 %v597_v11, 0.0  ;;  %v600_v20 = vadd.f32 %v2063_v38, %v599_v17  ;;  %v647_v24 = vmax.f32 %v533_v9, 0.0 }
 0x106   : > { %v650_v22 = vmax.f32 %v544_v13, 0.0  ;;  %v666_v23 = vmax.f32 %v608_v16, 0.0 }
 0x107   : > { %v648_v25 = vmax.f32 %v536_v18, 0.0  ;;  %v664_v26 = vmax.f32 %v600_v20, 0.0 }
 0x108   : > { %v678_v27 = vpack.c.bf16 %v650_v22, %v649_v21  ;;  %v2085_v28 = vpack.c.bf16 %v666_v23, %v665_v15 }
 0x109   : > { %v677_v29 = vpack.c.bf16 %v648_v25, %v647_v24  ;;  %v1730_v30 = vpop.f32.mrb[8].mxu0  ;;  %v2087_v31 = vpack.c.bf16 %v664_v26, %v663_v19  ;;  %v1746_v32 = vpop.f32.mrb[8].mxu1 }
 0x10a   : > { %v557_v33 = vadd.f32 %v1730_v30, %v2063_v38  ;;  %v548_v34 = vpop.f32.mrb[9].mxu0  ;;  %v621_v35 = vadd.f32 %v1746_v32, %v2063_v38  ;;  %v612_v36 = vpop.f32.mrb[9].mxu1 }
 0x10b   : > { %v549_v37 = vadd.f32 %v2063_v38, %v548_v34  ;;  %v1731_v39 = vpop.f32.mrb[10].mxu0  ;;  %1772 = vmatprep.mubr.bf16.mxu1 %v677_v29  ;;  %v613_v40 = vadd.f32 %v2063_v38, %v612_v36  ;;  %v1747_v41 = vpop.f32.mrb[10].mxu1 }
 0x10c   : > { %v560_v42 = vadd.f32 %v1731_v39, %v2063_v38  ;;  %v551_v43 = vpop.f32.mrb[11].mxu0  ;;  %1773 = vmatmul.mubr.bf16.gmra.mrb[20].mxu1 %v678_v27  ;;  %v669_v44 = vmax.f32 %v621_v35, 0.0  ;;  %v624_v45 = vadd.f32 %v1747_v41, %v2063_v38  ;;  %v615_v46 = vpop.f32.mrb[11].mxu1  ;;  %v653_v50 = vmax.f32 %v557_v33, 0.0 }
 0x10d   : > { %v552_v47 = vadd.f32 %v2063_v38, %v551_v43  ;;  %v667_v48 = vmax.f32 %v613_v40, 0.0  ;;  %v616_v49 = vadd.f32 %v2063_v38, %v615_v46  ;;  %v651_v53 = vmax.f32 %v549_v37, 0.0 }
 0x10e   : > { %v654_v51 = vmax.f32 %v560_v42, 0.0  ;;  %v670_v52 = vmax.f32 %v624_v45, 0.0 }
 0x10f   : > { %v652_v54 = vmax.f32 %v552_v47, 0.0  ;;  %v668_v55 = vmax.f32 %v616_v49, 0.0 }
 0x110   : > { %v680_v56 = vpack.c.bf16 %v654_v51, %v653_v50  ;;  %v688_v57 = vpack.c.bf16 %v670_v52, %v669_v44 }
 0x111   : > { %v679_v58 = vpack.c.bf16 %v652_v54, %v651_v53  ;;  %v1734_v59 = vpop.f32.mrb[12].mxu0  ;;  %v687_v60 = vpack.c.bf16 %v668_v55, %v667_v48  ;;  %v1750_v61 = vpop.f32.mrb[12].mxu1 }
 0x112   : > { %v573_v62 = vadd.f32 %v1734_v59, %v2063_v38  ;;  %v564_v63 = vpop.f32.mrb[13].mxu0  ;;  %v637_v1 = vadd.f32 %v1750_v61, %v2063_v38  ;;  %v628_v2 = vpop.f32.mrb[13].mxu1 }
 0x113   : > { %v565_v4 = vadd.f32 %v2063_v38, %v564_v63  ;;  %v1735_v5 = vpop.f32.mrb[14].mxu0  ;;  %1776 = vmatprep.mubr.bf16.mxu1 %v679_v58  ;;  %v629_v6 = vadd.f32 %v2063_v38, %v628_v2  ;;  %v1751_v7 = vpop.f32.mrb[14].mxu1 }
 0x114   : > { %v576_v8 = vadd.f32 %v1735_v5, %v2063_v38  ;;  %v567_v9 = vpop.f32.mrb[15].mxu0  ;;  %1777 = vmatmul.mubr.bf16.gmra.mrb[24].mxu1 %v680_v56  ;;  %v673_v10 = vmax.f32 %v637_v1, 0.0  ;;  %v640_v11 = vadd.f32 %v1751_v7, %v2063_v38  ;;  %v631_v12 = vpop.f32.mrb[15].mxu1  ;;  %v657_v16 = vmax.f32 %v573_v62, 0.0 }
 0x115   : > { %v568_v13 = vadd.f32 %v2063_v38, %v567_v9  ;;  %v671_v14 = vmax.f32 %v629_v6, 0.0  ;;  %v632_v15 = vadd.f32 %v2063_v38, %v631_v12  ;;  %v655_v19 = vmax.f32 %v565_v4, 0.0  ;;  %v1910_v38 = vld [vmem:[%s2220_s5 + $0x30] sm:$0xff]  }
 0x116   : > { %v658_v17 = vmax.f32 %v576_v8, 0.0  ;;  %v674_v18 = vmax.f32 %v640_v11, 0.0  ;;  %1812 = vmatprep.subr.bf16.mxu0 %v1910_v38 }
 0x117   : > { %v656_v20 = vmax.f32 %v568_v13, 0.0  ;;  %v672_v21 = vmax.f32 %v632_v15, 0.0  ;;  %1813 = vmatpush3.bf16.msra.mxu0 %v1910_v38 }
 0x118   : > { %v682_v22 = vpack.c.bf16 %v658_v17, %v657_v16  ;;  %v690_v23 = vpack.c.bf16 %v674_v18, %v673_v10 }
 0x119   : > { %v681_v24 = vpack.c.bf16 %v656_v20, %v655_v19  ;;  %v689_v25 = vpack.c.bf16 %v672_v21, %v671_v14 }
 0x11b   : > { %1780 = vmatprep.mubr.bf16.mxu1 %v681_v24 }
 0x11c   : > { %1781 = vmatmul.mubr.bf16.gmra.mrb[28].mxu1 %v682_v22 }
 0x11d   : > { %1784 = vmatprep.mubr.bf16.mxu1 %v2075_v3  ;;  %v1911_v3 = vld [vmem:[%s2220_s5 + $0x38] sm:$0xff]  }
 0x11e   : > { %1814 = vmatprep.subr.bf16.mxu0 %v1911_v3 }
 0x11f   : > { %1815 = vmatpush3.bf16.msra.mxu0 %v1911_v3 }
 0x124   : > { %1785 = vmatmul.mubr.bf16.gmra.mrb[32].mxu1 %v2073_v0  ;;  %v2118_v0 = vld [vmem:[%s2219_s4] ss:$0 sm:$0xff] }
 0x125   : > { %1788 = vmatprep.mubr.bf16.mxu1 %v2087_v31 }
 0x12c   : > { %1789 = vmatmul.mubr.bf16.gmra.mrb[36].mxu1 %v2085_v28 }
 0x12d   : > { %1792 = vmatprep.mubr.bf16.mxu1 %v687_v60 }
 0x134   : > { %1793 = vmatmul.mubr.bf16.gmra.mrb[40].mxu1 %v688_v57 }
 0x135   : > { %1796 = vmatprep.mubr.bf16.mxu1 %v689_v25 }
 0x13c   : > { %1797 = vmatmul.mubr.bf16.gmra.mrb[44].mxu1 %v690_v23 }
 0x1d7   : > { %v1770_v26 = vpop.f32.mrb[16].mxu1 }
 0x1d8   : > { %v805_v27 = vadd.f32 %v1770_v26, %v2118_v0  ;;  %v796_v28 = vpop.f32.mrb[17].mxu1 }
 0x1d9   : > { %v797_v29 = vadd.f32 %v2118_v0, %v796_v28  ;;  %v1771_v30 = vpop.f32.mrb[18].mxu1 }
 0x1da   : > { %v808_v31 = vadd.f32 %v1771_v30, %v2118_v0  ;;  %v799_v32 = vpop.f32.mrb[19].mxu1  ;;  %v925_v34 = vmax.f32 %v805_v27, 0.0 }
 0x1db   : > { %v800_v33 = vadd.f32 %v2118_v0, %v799_v32  ;;  %v923_v36 = vmax.f32 %v797_v29, 0.0 }
 0x1dc   : > { %v926_v35 = vmax.f32 %v808_v31, 0.0 }
 0x1dd   : > { %v924_v37 = vmax.f32 %v800_v33, 0.0 }
 0x1de   : > { %v956_v39 = vpack.c.bf16 %v926_v35, %v925_v34 }
 0x1df   : > { %v955_v40 = vpack.c.bf16 %v924_v37, %v923_v36  ;;  %v1774_v41 = vpop.f32.mrb[20].mxu1 }
 0x1e0   : > { %v821_v42 = vadd.f32 %v1774_v41, %v2118_v0  ;;  %v812_v43 = vpop.f32.mrb[21].mxu1 }
 0x1e1   : > { %v813_v44 = vadd.f32 %v2118_v0, %v812_v43  ;;  %v1775_v45 = vpop.f32.mrb[22].mxu1  ;;  %1816 = vmatprep.mubr.bf16.mxu0 %v955_v40 }
 0x1e2   : > { %v824_v46 = vadd.f32 %v1775_v45, %v2118_v0  ;;  %v815_v47 = vpop.f32.mrb[23].mxu1  ;;  %1817 = vmatmul.mubr.bf16.vlgmr.msra.gmra.mrb[16].mxu0 %v956_v39  ;;  %v929_v49 = vmax.f32 %v821_v42, 0.0 }
 0x1e3   : > { %v816_v48 = vadd.f32 %v2118_v0, %v815_v47  ;;  %v927_v51 = vmax.f32 %v813_v44, 0.0 }
 0x1e4   : > { %v930_v50 = vmax.f32 %v824_v46, 0.0 }
 0x1e5   : > { %v928_v52 = vmax.f32 %v816_v48, 0.0 }
 0x1e6   : > { %v958_v53 = vpack.c.bf16 %v930_v50, %v929_v49 }
 0x1e7   : > { %v957_v54 = vpack.c.bf16 %v928_v52, %v927_v51  ;;  %v1778_v55 = vpop.f32.mrb[24].mxu1 }
 0x1e8   : > { %v837_v56 = vadd.f32 %v1778_v55, %v2118_v0  ;;  %v828_v57 = vpop.f32.mrb[25].mxu1 }
 0x1e9   : > { %v829_v58 = vadd.f32 %v2118_v0, %v828_v57  ;;  %v1779_v59 = vpop.f32.mrb[26].mxu1  ;;  %1820 = vmatprep.mubr.bf16.mxu0 %v957_v54 }
 0x1ea   : > { %v840_v60 = vadd.f32 %v1779_v59, %v2118_v0  ;;  %v831_v61 = vpop.f32.mrb[27].mxu1  ;;  %1821 = vmatmul.mubr.bf16.gmra.mrb[20].mxu0 %v958_v53  ;;  %v933_v63 = vmax.f32 %v837_v56, 0.0 }
 0x1eb   : > { %v832_v62 = vadd.f32 %v2118_v0, %v831_v61  ;;  %v931_v2 = vmax.f32 %v829_v58, 0.0 }
 0x1ec   : > { %v934_v1 = vmax.f32 %v840_v60, 0.0 }
 0x1ed   : > { %v932_v4 = vmax.f32 %v832_v62, 0.0 }
 0x1ee   : > { %v960_v5 = vpack.c.bf16 %v934_v1, %v933_v63 }
 0x1ef   : > { %v959_v6 = vpack.c.bf16 %v932_v4, %v931_v2  ;;  %v1782_v7 = vpop.f32.mrb[28].mxu1 }
 0x1f0   : > { %v853_v8 = vadd.f32 %v1782_v7, %v2118_v0  ;;  %v844_v9 = vpop.f32.mrb[29].mxu1 }
 0x1f1   : > { %v845_v10 = vadd.f32 %v2118_v0, %v844_v9  ;;  %v1783_v11 = vpop.f32.mrb[30].mxu1  ;;  %1824 = vmatprep.mubr.bf16.mxu0 %v959_v6 }
 0x1f2   : > { %v856_v12 = vadd.f32 %v1783_v11, %v2118_v0  ;;  %v847_v13 = vpop.f32.mrb[31].mxu1  ;;  %1825 = vmatmul.mubr.bf16.gmra.mrb[24].mxu0 %v960_v5  ;;  %v937_v15 = vmax.f32 %v853_v8, 0.0 }
 0x1f3   : > { %v848_v14 = vadd.f32 %v2118_v0, %v847_v13  ;;  %v935_v17 = vmax.f32 %v845_v10, 0.0 }
 0x1f4   : > { %v938_v16 = vmax.f32 %v856_v12, 0.0 }
 0x1f5   : > { %v936_v18 = vmax.f32 %v848_v14, 0.0 }
 0x1f6   : > { %v962_v19 = vpack.c.bf16 %v938_v16, %v937_v15  ;;  %v2155_v15 = vld [vmem:[%s2221_s6] ss:$0 sm:$0xff] }
 0x1f7   : > { %v961_v20 = vpack.c.bf16 %v936_v18, %v935_v17  ;;  %v1786_v21 = vpop.f32.mrb[32].mxu1 }
 0x1f8   : > { %v869_v22 = vadd.f32 %v1786_v21, %v2118_v0  ;;  %v860_v23 = vpop.f32.mrb[33].mxu1 }
 0x1f9   : > { %v861_v24 = vadd.f32 %v2118_v0, %v860_v23  ;;  %v1787_v25 = vpop.f32.mrb[34].mxu1  ;;  %1828 = vmatprep.mubr.bf16.mxu0 %v961_v20 }
 0x1fa   : > { %v872_v38 = vadd.f32 %v1787_v25, %v2118_v0  ;;  %v863_v3 = vpop.f32.mrb[35].mxu1  ;;  %1829 = vmatmul.mubr.bf16.gmra.mrb[28].mxu0 %v962_v19  ;;  %v941_v27 = vmax.f32 %v869_v22, 0.0 }
 0x1fb   : > { %v864_v26 = vadd.f32 %v2118_v0, %v863_v3  ;;  %v939_v29 = vmax.f32 %v861_v24, 0.0 }
 0x1fc   : > { %v942_v28 = vmax.f32 %v872_v38, 0.0 }
 0x1fd   : > { %v940_v30 = vmax.f32 %v864_v26, 0.0 }
 0x1fe   : > { %v964_v31 = vpack.c.bf16 %v942_v28, %v941_v27 }
 0x1ff   : > { %v963_v32 = vpack.c.bf16 %v940_v30, %v939_v29  ;;  %v1790_v33 = vpop.f32.mrb[36].mxu1 }
 0x200   : > { %v885_v34 = vadd.f32 %v1790_v33, %v2118_v0  ;;  %v876_v35 = vpop.f32.mrb[37].mxu1 }
 0x201   : > { %v877_v36 = vadd.f32 %v2118_v0, %v876_v35  ;;  %v1791_v37 = vpop.f32.mrb[38].mxu1  ;;  %1832 = vmatprep.mubr.bf16.mxu0 %v963_v32 }
 0x202   : > { %v888_v39 = vadd.f32 %v1791_v37, %v2118_v0  ;;  %v879_v40 = vpop.f32.mrb[39].mxu1  ;;  %1833 = vmatmul.mubr.bf16.gmra.mrb[32].mxu0 %v964_v31  ;;  %v945_v42 = vmax.f32 %v885_v34, 0.0 }
 0x203   : > { %v880_v41 = vadd.f32 %v2118_v0, %v879_v40  ;;  %v943_v44 = vmax.f32 %v877_v36, 0.0 }
 0x204   : > { %v946_v43 = vmax.f32 %v888_v39, 0.0 }
 0x205   : > { %v944_v45 = vmax.f32 %v880_v41, 0.0 }
 0x206   : > { %v966_v46 = vpack.c.bf16 %v946_v43, %v945_v42 }
 0x207   : > { %v965_v47 = vpack.c.bf16 %v944_v45, %v943_v44  ;;  %v1794_v48 = vpop.f32.mrb[40].mxu1 }
 0x208   : > { %v901_v49 = vadd.f32 %v1794_v48, %v2118_v0  ;;  %v892_v50 = vpop.f32.mrb[41].mxu1 }
 0x209   : > { %v893_v51 = vadd.f32 %v2118_v0, %v892_v50  ;;  %v1795_v52 = vpop.f32.mrb[42].mxu1  ;;  %1836 = vmatprep.mubr.bf16.mxu0 %v965_v47 }
 0x20a   : > { %v904_v53 = vadd.f32 %v1795_v52, %v2118_v0  ;;  %v895_v54 = vpop.f32.mrb[43].mxu1  ;;  %1837 = vmatmul.mubr.bf16.gmra.mrb[36].mxu0 %v966_v46  ;;  %v949_v56 = vmax.f32 %v901_v49, 0.0 }
 0x20b   : > { %v896_v55 = vadd.f32 %v2118_v0, %v895_v54  ;;  %v947_v58 = vmax.f32 %v893_v51, 0.0 }
 0x20c   : > { %v950_v57 = vmax.f32 %v904_v53, 0.0 }
 0x20d   : > { %v948_v59 = vmax.f32 %v896_v55, 0.0 }
 0x20e   : > { %v968_v60 = vpack.c.bf16 %v950_v57, %v949_v56 }
 0x20f   : > { %v967_v61 = vpack.c.bf16 %v948_v59, %v947_v58  ;;  %v1798_v62 = vpop.f32.mrb[44].mxu1 }
 0x210   : > { %v917_v63 = vadd.f32 %v1798_v62, %v2118_v0  ;;  %v908_v1 = vpop.f32.mrb[45].mxu1 }
 0x211   : > { %v909_v2 = vadd.f32 %v2118_v0, %v908_v1  ;;  %v1799_v4 = vpop.f32.mrb[46].mxu1  ;;  %1840 = vmatprep.mubr.bf16.mxu0 %v967_v61 }
 0x212   : > { %v920_v5 = vadd.f32 %v1799_v4, %v2118_v0  ;;  %v911_v6 = vpop.f32.mrb[47].mxu1  ;;  %1841 = vmatmul.mubr.bf16.gmra.mrb[40].mxu0 %v968_v60  ;;  %v953_v8 = vmax.f32 %v917_v63, 0.0 }
 0x213   : > { %v912_v7 = vadd.f32 %v2118_v0, %v911_v6  ;;  %v951_v10 = vmax.f32 %v909_v2, 0.0 }
 0x214   : > { %v954_v9 = vmax.f32 %v920_v5, 0.0 }
 0x215   : > { %v952_v11 = vmax.f32 %v912_v7, 0.0 }
 0x216   : > { %v970_v12 = vpack.c.bf16 %v954_v9, %v953_v8 }
 0x217   : > { %v969_v13 = vpack.c.bf16 %v952_v11, %v951_v10 }
 0x219   : > { %1844 = vmatprep.mubr.bf16.mxu0 %v969_v13 }
 0x21a   : > { %1845 = vmatmul.mubr.bf16.gmra.mrb[44].mxu0 %v970_v12 }
 0x2b5   : > { %v1818_v14 = vpop.f32.mrb[16].mxu0 }
 0x2b6   : > { %v1076_v16 = vpop.f32.mrb[17].mxu0  ;;  %v1085_v18 = vadd.f32 %v1818_v14, %v2155_v15 }
 0x2b7   : > { %v1819_v17 = vpop.f32.mrb[18].mxu0  ;;  %v1077_v20 = vadd.f32 %v2155_v15, %v1076_v16 }
 0x2b8   : > { %v1088_v0 = vadd.f32 %v1819_v17, %v2155_v15  ;;  %v1079_v19 = vpop.f32.mrb[19].mxu0 }
 0x2b9   : > { %v1080_v21 = vadd.f32 %v2155_v15, %v1079_v19 }
 0x2ba   : > { %v1545_v22 = vpack.c.bf16 %v1088_v0, %v1085_v18 }
 0x2bb   : > { %v1540_v23 = vpack.c.bf16 %v1080_v21, %v1077_v20 }
 0x2bc   : > { %1617 = vst [vmem:[%s2165_s25 + $0x8] sm:$0xff] %v1545_v22  }
 0x2bd   : > { %1541 = vst [vmem:[%s2165_s25] sm:$0xff] %v1540_v23   ;;  %v1822_v24 = vpop.f32.mrb[20].mxu0 }
 0x2be   : > { %v1092_v25 = vpop.f32.mrb[21].mxu0  ;;  %v1101_v3 = vadd.f32 %v1822_v24, %v2155_v15 }
 0x2bf   : > { %v1823_v38 = vpop.f32.mrb[22].mxu0  ;;  %v1093_v28 = vadd.f32 %v2155_v15, %v1092_v25 }
 0x2c0   : > { %v1104_v26 = vadd.f32 %v1823_v38, %v2155_v15  ;;  %v1095_v27 = vpop.f32.mrb[23].mxu0 }
 0x2c1   : > { %v1096_v29 = vadd.f32 %v2155_v15, %v1095_v27 }
 0x2c2   : > { %v1555_v30 = vpack.c.bf16 %v1104_v26, %v1101_v3 }
 0x2c3   : > { %v1550_v31 = vpack.c.bf16 %v1096_v29, %v1093_v28 }
 0x2c4   : > { %1619 = vst [vmem:[%s2165_s25 + $0x18] sm:$0xff] %v1555_v30  }
 0x2c5   : > { %1618 = vst [vmem:[%s2165_s25 + $0x10] sm:$0xff] %v1550_v31   ;;  %v1826_v32 = vpop.f32.mrb[24].mxu0 }
 0x2c6   : > { %v1108_v33 = vpop.f32.mrb[25].mxu0  ;;  %v1117_v35 = vadd.f32 %v1826_v32, %v2155_v15 }
 0x2c7   : > { %v1827_v34 = vpop.f32.mrb[26].mxu0  ;;  %v1109_v39 = vadd.f32 %v2155_v15, %v1108_v33 }
 0x2c8   : > { %v1120_v36 = vadd.f32 %v1827_v34, %v2155_v15  ;;  %v1111_v37 = vpop.f32.mrb[27].mxu0 }
 0x2c9   : > { %v1112_v40 = vadd.f32 %v2155_v15, %v1111_v37 }
 0x2ca   : > { %v1565_v41 = vpack.c.bf16 %v1120_v36, %v1117_v35 }
 0x2cb   : > { %v1560_v42 = vpack.c.bf16 %v1112_v40, %v1109_v39 }
 0x2cc   : > { %1621 = vst [vmem:[%s2165_s25 + $0x28] sm:$0xff] %v1565_v41  }
 0x2cd   : > { %1620 = vst [vmem:[%s2165_s25 + $0x20] sm:$0xff] %v1560_v42   ;;  %v1830_v43 = vpop.f32.mrb[28].mxu0 }
 0x2ce   : > { %v1124_v44 = vpop.f32.mrb[29].mxu0  ;;  %v1133_v46 = vadd.f32 %v1830_v43, %v2155_v15 }
 0x2cf   : > { %v1831_v45 = vpop.f32.mrb[30].mxu0  ;;  %v1125_v49 = vadd.f32 %v2155_v15, %v1124_v44 }
 0x2d0   : > { %v1136_v47 = vadd.f32 %v1831_v45, %v2155_v15  ;;  %v1127_v48 = vpop.f32.mrb[31].mxu0 }
 0x2d1   : > { %v1128_v50 = vadd.f32 %v2155_v15, %v1127_v48 }
 0x2d2   : > { %v1575_v51 = vpack.c.bf16 %v1136_v47, %v1133_v46 }
 0x2d3   : > { %v1570_v52 = vpack.c.bf16 %v1128_v50, %v1125_v49 }
 0x2d4   : > { %1623 = vst [vmem:[%s2165_s25 + $0x38] sm:$0xff] %v1575_v51  }
 0x2d5   : > { %1622 = vst [vmem:[%s2165_s25 + $0x30] sm:$0xff] %v1570_v52   ;;  %v1834_v53 = vpop.f32.mrb[32].mxu0 }
 0x2d6   : > { %v1140_v54 = vpop.f32.mrb[33].mxu0  ;;  %v1149_v56 = vadd.f32 %v1834_v53, %v2155_v15 }
 0x2d7   : > { %v1835_v55 = vpop.f32.mrb[34].mxu0  ;;  %v1141_v59 = vadd.f32 %v2155_v15, %v1140_v54 }
 0x2d8   : > { %v1152_v57 = vadd.f32 %v1835_v55, %v2155_v15  ;;  %v1143_v58 = vpop.f32.mrb[35].mxu0 }
 0x2d9   : > { %v1144_v60 = vadd.f32 %v2155_v15, %v1143_v58 }
 0x2da   : > { %v1585_v61 = vpack.c.bf16 %v1152_v57, %v1149_v56 }
 0x2db   : > { %v1580_v62 = vpack.c.bf16 %v1144_v60, %v1141_v59 }
 0x2dc   : > { %1625 = vst [vmem:[%s2165_s25 + $0x48] sm:$0xff] %v1585_v61  }
 0x2dd   : > { %1624 = vst [vmem:[%s2165_s25 + $0x40] sm:$0xff] %v1580_v62   ;;  %v1838_v63 = vpop.f32.mrb[36].mxu0 }
 0x2de   : > { %v1156_v1 = vpop.f32.mrb[37].mxu0  ;;  %v1165_v4 = vadd.f32 %v1838_v63, %v2155_v15 }
 0x2df   : > { %v1839_v2 = vpop.f32.mrb[38].mxu0  ;;  %v1157_v7 = vadd.f32 %v2155_v15, %v1156_v1 }
 0x2e0   : > { %v1168_v5 = vadd.f32 %v1839_v2, %v2155_v15  ;;  %v1159_v6 = vpop.f32.mrb[39].mxu0 }
 0x2e1   : > { %v1160_v8 = vadd.f32 %v2155_v15, %v1159_v6 }
 0x2e2   : > { %v1595_v9 = vpack.c.bf16 %v1168_v5, %v1165_v4 }
 0x2e3   : > { %v1590_v10 = vpack.c.bf16 %v1160_v8, %v1157_v7 }
 0x2e4   : > { %1627 = vst [vmem:[%s2165_s25 + $0x58] sm:$0xff] %v1595_v9  }
 0x2e5   : > { %1626 = vst [vmem:[%s2165_s25 + $0x50] sm:$0xff] %v1590_v10   ;;  %v1842_v11 = vpop.f32.mrb[40].mxu0 }
 0x2e6   : > { %v1172_v12 = vpop.f32.mrb[41].mxu0  ;;  %v1181_v14 = vadd.f32 %v1842_v11, %v2155_v15 }
 0x2e7   : > { %v1843_v13 = vpop.f32.mrb[42].mxu0  ;;  %v1173_v18 = vadd.f32 %v2155_v15, %v1172_v12 }
 0x2e8   : > { %v1184_v16 = vadd.f32 %v1843_v13, %v2155_v15  ;;  %v1175_v17 = vpop.f32.mrb[43].mxu0 }
 0x2e9   : > { %v1176_v0 = vadd.f32 %v2155_v15, %v1175_v17 }
 0x2ea   : > { %v1605_v19 = vpack.c.bf16 %v1184_v16, %v1181_v14 }
 0x2eb   : > { %v1600_v20 = vpack.c.bf16 %v1176_v0, %v1173_v18 }
 0x2ec   : > { %1629 = vst [vmem:[%s2165_s25 + $0x68] sm:$0xff] %v1605_v19  }
 0x2ed   : > { %1628 = vst [vmem:[%s2165_s25 + $0x60] sm:$0xff] %v1600_v20   ;;  %v1846_v21 = vpop.f32.mrb[44].mxu0 }
 0x2ee   : > { %v1188_v22 = vpop.f32.mrb[45].mxu0  ;;  %v1197_v24 = vadd.f32 %v1846_v21, %v2155_v15 }
 0x2ef   : > { %v1847_v23 = vpop.f32.mrb[46].mxu0  ;;  %v1189_v3 = vadd.f32 %v2155_v15, %v1188_v22 }
 0x2f0   : > { %v1200_v25 = vadd.f32 %v1847_v23, %v2155_v15  ;;  %v1191_v38 = vpop.f32.mrb[47].mxu0 }
 0x2f1   : > { %v1192_v26 = vadd.f32 %v2155_v15, %v1191_v38 }
 0x2f2   : > { %v1615_v27 = vpack.c.bf16 %v1200_v25, %v1197_v24 }
 0x2f3   : > { %v1610_v28 = vpack.c.bf16 %v1192_v26, %v1189_v3 }
 0x2f4   : > { %1631 = vst [vmem:[%s2165_s25 + $0x78] sm:$0xff] %v1615_v27  }
 0x2f5   : > { %1630 = vst [vmem:[%s2165_s25 + $0x70] sm:$0xff] %v1610_v28  }
 0x2f6 PF: > { %s17_s24 = sadd.s32 1, %s1918_s24  }
 0x2f7   : > { %p14_p4 = scmp.ge.s32.totalorder %s17_s24, 4  }
 0x2f9   :  { %16 = sbr.rel (!%p14_p4) target bundleno = 1 (0x1), region = 78 }

// kernel: geomol_gnn_forward.11
= control target key start
LH: loop header
LB: loop body
LE: loop exit
PB: predicated region body
PF: predicated region fallthrough
CT: control target
= control target key end

     0   :  { %s2513_s3 = inlined_call_operand.vmem [shape: bf16[128,128], index: 3, kind: input, shape index: {}]   ;;  %s2514_s1 = inlined_call_operand.vmem [shape: bf16[256,128], index: 1, kind: input, shape index: {}]   ;;  %s2515_s2 = inlined_call_operand.vmem [shape: bf16[128,128], index: 2, kind: input, shape index: {}]   ;;  %s2516_s0 = inlined_call_operand.vmem [shape: bf16[256,128], index: 0, kind: input, shape index: {}]   ;;  %s2517_s5 = inlined_call_operand.vmem [shape: bf16[128,128], index: 5, kind: input, shape index: {}]   ;;  %s2518_s7 = inlined_call_operand.vmem [shape: bf16[128,128], index: 7, kind: input, shape index: {}]   ;;  %s2519_s4 = inlined_call_operand.vmem [shape: f32[1,128], index: 4, kind: input, shape index: {}]   ;;  %s2520_s6 = inlined_call_operand.vmem [shape: f32[1,128], index: 6, kind: input, shape index: {}]   ;;  %s2521_s8 = inlined_call_operand.vmem [shape: f32[1,128], index: 8, kind: input, shape index: {}]   ;;  %s2522_s9 = inlined_call_operand.vmem [shape: bf16[256,128], index: 9, kind: output, shape index: {}]  }
   0x1   :  { %v2048_v0 = vld [vmem:[%s2513_s3] sm:$0xff]   ;;  %v2049_v1 = vld [vmem:[%s2513_s3 + $0x8] sm:$0xff]   ;;  %v2050_v2 = vld [vmem:[%s2513_s3 + $0x10] sm:$0xff]  }
   0x2   :  { %1824 = vmatprep.subr.bf16.mxu0 %v2048_v0  ;;  %v2051_v3 = vld [vmem:[%s2513_s3 + $0x18] sm:$0xff]   ;;  %v2056_v4 = vld [vmem:[%s2514_s1] sm:$0xff]   ;;  %v2053_v6 = vld [vmem:[%s2513_s3 + $0x28] sm:$0xff]  }
   0x3   :  { %1825 = vmatpush3.bf16.msra.mxu0 %v2048_v0  ;;  %1840 = vmatprep.mubr.bf16.mxu0 %v2056_v4  ;;  %v2052_v5 = vld [vmem:[%s2513_s3 + $0x20] sm:$0xff]   ;;  %v2054_v7 = vld [vmem:[%s2513_s3 + $0x30] sm:$0xff]   ;;  %v2055_v8 = vld [vmem:[%s2513_s3 + $0x38] sm:$0xff]  }
   0x4   :  { %1826 = vmatprep.subr.bf16.mxu0 %v2049_v1  ;;  %v2058_v9 = vld [vmem:[%s2515_s2] sm:$0xff]   ;;  %v2057_v10 = vld [vmem:[%s2514_s1 + $0x8] sm:$0xff]   ;;  %v2059_v11 = vld [vmem:[%s2514_s1 + $0x10] sm:$0xff]  }
   0x5   :  { %v2061_v12 = vld [vmem:[%s2515_s2 + $0x8] sm:$0xff]   ;;  %v2064_v13 = vld [vmem:[%s2515_s2 + $0x10] sm:$0xff]   ;;  %v2060_v14 = vld [vmem:[%s2514_s1 + $0x18] sm:$0xff]  }
   0x6   :  { %v2062_v15 = vld [vmem:[%s2514_s1 + $0x20] sm:$0xff]   ;;  %v2067_v16 = vld [vmem:[%s2515_s2 + $0x18] sm:$0xff]   ;;  %v2063_v18 = vld [vmem:[%s2514_s1 + $0x28] sm:$0xff]  }
   0x7   :  { %1827 = vmatpush3.bf16.msra.mxu0 %v2049_v1  ;;  %v2070_v17 = vld [vmem:[%s2515_s2 + $0x20] sm:$0xff]   ;;  %v2065_v19 = vld [vmem:[%s2514_s1 + $0x30] sm:$0xff]   ;;  %v2073_v20 = vld [vmem:[%s2515_s2 + $0x28] sm:$0xff]  }
   0x8   :  { %1828 = vmatprep.subr.bf16.mxu0 %v2050_v2  ;;  %v2096_v21 = vld [vmem:[%s2517_s5] sm:$0xff]   ;;  %v2097_v22 = vld [vmem:[%s2517_s5 + $0x8] sm:$0xff]   ;;  %v2066_v23 = vld [vmem:[%s2514_s1 + $0x38] sm:$0xff]  }
   0x9   :  { %1920 = vmatprep.subr.bf16.mxu1 %v2096_v21  ;;  %v2076_v24 = vld [vmem:[%s2515_s2 + $0x30] sm:$0xff]   ;;  %v2068_v26 = vld [vmem:[%s2514_s1 + $0x40] sm:$0xff]   ;;  %v2079_v27 = vld [vmem:[%s2515_s2 + $0x38] sm:$0xff]  }
   0xa   :  { %1921 = vmatpush3.bf16.msra.mxu1 %v2096_v21  ;;  %v2098_v25 = vld [vmem:[%s2517_s5 + $0x10] sm:$0xff]   ;;  %v2099_v28 = vld [vmem:[%s2517_s5 + $0x18] sm:$0xff]   ;;  %v2100_v29 = vld [vmem:[%s2517_s5 + $0x20] sm:$0xff]  }
   0xb   :  { %1829 = vmatpush3.bf16.msra.mxu0 %v2050_v2  ;;  %1922 = vmatprep.subr.bf16.mxu1 %v2097_v22  ;;  %v2069_v30 = vld [vmem:[%s2514_s1 + $0x48] sm:$0xff]   ;;  %v2071_v31 = vld [vmem:[%s2514_s1 + $0x50] sm:$0xff]   ;;  %v2072_v33 = vld [vmem:[%s2514_s1 + $0x58] sm:$0xff]  }
   0xc   :  { %1830 = vmatprep.subr.bf16.mxu0 %v2051_v3  ;;  %v2101_v32 = vld [vmem:[%s2517_s5 + $0x28] sm:$0xff]   ;;  %v2074_v34 = vld [vmem:[%s2514_s1 + $0x60] sm:$0xff]   ;;  %v2077_v36 = vld [vmem:[%s2514_s1 + $0x70] sm:$0xff]  }
   0xd   :  { %v2075_v35 = vld [vmem:[%s2514_s1 + $0x68] sm:$0xff]   ;;  %v2078_v37 = vld [vmem:[%s2514_s1 + $0x78] sm:$0xff]   ;;  %v2080_v38 = vld [vmem:[%s2516_s0] sm:$0xff]  }
   0xe   :  { %1923 = vmatpush3.bf16.msra.mxu1 %v2097_v22  ;;  %v2081_v39 = vld [vmem:[%s2516_s0 + $0x8] sm:$0xff]   ;;  %v2082_v40 = vld [vmem:[%s2516_s0 + $0x10] sm:$0xff]   ;;  %v2083_v41 = vld [vmem:[%s2516_s0 + $0x18] sm:$0xff]  }
   0xf   :  { %1831 = vmatpush3.bf16.msra.mxu0 %v2051_v3  ;;  %1924 = vmatprep.subr.bf16.mxu1 %v2098_v25  ;;  %v2084_v42 = vld [vmem:[%s2516_s0 + $0x20] sm:$0xff]   ;;  %v2085_v43 = vld [vmem:[%s2516_s0 + $0x28] sm:$0xff]   ;;  %v2086_v44 = vld [vmem:[%s2516_s0 + $0x30] sm:$0xff]  }
  0x10   :  { %1832 = vmatprep.subr.bf16.mxu0 %v2052_v5  ;;  %v2087_v45 = vld [vmem:[%s2516_s0 + $0x38] sm:$0xff]   ;;  %v2088_v46 = vld [vmem:[%s2516_s0 + $0x40] sm:$0xff]   ;;  %v2089_v47 = vld [vmem:[%s2516_s0 + $0x48] sm:$0xff]  }
  0x11   :  { %v2090_v48 = vld [vmem:[%s2516_s0 + $0x50] sm:$0xff]   ;;  %v2091_v49 = vld [vmem:[%s2516_s0 + $0x58] sm:$0xff]   ;;  %v2092_v50 = vld [vmem:[%s2516_s0 + $0x60] sm:$0xff]  }
  0x12   :  { %1925 = vmatpush3.bf16.msra.mxu1 %v2098_v25  ;;  %v2093_v51 = vld [vmem:[%s2516_s0 + $0x68] sm:$0xff]   ;;  %v2094_v52 = vld [vmem:[%s2516_s0 + $0x70] sm:$0xff]   ;;  %v2095_v53 = vld [vmem:[%s2516_s0 + $0x78] sm:$0xff]  }
  0x13   :  { %1833 = vmatpush3.bf16.msra.mxu0 %v2052_v5  ;;  %1926 = vmatprep.subr.bf16.mxu1 %v2099_v28  ;;  %v2102_v54 = vld [vmem:[%s2517_s5 + $0x30] sm:$0xff]   ;;  %v2103_v55 = vld [vmem:[%s2517_s5 + $0x38] sm:$0xff]   ;;  %v2104_v56 = vld [vmem:[%s2518_s7] sm:$0xff]  }
  0x14   :  { %1834 = vmatprep.subr.bf16.mxu0 %v2053_v6  ;;  %v2336_v57 = vld [vmem:[%s2519_s4] ss:$0 sm:$0xff] }
  0x16   :  { %1927 = vmatpush3.bf16.msra.mxu1 %v2099_v28 }
  0x17   :  { %1835 = vmatpush3.bf16.msra.mxu0 %v2053_v6  ;;  %1928 = vmatprep.subr.bf16.mxu1 %v2100_v29 }
  0x18   :  { %1836 = vmatprep.subr.bf16.mxu0 %v2054_v7 }
  0x1a   :  { %1929 = vmatpush3.bf16.msra.mxu1 %v2100_v29 }
  0x1b   :  { %1837 = vmatpush3.bf16.msra.mxu0 %v2054_v7  ;;  %1930 = vmatprep.subr.bf16.mxu1 %v2101_v32 }
  0x1c   :  { %1838 = vmatprep.subr.bf16.mxu0 %v2055_v8 }
  0x1e   :  { %1931 = vmatpush3.bf16.msra.mxu1 %v2101_v32 }
  0x1f   :  { %1839 = vmatpush3.bf16.msra.mxu0 %v2055_v8  ;;  %1932 = vmatprep.subr.bf16.mxu1 %v2102_v54 }
  0x20   :  { %1872 = vmatprep.subr.bf16.mxu0 %v2058_v9 }
  0x22   :  { %1841 = vmatmul.mubr.bf16.vlgmr.msra.gmra.mrb[0].mxu0 %v2057_v10  ;;  %1933 = vmatpush3.bf16.msra.mxu1 %v2102_v54 }
  0x23   :  { %1873 = vmatpush3.bf16.msra.mxu0 %v2058_v9  ;;  %1844 = vmatprep.mubr.bf16.mxu0 %v2059_v11  ;;  %v2105_v11 = vld [vmem:[%s2518_s7 + $0x8] sm:$0xff]  }
  0x24   :  { %1874 = vmatprep.subr.bf16.mxu0 %v2061_v12  ;;  %1934 = vmatprep.subr.bf16.mxu1 %v2103_v55 }
  0x26   :  { %1935 = vmatpush3.bf16.msra.mxu1 %v2103_v55 }
  0x27   :  { %1875 = vmatpush3.bf16.msra.mxu0 %v2061_v12  ;;  %1968 = vmatprep.subr.bf16.mxu1 %v2104_v56 }
  0x28   :  { %1876 = vmatprep.subr.bf16.mxu0 %v2064_v13 }
  0x2a   :  { %1845 = vmatmul.mubr.bf16.gmra.mrb[4].mxu0 %v2060_v14 }
  0x2b   :  { %1848 = vmatprep.mubr.bf16.mxu0 %v2062_v15  ;;  %1877 = vmatpush3.bf16.msra.mxu0 %v2064_v13 }
  0x2c   :  { %1878 = vmatprep.subr.bf16.mxu0 %v2067_v16 }
  0x2f   :  { %1879 = vmatpush3.bf16.msra.mxu0 %v2067_v16 }
  0x30   :  { %1880 = vmatprep.subr.bf16.mxu0 %v2070_v17 }
  0x32   :  { %1849 = vmatmul.mubr.bf16.gmra.mrb[8].mxu0 %v2063_v18 }
  0x33   :  { %1852 = vmatprep.mubr.bf16.mxu0 %v2065_v19  ;;  %1881 = vmatpush3.bf16.msra.mxu0 %v2070_v17  ;;  %v2106_v19 = vld [vmem:[%s2518_s7 + $0x10] sm:$0xff]  }
  0x34   :  { %1882 = vmatprep.subr.bf16.mxu0 %v2073_v20 }
  0x37   :  { %1883 = vmatpush3.bf16.msra.mxu0 %v2073_v20 }
  0x38   :  { %1884 = vmatprep.subr.bf16.mxu0 %v2076_v24 }
  0x3a   :  { %1853 = vmatmul.mubr.bf16.gmra.mrb[12].mxu0 %v2066_v23 }
  0x3b   :  { %1856 = vmatprep.mubr.bf16.mxu0 %v2068_v26  ;;  %1885 = vmatpush3.bf16.msra.mxu0 %v2076_v24 }
  0x3c   :  { %1886 = vmatprep.subr.bf16.mxu0 %v2079_v27 }
  0x3f   :  { %1887 = vmatpush3.bf16.msra.mxu0 %v2079_v27  ;;  %v2107_v27 = vld [vmem:[%s2518_s7 + $0x18] sm:$0xff]  }
  0x42   :  { %1857 = vmatmul.mubr.bf16.gmra.mrb[16].mxu0 %v2069_v30 }
  0x43   :  { %1860 = vmatprep.mubr.bf16.mxu0 %v2071_v31 }
  0x4a   :  { %1861 = vmatmul.mubr.bf16.gmra.mrb[20].mxu0 %v2072_v33 }
  0x4b   :  { %1864 = vmatprep.mubr.bf16.mxu0 %v2074_v34 }
  0x52   :  { %1865 = vmatmul.mubr.bf16.gmra.mrb[24].mxu0 %v2075_v35  ;;  %v2108_v35 = vld [vmem:[%s2518_s7 + $0x20] sm:$0xff]  }
  0x53   :  { %1868 = vmatprep.mubr.bf16.mxu0 %v2077_v36 }
  0x5a   :  { %1869 = vmatmul.mubr.bf16.gmra.mrb[28].mxu0 %v2078_v37 }
  0x5b   :  { %1888 = vmatprep.mubr.bf16.mxu0 %v2080_v38 }
  0x62   :  { %1889 = vmatmul.mubr.bf16.vlgmr.msra.gmra.mrb[0].mxu0 %v2081_v39 }
  0x63   :  { %1892 = vmatprep.mubr.bf16.mxu0 %v2082_v40 }
  0x6a   :  { %1893 = vmatmul.mubr.bf16.gmra.mrb[4].mxu0 %v2083_v41 }
  0x6b   :  { %1896 = vmatprep.mubr.bf16.mxu0 %v2084_v42 }
  0x72   :  { %1897 = vmatmul.mubr.bf16.gmra.mrb[8].mxu0 %v2085_v43  ;;  %v2109_v43 = vld [vmem:[%s2518_s7 + $0x28] sm:$0xff]  }
  0x73   :  { %1900 = vmatprep.mubr.bf16.mxu0 %v2086_v44 }
  0x7a   :  { %1901 = vmatmul.mubr.bf16.gmra.mrb[12].mxu0 %v2087_v45 }
  0x7b   :  { %1904 = vmatprep.mubr.bf16.mxu0 %v2088_v46 }
  0x82   :  { %1905 = vmatmul.mubr.bf16.gmra.mrb[16].mxu0 %v2089_v47 }
  0x83   :  { %1908 = vmatprep.mubr.bf16.mxu0 %v2090_v48 }
  0x8a   :  { %1909 = vmatmul.mubr.bf16.gmra.mrb[20].mxu0 %v2091_v49 }
  0x8b   :  { %1912 = vmatprep.mubr.bf16.mxu0 %v2092_v50 }
  0x92   :  { %1913 = vmatmul.mubr.bf16.gmra.mrb[24].mxu0 %v2093_v51  ;;  %v2110_v51 = vld [vmem:[%s2518_s7 + $0x30] sm:$0xff]  }
  0x93   :  { %1916 = vmatprep.mubr.bf16.mxu0 %v2094_v52 }
  0x9a   :  { %1917 = vmatmul.mubr.bf16.gmra.mrb[28].mxu0 %v2095_v53 }
 0x135   :  { %v1890_v58 = vpop.f32.mrb[0].mxu0 }
 0x136   :  { %v748_v59 = vadd.f32 %v1890_v58, %v2336_v57  ;;  %v612_v60 = vpop.f32.mrb[1].mxu0 }
 0x137   :  { %v746_v61 = vadd.f32 %v2336_v57, %v612_v60  ;;  %v1891_v62 = vpop.f32.mrb[2].mxu0 }
 0x138   :  { %v749_v63 = vadd.f32 %v1891_v62, %v2336_v57  ;;  %v615_v0 = vpop.f32.mrb[3].mxu0  ;;  %v780_v2 = vmax.f32 %v748_v59, 0.0 }
 0x139   :  { %v747_v1 = vadd.f32 %v2336_v57, %v615_v0  ;;  %v778_v4 = vmax.f32 %v746_v61, 0.0 }
 0x13a   :  { %v781_v3 = vmax.f32 %v749_v63, 0.0 }
 0x13b   :  { %v779_v5 = vmax.f32 %v747_v1, 0.0 }
 0x13c   :  { %v811_v6 = vpack.c.bf16 %v781_v3, %v780_v2 }
 0x13d   :  { %v1894_v7 = vpop.f32.mrb[4].mxu0  ;;  %v810_v8 = vpack.c.bf16 %v779_v5, %v778_v4 }
 0x13e   :  { %v752_v9 = vadd.f32 %v1894_v7, %v2336_v57  ;;  %v628_v10 = vpop.f32.mrb[5].mxu0 }
 0x13f   :  { %v750_v12 = vadd.f32 %v2336_v57, %v628_v10  ;;  %v1895_v13 = vpop.f32.mrb[6].mxu0  ;;  %1936 = vmatprep.mubr.bf16.mxu1 %v810_v8 }
 0x140   :  { %v753_v14 = vadd.f32 %v1895_v13, %v2336_v57  ;;  %v631_v15 = vpop.f32.mrb[7].mxu0  ;;  %1937 = vmatmul.mubr.bf16.vlgmr.msra.gmra.mrb[0].mxu1 %v811_v6  ;;  %v784_v17 = vmax.f32 %v752_v9, 0.0 }
 0x141   :  { %v751_v16 = vadd.f32 %v2336_v57, %v631_v15  ;;  %1969 = vmatpush3.bf16.msra.mxu1 %v2104_v56  ;;  %v782_v20 = vmax.f32 %v750_v12, 0.0 }
 0x142   :  { %v785_v18 = vmax.f32 %v753_v14, 0.0  ;;  %1970 = vmatprep.subr.bf16.mxu1 %v2105_v11 }
 0x143   :  { %v783_v21 = vmax.f32 %v751_v16, 0.0 }
 0x144   :  { %v813_v22 = vpack.c.bf16 %v785_v18, %v784_v17 }
 0x145   :  { %v812_v23 = vpack.c.bf16 %v783_v21, %v782_v20  ;;  %v1898_v24 = vpop.f32.mrb[8].mxu0  ;;  %1971 = vmatpush3.bf16.msra.mxu1 %v2105_v11 }
 0x146   :  { %v756_v25 = vadd.f32 %v1898_v24, %v2336_v57  ;;  %v644_v26 = vpop.f32.mrb[9].mxu0  ;;  %1972 = vmatprep.subr.bf16.mxu1 %v2106_v19 }
 0x147   :  { %v754_v28 = vadd.f32 %v2336_v57, %v644_v26  ;;  %v1899_v29 = vpop.f32.mrb[10].mxu0  ;;  %1940 = vmatprep.mubr.bf16.mxu1 %v812_v23 }
 0x148   :  { %v757_v30 = vadd.f32 %v1899_v29, %v2336_v57  ;;  %v647_v31 = vpop.f32.mrb[11].mxu0  ;;  %1941 = vmatmul.mubr.bf16.gmra.mrb[4].mxu1 %v813_v22  ;;  %v788_v33 = vmax.f32 %v756_v25, 0.0 }
 0x149   :  { %v755_v32 = vadd.f32 %v2336_v57, %v647_v31  ;;  %1973 = vmatpush3.bf16.msra.mxu1 %v2106_v19  ;;  %v786_v36 = vmax.f32 %v754_v28, 0.0 }
 0x14a   :  { %v789_v34 = vmax.f32 %v757_v30, 0.0  ;;  %1974 = vmatprep.subr.bf16.mxu1 %v2107_v27 }
 0x14b   :  { %v787_v37 = vmax.f32 %v755_v32, 0.0 }
 0x14c   :  { %v815_v38 = vpack.c.bf16 %v789_v34, %v788_v33 }
 0x14d   :  { %v814_v39 = vpack.c.bf16 %v787_v37, %v786_v36  ;;  %v1902_v40 = vpop.f32.mrb[12].mxu0  ;;  %1975 = vmatpush3.bf16.msra.mxu1 %v2107_v27 }
 0x14e   :  { %v760_v41 = vadd.f32 %v1902_v40, %v2336_v57  ;;  %v660_v42 = vpop.f32.mrb[13].mxu0  ;;  %1976 = vmatprep.subr.bf16.mxu1 %v2108_v35 }
 0x14f   :  { %v758_v44 = vadd.f32 %v2336_v57, %v660_v42  ;;  %v1903_v45 = vpop.f32.mrb[14].mxu0  ;;  %1944 = vmatprep.mubr.bf16.mxu1 %v814_v39 }
 0x150   :  { %v761_v46 = vadd.f32 %v1903_v45, %v2336_v57  ;;  %v663_v47 = vpop.f32.mrb[15].mxu0  ;;  %1945 = vmatmul.mubr.bf16.gmra.mrb[8].mxu1 %v815_v38  ;;  %v792_v49 = vmax.f32 %v760_v41, 0.0 }
 0x151   :  { %v759_v48 = vadd.f32 %v2336_v57, %v663_v47  ;;  %1977 = vmatpush3.bf16.msra.mxu1 %v2108_v35  ;;  %v790_v52 = vmax.f32 %v758_v44, 0.0 }
 0x152   :  { %v793_v50 = vmax.f32 %v761_v46, 0.0  ;;  %1978 = vmatprep.subr.bf16.mxu1 %v2109_v43 }
 0x153   :  { %v791_v53 = vmax.f32 %v759_v48, 0.0 }
 0x154   :  { %v817_v54 = vpack.c.bf16 %v793_v50, %v792_v49  ;;  %v2111_v49 = vld [vmem:[%s2518_s7 + $0x38] sm:$0xff]   ;;  %v2394_v50 = vld [vmem:[%s2520_s6] ss:$0 sm:$0xff] }
 0x155   :  { %v816_v55 = vpack.c.bf16 %v791_v53, %v790_v52  ;;  %v1906_v56 = vpop.f32.mrb[16].mxu0  ;;  %1979 = vmatpush3.bf16.msra.mxu1 %v2109_v43 }
 0x156   :  { %v764_v58 = vadd.f32 %v1906_v56, %v2336_v57  ;;  %v676_v59 = vpop.f32.mrb[17].mxu0  ;;  %1980 = vmatprep.subr.bf16.mxu1 %v2110_v51 }
 0x157   :  { %v762_v60 = vadd.f32 %v2336_v57, %v676_v59  ;;  %v1907_v61 = vpop.f32.mrb[18].mxu0  ;;  %1948 = vmatprep.mubr.bf16.mxu1 %v816_v55 }
 0x158   :  { %v765_v62 = vadd.f32 %v1907_v61, %v2336_v57  ;;  %v679_v63 = vpop.f32.mrb[19].mxu0  ;;  %1949 = vmatmul.mubr.bf16.gmra.mrb[12].mxu1 %v817_v54  ;;  %v796_v1 = vmax.f32 %v764_v58, 0.0 }
 0x159   :  { %v763_v0 = vadd.f32 %v2336_v57, %v679_v63  ;;  %1981 = vmatpush3.bf16.msra.mxu1 %v2110_v51  ;;  %v794_v3 = vmax.f32 %v762_v60, 0.0 }
 0x15a   :  { %v797_v2 = vmax.f32 %v765_v62, 0.0  ;;  %1982 = vmatprep.subr.bf16.mxu1 %v2111_v49 }
 0x15b   :  { %v795_v4 = vmax.f32 %v763_v0, 0.0 }
 0x15c   :  { %v819_v5 = vpack.c.bf16 %v797_v2, %v796_v1 }
 0x15d   :  { %v818_v6 = vpack.c.bf16 %v795_v4, %v794_v3  ;;  %v1910_v7 = vpop.f32.mrb[20].mxu0  ;;  %1983 = vmatpush3.bf16.msra.mxu1 %v2111_v49 }
 0x15e   :  { %v768_v8 = vadd.f32 %v1910_v7, %v2336_v57  ;;  %v692_v9 = vpop.f32.mrb[21].mxu0 }
 0x15f   :  { %v766_v10 = vadd.f32 %v2336_v57, %v692_v9  ;;  %v1911_v11 = vpop.f32.mrb[22].mxu0  ;;  %1952 = vmatprep.mubr.bf16.mxu1 %v818_v6 }
 0x160   :  { %v769_v12 = vadd.f32 %v1911_v11, %v2336_v57  ;;  %v695_v13 = vpop.f32.mrb[23].mxu0  ;;  %1953 = vmatmul.mubr.bf16.gmra.mrb[16].mxu1 %v819_v5  ;;  %v800_v15 = vmax.f32 %v768_v8, 0.0 }
 0x161   :  { %v767_v14 = vadd.f32 %v2336_v57, %v695_v13  ;;  %v798_v17 = vmax.f32 %v766_v10, 0.0 }
 0x162   :  { %v801_v16 = vmax.f32 %v769_v12, 0.0 }
 0x163   :  { %v799_v18 = vmax.f32 %v767_v14, 0.0 }
 0x164   :  { %v821_v19 = vpack.c.bf16 %v801_v16, %v800_v15 }
 0x165   :  { %v820_v20 = vpack.c.bf16 %v799_v18, %v798_v17  ;;  %v1914_v21 = vpop.f32.mrb[24].mxu0 }
 0x166   :  { %v772_v22 = vadd.f32 %v1914_v21, %v2336_v57  ;;  %v708_v23 = vpop.f32.mrb[25].mxu0 }
 0x167   :  { %v770_v24 = vadd.f32 %v2336_v57, %v708_v23  ;;  %v1915_v25 = vpop.f32.mrb[26].mxu0  ;;  %1956 = vmatprep.mubr.bf16.mxu1 %v820_v20 }
 0x168   :  { %v773_v26 = vadd.f32 %v1915_v25, %v2336_v57  ;;  %v711_v27 = vpop.f32.mrb[27].mxu0  ;;  %1957 = vmatmul.mubr.bf16.gmra.mrb[20].mxu1 %v821_v19  ;;  %v804_v29 = vmax.f32 %v772_v22, 0.0 }
 0x169   :  { %v771_v28 = vadd.f32 %v2336_v57, %v711_v27  ;;  %v802_v31 = vmax.f32 %v770_v24, 0.0 }
 0x16a   :  { %v805_v30 = vmax.f32 %v773_v26, 0.0 }
 0x16b   :  { %v803_v32 = vmax.f32 %v771_v28, 0.0 }
 0x16c   :  { %v823_v33 = vpack.c.bf16 %v805_v30, %v804_v29 }
 0x16d   :  { %v822_v34 = vpack.c.bf16 %v803_v32, %v802_v31  ;;  %v1918_v35 = vpop.f32.mrb[28].mxu0 }
 0x16e   :  { %v776_v36 = vadd.f32 %v1918_v35, %v2336_v57  ;;  %v724_v37 = vpop.f32.mrb[29].mxu0 }
 0x16f   :  { %v774_v38 = vadd.f32 %v2336_v57, %v724_v37  ;;  %v1919_v39 = vpop.f32.mrb[30].mxu0  ;;  %1960 = vmatprep.mubr.bf16.mxu1 %v822_v34 }
 0x170   :  { %v777_v40 = vadd.f32 %v1919_v39, %v2336_v57  ;;  %v727_v41 = vpop.f32.mrb[31].mxu0  ;;  %1961 = vmatmul.mubr.bf16.gmra.mrb[24].mxu1 %v823_v33  ;;  %v808_v43 = vmax.f32 %v776_v36, 0.0 }
 0x171   :  { %v775_v42 = vadd.f32 %v2336_v57, %v727_v41  ;;  %v806_v45 = vmax.f32 %v774_v38, 0.0 }
 0x172   :  { %v809_v44 = vmax.f32 %v777_v40, 0.0 }
 0x173   :  { %v807_v46 = vmax.f32 %v775_v42, 0.0 }
 0x174   :  { %v825_v47 = vpack.c.bf16 %v809_v44, %v808_v43 }
 0x175   :  { %v824_v48 = vpack.c.bf16 %v807_v46, %v806_v45 }
 0x177   :  { %1964 = vmatprep.mubr.bf16.mxu1 %v824_v48 }
 0x178   :  { %1965 = vmatmul.mubr.bf16.gmra.mrb[28].mxu1 %v825_v47 }
 0x213   :  { %v1938_v57 = vpop.f32.mrb[0].mxu1 }
 0x214   :  { %v940_v51 = vadd.f32 %v1938_v57, %v2394_v50  ;;  %v931_v52 = vpop.f32.mrb[1].mxu1 }
 0x215   :  { %v932_v53 = vadd.f32 %v2394_v50, %v931_v52  ;;  %v1939_v54 = vpop.f32.mrb[2].mxu1 }
 0x216   :  { %v943_v55 = vadd.f32 %v1939_v54, %v2394_v50  ;;  %v934_v56 = vpop.f32.mrb[3].mxu1  ;;  %v1060_v59 = vmax.f32 %v940_v51, 0.0 }
 0x217   :  { %v935_v58 = vadd.f32 %v2394_v50, %v934_v56  ;;  %v1058_v61 = vmax.f32 %v932_v53, 0.0 }
 0x218   :  { %v1061_v60 = vmax.f32 %v943_v55, 0.0 }
 0x219   :  { %v1059_v62 = vmax.f32 %v935_v58, 0.0 }
 0x21a   :  { %v1091_v63 = vpack.c.bf16 %v1061_v60, %v1060_v59 }
 0x21b   :  { %v1090_v0 = vpack.c.bf16 %v1059_v62, %v1058_v61  ;;  %v1942_v1 = vpop.f32.mrb[4].mxu1 }
 0x21c   :  { %v956_v2 = vadd.f32 %v1942_v1, %v2394_v50  ;;  %v947_v3 = vpop.f32.mrb[5].mxu1 }
 0x21d   :  { %v948_v4 = vadd.f32 %v2394_v50, %v947_v3  ;;  %v1943_v5 = vpop.f32.mrb[6].mxu1  ;;  %1984 = vmatprep.mubr.bf16.mxu1 %v1090_v0 }
 0x21e   :  { %v959_v6 = vadd.f32 %v1943_v5, %v2394_v50  ;;  %v950_v7 = vpop.f32.mrb[7].mxu1  ;;  %1985 = vmatmul.mubr.bf16.vlgmr.msra.gmra.mrb[32].mxu1 %v1091_v63  ;;  %v1064_v9 = vmax.f32 %v956_v2, 0.0 }
 0x21f   :  { %v951_v8 = vadd.f32 %v2394_v50, %v950_v7  ;;  %v1062_v11 = vmax.f32 %v948_v4, 0.0 }
 0x220   :  { %v1065_v10 = vmax.f32 %v959_v6, 0.0 }
 0x221   :  { %v1063_v12 = vmax.f32 %v951_v8, 0.0 }
 0x222   :  { %v1093_v13 = vpack.c.bf16 %v1065_v10, %v1064_v9 }
 0x223   :  { %v1092_v14 = vpack.c.bf16 %v1063_v12, %v1062_v11  ;;  %v1946_v15 = vpop.f32.mrb[8].mxu1 }
 0x224   :  { %v972_v16 = vadd.f32 %v1946_v15, %v2394_v50  ;;  %v963_v17 = vpop.f32.mrb[9].mxu1 }
 0x225   :  { %v964_v18 = vadd.f32 %v2394_v50, %v963_v17  ;;  %v1947_v19 = vpop.f32.mrb[10].mxu1  ;;  %1988 = vmatprep.mubr.bf16.mxu1 %v1092_v14 }
 0x226   :  { %v975_v20 = vadd.f32 %v1947_v19, %v2394_v50  ;;  %v966_v21 = vpop.f32.mrb[11].mxu1  ;;  %1989 = vmatmul.mubr.bf16.gmra.mrb[36].mxu1 %v1093_v13  ;;  %v1068_v23 = vmax.f32 %v972_v16, 0.0 }
 0x227   :  { %v967_v22 = vadd.f32 %v2394_v50, %v966_v21  ;;  %v1066_v25 = vmax.f32 %v964_v18, 0.0 }
 0x228   :  { %v1069_v24 = vmax.f32 %v975_v20, 0.0 }
 0x229   :  { %v1067_v26 = vmax.f32 %v967_v22, 0.0 }
 0x22a   :  { %v1095_v27 = vpack.c.bf16 %v1069_v24, %v1068_v23 }
 0x22b   :  { %v1094_v28 = vpack.c.bf16 %v1067_v26, %v1066_v25  ;;  %v1950_v29 = vpop.f32.mrb[12].mxu1 }
 0x22c   :  { %v988_v30 = vadd.f32 %v1950_v29, %v2394_v50  ;;  %v979_v31 = vpop.f32.mrb[13].mxu1 }
 0x22d   :  { %v980_v32 = vadd.f32 %v2394_v50, %v979_v31  ;;  %v1951_v33 = vpop.f32.mrb[14].mxu1  ;;  %1992 = vmatprep.mubr.bf16.mxu1 %v1094_v28 }
 0x22e   :  { %v991_v34 = vadd.f32 %v1951_v33, %v2394_v50  ;;  %v982_v35 = vpop.f32.mrb[15].mxu1  ;;  %1993 = vmatmul.mubr.bf16.gmra.mrb[40].mxu1 %v1095_v27  ;;  %v1072_v37 = vmax.f32 %v988_v30, 0.0 }
 0x22f   :  { %v983_v36 = vadd.f32 %v2394_v50, %v982_v35  ;;  %v1070_v39 = vmax.f32 %v980_v32, 0.0 }
 0x230   :  { %v1073_v38 = vmax.f32 %v991_v34, 0.0 }
 0x231   :  { %v1071_v40 = vmax.f32 %v983_v36, 0.0 }
 0x232   :  { %v1097_v41 = vpack.c.bf16 %v1073_v38, %v1072_v37  ;;  %v2431_v37 = vld [vmem:[%s2521_s8] ss:$0 sm:$0xff] }
 0x233   :  { %v1096_v42 = vpack.c.bf16 %v1071_v40, %v1070_v39  ;;  %v1954_v43 = vpop.f32.mrb[16].mxu1 }
 0x234   :  { %v1004_v44 = vadd.f32 %v1954_v43, %v2394_v50  ;;  %v995_v45 = vpop.f32.mrb[17].mxu1 }
 0x235   :  { %v996_v46 = vadd.f32 %v2394_v50, %v995_v45  ;;  %v1955_v47 = vpop.f32.mrb[18].mxu1  ;;  %1996 = vmatprep.mubr.bf16.mxu1 %v1096_v42 }
 0x236   :  { %v1007_v48 = vadd.f32 %v1955_v47, %v2394_v50  ;;  %v998_v49 = vpop.f32.mrb[19].mxu1  ;;  %1997 = vmatmul.mubr.bf16.gmra.mrb[44].mxu1 %v1097_v41  ;;  %v1076_v51 = vmax.f32 %v1004_v44, 0.0 }
 0x237   :  { %v999_v57 = vadd.f32 %v2394_v50, %v998_v49  ;;  %v1074_v53 = vmax.f32 %v996_v46, 0.0 }
 0x238   :  { %v1077_v52 = vmax.f32 %v1007_v48, 0.0 }
 0x239   :  { %v1075_v54 = vmax.f32 %v999_v57, 0.0 }
 0x23a   :  { %v1099_v55 = vpack.c.bf16 %v1077_v52, %v1076_v51 }
 0x23b   :  { %v1098_v56 = vpack.c.bf16 %v1075_v54, %v1074_v53  ;;  %v1958_v58 = vpop.f32.mrb[20].mxu1 }
 0x23c   :  { %v1020_v59 = vadd.f32 %v1958_v58, %v2394_v50  ;;  %v1011_v60 = vpop.f32.mrb[21].mxu1 }
 0x23d   :  { %v1012_v61 = vadd.f32 %v2394_v50, %v1011_v60  ;;  %v1959_v62 = vpop.f32.mrb[22].mxu1  ;;  %2000 = vmatprep.mubr.bf16.mxu1 %v1098_v56 }
 0x23e   :  { %v1023_v63 = vadd.f32 %v1959_v62, %v2394_v50  ;;  %v1014_v0 = vpop.f32.mrb[23].mxu1  ;;  %2001 = vmatmul.mubr.bf16.gmra.mrb[48].mxu1 %v1099_v55  ;;  %v1080_v2 = vmax.f32 %v1020_v59, 0.0 }
 0x23f   :  { %v1015_v1 = vadd.f32 %v2394_v50, %v1014_v0  ;;  %v1078_v4 = vmax.f32 %v1012_v61, 0.0 }
 0x240   :  { %v1081_v3 = vmax.f32 %v1023_v63, 0.0 }
 0x241   :  { %v1079_v5 = vmax.f32 %v1015_v1, 0.0 }
 0x242   :  { %v1101_v6 = vpack.c.bf16 %v1081_v3, %v1080_v2 }
 0x243   :  { %v1100_v7 = vpack.c.bf16 %v1079_v5, %v1078_v4  ;;  %v1962_v8 = vpop.f32.mrb[24].mxu1 }
 0x244   :  { %v1036_v9 = vadd.f32 %v1962_v8, %v2394_v50  ;;  %v1027_v10 = vpop.f32.mrb[25].mxu1 }
 0x245   :  { %v1028_v11 = vadd.f32 %v2394_v50, %v1027_v10  ;;  %v1963_v12 = vpop.f32.mrb[26].mxu1  ;;  %2004 = vmatprep.mubr.bf16.mxu1 %v1100_v7 }
 0x246   :  { %v1039_v13 = vadd.f32 %v1963_v12, %v2394_v50  ;;  %v1030_v14 = vpop.f32.mrb[27].mxu1  ;;  %2005 = vmatmul.mubr.bf16.gmra.mrb[52].mxu1 %v1101_v6  ;;  %v1084_v16 = vmax.f32 %v1036_v9, 0.0 }
 0x247   :  { %v1031_v15 = vadd.f32 %v2394_v50, %v1030_v14  ;;  %v1082_v18 = vmax.f32 %v1028_v11, 0.0 }
 0x248   :  { %v1085_v17 = vmax.f32 %v1039_v13, 0.0 }
 0x249   :  { %v1083_v19 = vmax.f32 %v1031_v15, 0.0 }
 0x24a   :  { %v1103_v20 = vpack.c.bf16 %v1085_v17, %v1084_v16 }
 0x24b   :  { %v1102_v21 = vpack.c.bf16 %v1083_v19, %v1082_v18  ;;  %v1966_v22 = vpop.f32.mrb[28].mxu1 }
 0x24c   :  { %v1052_v23 = vadd.f32 %v1966_v22, %v2394_v50  ;;  %v1043_v24 = vpop.f32.mrb[29].mxu1 }
 0x24d   :  { %v1044_v25 = vadd.f32 %v2394_v50, %v1043_v24  ;;  %v1967_v26 = vpop.f32.mrb[30].mxu1  ;;  %2008 = vmatprep.mubr.bf16.mxu1 %v1102_v21 }
 0x24e   :  { %v1055_v27 = vadd.f32 %v1967_v26, %v2394_v50  ;;  %v1046_v28 = vpop.f32.mrb[31].mxu1  ;;  %2009 = vmatmul.mubr.bf16.gmra.mrb[56].mxu1 %v1103_v20  ;;  %v1088_v30 = vmax.f32 %v1052_v23, 0.0 }
 0x24f   :  { %v1047_v29 = vadd.f32 %v2394_v50, %v1046_v28  ;;  %v1086_v32 = vmax.f32 %v1044_v25, 0.0 }
 0x250   :  { %v1089_v31 = vmax.f32 %v1055_v27, 0.0 }
 0x251   :  { %v1087_v33 = vmax.f32 %v1047_v29, 0.0 }
 0x252   :  { %v1105_v34 = vpack.c.bf16 %v1089_v31, %v1088_v30 }
 0x253   :  { %v1104_v35 = vpack.c.bf16 %v1087_v33, %v1086_v32 }
 0x255   :  { %2012 = vmatprep.mubr.bf16.mxu1 %v1104_v35 }
 0x256   :  { %2013 = vmatmul.mubr.bf16.gmra.mrb[60].mxu1 %v1105_v34 }
 0x2f1   :  { %v1986_v36 = vpop.f32.mrb[32].mxu1 }
 0x2f2   :  { %v1211_v38 = vpop.f32.mrb[33].mxu1  ;;  %v1220_v40 = vadd.f32 %v1986_v36, %v2431_v37 }
 0x2f3   :  { %v1987_v39 = vpop.f32.mrb[34].mxu1  ;;  %v1212_v42 = vadd.f32 %v2431_v37, %v1211_v38 }
 0x2f4   :  { %v1223_v50 = vadd.f32 %v1987_v39, %v2431_v37  ;;  %v1214_v41 = vpop.f32.mrb[35].mxu1 }
 0x2f5   :  { %v1215_v43 = vadd.f32 %v2431_v37, %v1214_v41 }
 0x2f6   :  { %v1641_v44 = vpack.c.bf16 %v1223_v50, %v1220_v40 }
 0x2f7   :  { %v1636_v45 = vpack.c.bf16 %v1215_v43, %v1212_v42 }
 0x2f8   :  { %1713 = vst [vmem:[%s2522_s9 + $0x8] sm:$0xff] %v1641_v44  }
 0x2f9   :  { %1637 = vst [vmem:[%s2522_s9] sm:$0xff] %v1636_v45   ;;  %v1990_v46 = vpop.f32.mrb[36].mxu1 }
 0x2fa   :  { %v1227_v47 = vpop.f32.mrb[37].mxu1  ;;  %v1236_v49 = vadd.f32 %v1990_v46, %v2431_v37 }
 0x2fb   :  { %v1991_v48 = vpop.f32.mrb[38].mxu1  ;;  %v1228_v52 = vadd.f32 %v2431_v37, %v1227_v47 }
 0x2fc   :  { %v1239_v57 = vadd.f32 %v1991_v48, %v2431_v37  ;;  %v1230_v51 = vpop.f32.mrb[39].mxu1 }
 0x2fd   :  { %v1231_v53 = vadd.f32 %v2431_v37, %v1230_v51 }
 0x2fe   :  { %v1651_v54 = vpack.c.bf16 %v1239_v57, %v1236_v49 }
 0x2ff   :  { %v1646_v55 = vpack.c.bf16 %v1231_v53, %v1228_v52 }
 0x300   :  { %1715 = vst [vmem:[%s2522_s9 + $0x18] sm:$0xff] %v1651_v54  }
 0x301   :  { %1714 = vst [vmem:[%s2522_s9 + $0x10] sm:$0xff] %v1646_v55   ;;  %v1994_v56 = vpop.f32.mrb[40].mxu1 }
 0x302   :  { %v1243_v58 = vpop.f32.mrb[41].mxu1  ;;  %v1252_v60 = vadd.f32 %v1994_v56, %v2431_v37 }
 0x303   :  { %v1995_v59 = vpop.f32.mrb[42].mxu1  ;;  %v1244_v63 = vadd.f32 %v2431_v37, %v1243_v58 }
 0x304   :  { %v1255_v61 = vadd.f32 %v1995_v59, %v2431_v37  ;;  %v1246_v62 = vpop.f32.mrb[43].mxu1 }
 0x305   :  { %v1247_v0 = vadd.f32 %v2431_v37, %v1246_v62 }
 0x306   :  { %v1661_v1 = vpack.c.bf16 %v1255_v61, %v1252_v60 }
 0x307   :  { %v1656_v2 = vpack.c.bf16 %v1247_v0, %v1244_v63 }
 0x308   :  { %1717 = vst [vmem:[%s2522_s9 + $0x28] sm:$0xff] %v1661_v1  }
 0x309   :  { %1716 = vst [vmem:[%s2522_s9 + $0x20] sm:$0xff] %v1656_v2   ;;  %v1998_v3 = vpop.f32.mrb[44].mxu1 }
 0x30a   :  { %v1259_v4 = vpop.f32.mrb[45].mxu1  ;;  %v1268_v6 = vadd.f32 %v1998_v3, %v2431_v37 }
 0x30b   :  { %v1999_v5 = vpop.f32.mrb[46].mxu1  ;;  %v1260_v9 = vadd.f32 %v2431_v37, %v1259_v4 }
 0x30c   :  { %v1271_v7 = vadd.f32 %v1999_v5, %v2431_v37  ;;  %v1262_v8 = vpop.f32.mrb[47].mxu1 }
 0x30d   :  { %v1263_v10 = vadd.f32 %v2431_v37, %v1262_v8 }
 0x30e   :  { %v1671_v11 = vpack.c.bf16 %v1271_v7, %v1268_v6 }
 0x30f   :  { %v1666_v12 = vpack.c.bf16 %v1263_v10, %v1260_v9 }
 0x310   :  { %1719 = vst [vmem:[%s2522_s9 + $0x38] sm:$0xff] %v1671_v11  }
 0x311   :  { %1718 = vst [vmem:[%s2522_s9 + $0x30] sm:$0xff] %v1666_v12   ;;  %v2002_v13 = vpop.f32.mrb[48].mxu1 }
 0x312   :  { %v1275_v14 = vpop.f32.mrb[49].mxu1  ;;  %v1284_v16 = vadd.f32 %v2002_v13, %v2431_v37 }
 0x313   :  { %v2003_v15 = vpop.f32.mrb[50].mxu1  ;;  %v1276_v19 = vadd.f32 %v2431_v37, %v1275_v14 }
 0x314   :  { %v1287_v17 = vadd.f32 %v2003_v15, %v2431_v37  ;;  %v1278_v18 = vpop.f32.mrb[51].mxu1 }
 0x315   :  { %v1279_v20 = vadd.f32 %v2431_v37, %v1278_v18 }
 0x316   :  { %v1681_v21 = vpack.c.bf16 %v1287_v17, %v1284_v16 }
 0x317   :  { %v1676_v22 = vpack.c.bf16 %v1279_v20, %v1276_v19 }
 0x318   :  { %1721 = vst [vmem:[%s2522_s9 + $0x48] sm:$0xff] %v1681_v21  }
 0x319   :  { %1720 = vst [vmem:[%s2522_s9 + $0x40] sm:$0xff] %v1676_v22   ;;  %v2006_v23 = vpop.f32.mrb[52].mxu1 }
 0x31a   :  { %v1291_v24 = vpop.f32.mrb[53].mxu1  ;;  %v1300_v26 = vadd.f32 %v2006_v23, %v2431_v37 }
 0x31b   :  { %v2007_v25 = vpop.f32.mrb[54].mxu1  ;;  %v1292_v29 = vadd.f32 %v2431_v37, %v1291_v24 }
 0x31c   :  { %v1303_v27 = vadd.f32 %v2007_v25, %v2431_v37  ;;  %v1294_v28 = vpop.f32.mrb[55].mxu1 }
 0x31d   :  { %v1295_v30 = vadd.f32 %v2431_v37, %v1294_v28 }
 0x31e   :  { %v1691_v31 = vpack.c.bf16 %v1303_v27, %v1300_v26 }
 0x31f   :  { %v1686_v32 = vpack.c.bf16 %v1295_v30, %v1292_v29 }
 0x320   :  { %1723 = vst [vmem:[%s2522_s9 + $0x58] sm:$0xff] %v1691_v31  }
 0x321   :  { %1722 = vst [vmem:[%s2522_s9 + $0x50] sm:$0xff] %v1686_v32   ;;  %v2010_v33 = vpop.f32.mrb[56].mxu1 }
 0x322   :  { %v1307_v34 = vpop.f32.mrb[57].mxu1  ;;  %v1316_v36 = vadd.f32 %v2010_v33, %v2431_v37 }
 0x323   :  { %v2011_v35 = vpop.f32.mrb[58].mxu1  ;;  %v1308_v40 = vadd.f32 %v2431_v37, %v1307_v34 }
 0x324   :  { %v1319_v38 = vadd.f32 %v2011_v35, %v2431_v37  ;;  %v1310_v39 = vpop.f32.mrb[59].mxu1 }
 0x325   :  { %v1311_v50 = vadd.f32 %v2431_v37, %v1310_v39 }
 0x326   :  { %v1701_v41 = vpack.c.bf16 %v1319_v38, %v1316_v36 }
 0x327   :  { %v1696_v42 = vpack.c.bf16 %v1311_v50, %v1308_v40 }
 0x328   :  { %1725 = vst [vmem:[%s2522_s9 + $0x68] sm:$0xff] %v1701_v41  }
 0x329   :  { %1724 = vst [vmem:[%s2522_s9 + $0x60] sm:$0xff] %v1696_v42   ;;  %v2014_v43 = vpop.f32.mrb[60].mxu1 }
 0x32a   :  { %v1323_v44 = vpop.f32.mrb[61].mxu1  ;;  %v1332_v46 = vadd.f32 %v2014_v43, %v2431_v37 }
 0x32b   :  { %v2015_v45 = vpop.f32.mrb[62].mxu1  ;;  %v1324_v49 = vadd.f32 %v2431_v37, %v1323_v44 }
 0x32c   :  { %v1335_v47 = vadd.f32 %v2015_v45, %v2431_v37  ;;  %v1326_v48 = vpop.f32.mrb[63].mxu1 }
 0x32d   :  { %v1327_v57 = vadd.f32 %v2431_v37, %v1326_v48 }
 0x32e   :  { %v1711_v51 = vpack.c.bf16 %v1335_v47, %v1332_v46 }
 0x32f   :  { %v1706_v52 = vpack.c.bf16 %v1327_v57, %v1324_v49 }
 0x330   :  { %1727 = vst [vmem:[%s2522_s9 + $0x78] sm:$0xff] %v1711_v51  }
 0x331   :  { %1726 = vst [vmem:[%s2522_s9 + $0x70] sm:$0xff] %v1706_v52  }

// kernel: geomol_gnn_forward.10
= control target key start
LH: loop header
LB: loop body
LE: loop exit
PB: predicated region body
PF: predicated region fallthrough
CT: control target
= control target key end

     0   :  { %s7557_s0 = inlined_call_operand.vmem [shape: bf16[512,128], index: 0, kind: input, shape index: {}]   ;;  %s7558_s1 = inlined_call_operand.vmem [shape: bf16[512,128], index: 1, kind: input, shape index: {}]   ;;  %s7559_s2 = inlined_call_operand.vmem [shape: bf16[512,128], index: 2, kind: input, shape index: {}]   ;;  %s7560_s3 = inlined_call_operand.vmem [shape: bf16[256,512], index: 3, kind: input, shape index: {}]   ;;  %s7561_s4 = inlined_call_operand.vmem [shape: f32[256,1], index: 4, kind: input, shape index: {}]   ;;  %s7562_s5 = inlined_call_operand.vmem [shape: bf16[128,128], index: 5, kind: input, shape index: {}]   ;;  %s7563_s6 = inlined_call_operand.vmem [shape: bf16[128,128], index: 6, kind: input, shape index: {}]   ;;  %s7564_s7 = inlined_call_operand.vmem [shape: bf16[128,128], index: 7, kind: input, shape index: {}]   ;;  %s7565_s8 = inlined_call_operand.vmem [shape: f32[1,128], index: 8, kind: input, shape index: {}]   ;;  %s7566_s9 = inlined_call_operand.vmem [shape: bf16[128,128], index: 9, kind: input, shape index: {}]   ;;  %s7567_s10 = inlined_call_operand.vmem [shape: f32[1,128], index: 10, kind: input, shape index: {}]   ;;  %s7568_s11 = inlined_call_operand.vmem [shape: bf16[128,128], index: 11, kind: input, shape index: {}]   ;;  %s7569_s12 = inlined_call_operand.vmem [shape: f32[1,128], index: 12, kind: input, shape index: {}]   ;;  %s7570_s13 = inlined_call_operand.vmem [shape: bf16[128,128], index: 13, kind: input, shape index: {}]   ;;  %s7571_s14 = inlined_call_operand.vmem [shape: bf16[128,128], index: 14, kind: input, shape index: {}]   ;;  %s7572_s15 = inlined_call_operand.vmem [shape: f32[1,128], index: 15, kind: input, shape index: {}]   ;;  %s7573_s16 = inlined_call_operand.vmem [shape: bf16[128,128], index: 16, kind: input, shape index: {}]   ;;  %s7574_s17 = inlined_call_operand.vmem [shape: f32[1,128], index: 17, kind: input, shape index: {}]   ;;  %s7575_s18 = inlined_call_operand.vmem [shape: bf16[128,128], index: 18, kind: input, shape index: {}]   ;;  %s7576_s19 = inlined_call_operand.vmem [shape: f32[1,128], index: 19, kind: input, shape index: {}]   ;;  %s7577_s20 = inlined_call_operand.vmem [shape: bf16[512,128], index: 20, kind: output, shape index: {0}]   ;;  %s7578_s21 = inlined_call_operand.vmem [shape: bf16[256,128], index: 21, kind: output, shape index: {1}]  }
   0x1   :  { %7585 = sst [smem:[#allocation7_spill]] %s7557_s0 }
   0x2   :  { %7586 = sst [smem:[#allocation8_spill]] %s7558_s1 }
   0x3   :  { %7587 = sst [smem:[#allocation9_spill]] %s7559_s2 }
   0x4   :  { %7588 = sst [smem:[#allocation10_spill]] %s7560_s3 }
   0x5   :  { %7589 = sst [smem:[#allocation11_spill]] %s7561_s4 }
   0x6   :  { %7590 = sst [smem:[#allocation12_spill]] %s7562_s5 }
   0x7   :  { %7591 = sst [smem:[#allocation13_spill]] %s7572_s15 }
   0x8   :  { %7592 = sst [smem:[#allocation14_spill]] %s7574_s17 }
   0x9   :  { %7593 = sst [smem:[#allocation15_spill]] %s7576_s19 }
   0xa   :  { %7594 = sst [smem:[#allocation16_spill]] %s7578_s21 }
   0xb   :  { %s6669_s2 = smov 0   ;;  %s6671_s25 = smov 0  }
   0xc   :  { %s6673_s26 = smov 0  }
   0xd LB: > { %7595 = sst [smem:[#allocation4_spill]] %s6551_s25  ;;  %s6685_s27 = sadd.s32 4294967295, %s6555_s26   ;;  %s6555_s26 = sphi %s6673_s26, %s7608_s26   ;;  %s6551_s25 = sphi %s6671_s25, %s7610_s25   ;;  %s6547_s2 = sphi %s6669_s2, %s7609_s2  }
   0xe   : > { %s6688_s3 = sadd.s32 1, %s6555_s26   ;;  %s117_s29 = sadd.s32 1, %s6551_s25 }
   0xf   : > { %7596 = sst [smem:[#allocation5_spill]] %s6688_s3  ;;  %s114_s28 = ssub.s32 %s6555_s26, %s6688_s3 }
  0x10   : > { %p115_p0 = scmp.eq.s32.totalorder %s114_s28, 0  ;;  %p124_p1 = scmp.ne.s32.totalorder %s6551_s25, %s6547_s2 }
  0x11   : > { %p125_p2 = scmp.eq.s32.totalorder %s6555_s26, 0  ;;  %p4938_p4 = scmp.ge.s32.totalorder %s6555_s26, 2 }
  0x12   : > { %s6697_s0 = scalar_select %p115_p0, %s6551_s25, %s117_s29  }
  0x13   : > { %p126_p3 = por %p125_p2, %p124_p1  ;;  %581 = sbr.rel (%p4938_p4) target bundleno = 52 (0x34), region = 80 }
  0x14   : > { %7597 = sst [smem:[#allocation6_spill]] %s6697_s0 }
  0x1a   : > { %611 = sbr.rel (!%p126_p3) target bundleno = 52 (0x34), region = 96  ;;  %s613_s4 = sand.u32 (%p126_p3), 1, %s6551_s25  }
  0x1b   : > { %s5194_s30 = sshll.u32 (%p126_p3), %s6555_s26, 3  ;;  %s4939_s5 = sshll.u32 (%p126_p3), %s613_s4, 8 }
  0x1c   : > { %s7598_s1 = sld [smem:[#allocation10_spill]] (%p126_p3)  ;;  %s6710_s28 = scalar_lea.vmem (%p126_p3), [#allocation3], %s4939_s5 }
  0x22   : > { %s6705_s24 = scalar_lea.vmem %s7598_s1, %s5194_s30 }
  0x23   : > { %v708_v0 = vld [vmem:[%s6705_s24] sm:$0xff]  ;;  %v710_v1 = vld [vmem:[%s6705_s24 + $0x10] sm:$0xff] }
  0x24   : > { %v712_v2 = vld [vmem:[%s6705_s24 + $0x20] sm:$0xff]  ;;  %709 = vst [vmem:[%s6710_s28] sm:$0xff] %v708_v0  ;;  %711 = vst [vmem:[%s6710_s28 + $0x8] sm:$0xff] %v710_v1  ;;  %v714_v3 = vld [vmem:[%s6705_s24 + $0x30] sm:$0xff] }
  0x25   : > { %713 = vst [vmem:[%s6710_s28 + $0x10] sm:$0xff] %v712_v2  ;;  %v716_v4 = vld [vmem:[%s6705_s24 + $0x40] sm:$0xff]  ;;  %v718_v5 = vld [vmem:[%s6705_s24 + $0x50] sm:$0xff]  ;;  %715 = vst [vmem:[%s6710_s28 + $0x18] sm:$0xff] %v714_v3 }
  0x26   : > { %717 = vst [vmem:[%s6710_s28 + $0x20] sm:$0xff] %v716_v4  ;;  %719 = vst [vmem:[%s6710_s28 + $0x28] sm:$0xff] %v718_v5  ;;  %v720_v6 = vld [vmem:[%s6705_s24 + $0x60] sm:$0xff]  ;;  %v722_v7 = vld [vmem:[%s6705_s24 + $0x70] sm:$0xff] }
  0x27   : > { %v724_v8 = vld [vmem:[%s6705_s24 + $0x80] sm:$0xff]  ;;  %721 = vst [vmem:[%s6710_s28 + $0x30] sm:$0xff] %v720_v6  ;;  %723 = vst [vmem:[%s6710_s28 + $0x38] sm:$0xff] %v722_v7  ;;  %v726_v9 = vld [vmem:[%s6705_s24 + $0x90] sm:$0xff] }
  0x28   : > { %725 = vst [vmem:[%s6710_s28 + $0x40] sm:$0xff] %v724_v8  ;;  %v728_v10 = vld [vmem:[%s6705_s24 + $0xa0] sm:$0xff]  ;;  %v730_v11 = vld [vmem:[%s6705_s24 + $0xb0] sm:$0xff]  ;;  %727 = vst [vmem:[%s6710_s28 + $0x48] sm:$0xff] %v726_v9 }
  0x29   : > { %729 = vst [vmem:[%s6710_s28 + $0x50] sm:$0xff] %v728_v10  ;;  %731 = vst [vmem:[%s6710_s28 + $0x58] sm:$0xff] %v730_v11  ;;  %v732_v12 = vld [vmem:[%s6705_s24 + $0xc0] sm:$0xff]  ;;  %v734_v13 = vld [vmem:[%s6705_s24 + $0xd0] sm:$0xff] }
  0x2a   : > { %v736_v14 = vld [vmem:[%s6705_s24 + $0xe0] sm:$0xff]  ;;  %733 = vst [vmem:[%s6710_s28 + $0x60] sm:$0xff] %v732_v12  ;;  %735 = vst [vmem:[%s6710_s28 + $0x68] sm:$0xff] %v734_v13  ;;  %v738_v15 = vld [vmem:[%s6705_s24 + $0xf0] sm:$0xff] }
  0x2b   : > { %737 = vst [vmem:[%s6710_s28 + $0x70] sm:$0xff] %v736_v14  ;;  %v740_v16 = vld [vmem:[%s6705_s24 + $0x100] sm:$0xff]  ;;  %v742_v17 = vld [vmem:[%s6705_s24 + $0x110] sm:$0xff]  ;;  %739 = vst [vmem:[%s6710_s28 + $0x78] sm:$0xff] %v738_v15 }
  0x2c   : > { %741 = vst [vmem:[%s6710_s28 + $0x80] sm:$0xff] %v740_v16  ;;  %743 = vst [vmem:[%s6710_s28 + $0x88] sm:$0xff] %v742_v17  ;;  %v744_v18 = vld [vmem:[%s6705_s24 + $0x120] sm:$0xff]  ;;  %v746_v19 = vld [vmem:[%s6705_s24 + $0x130] sm:$0xff] }
  0x2d   : > { %v748_v20 = vld [vmem:[%s6705_s24 + $0x140] sm:$0xff]  ;;  %745 = vst [vmem:[%s6710_s28 + $0x90] sm:$0xff] %v744_v18  ;;  %747 = vst [vmem:[%s6710_s28 + $0x98] sm:$0xff] %v746_v19  ;;  %v750_v21 = vld [vmem:[%s6705_s24 + $0x150] sm:$0xff] }
  0x2e   : > { %749 = vst [vmem:[%s6710_s28 + $0xa0] sm:$0xff] %v748_v20  ;;  %v752_v22 = vld [vmem:[%s6705_s24 + $0x160] sm:$0xff]  ;;  %v754_v23 = vld [vmem:[%s6705_s24 + $0x170] sm:$0xff]  ;;  %751 = vst [vmem:[%s6710_s28 + $0xa8] sm:$0xff] %v750_v21 }
  0x2f   : > { %753 = vst [vmem:[%s6710_s28 + $0xb0] sm:$0xff] %v752_v22  ;;  %755 = vst [vmem:[%s6710_s28 + $0xb8] sm:$0xff] %v754_v23  ;;  %v756_v24 = vld [vmem:[%s6705_s24 + $0x180] sm:$0xff]  ;;  %v758_v25 = vld [vmem:[%s6705_s24 + $0x190] sm:$0xff] }
  0x30   : > { %v760_v26 = vld [vmem:[%s6705_s24 + $0x1a0] sm:$0xff]  ;;  %757 = vst [vmem:[%s6710_s28 + $0xc0] sm:$0xff] %v756_v24  ;;  %759 = vst [vmem:[%s6710_s28 + $0xc8] sm:$0xff] %v758_v25  ;;  %v762_v27 = vld [vmem:[%s6705_s24 + $0x1b0] sm:$0xff] }
  0x31   : > { %761 = vst [vmem:[%s6710_s28 + $0xd0] sm:$0xff] %v760_v26  ;;  %v764_v28 = vld [vmem:[%s6705_s24 + $0x1c0] sm:$0xff]  ;;  %v766_v29 = vld [vmem:[%s6705_s24 + $0x1d0] sm:$0xff]  ;;  %763 = vst [vmem:[%s6710_s28 + $0xd8] sm:$0xff] %v762_v27 }
  0x32   : > { %765 = vst [vmem:[%s6710_s28 + $0xe0] sm:$0xff] %v764_v28  ;;  %767 = vst [vmem:[%s6710_s28 + $0xe8] sm:$0xff] %v766_v29  ;;  %v768_v30 = vld [vmem:[%s6705_s24 + $0x1e0] sm:$0xff]  ;;  %v770_v31 = vld [vmem:[%s6705_s24 + $0x1f0] sm:$0xff] }
  0x33   : > { %769 = vst [vmem:[%s6710_s28 + $0xf0] sm:$0xff] %v768_v30  ;;  %771 = vst [vmem:[%s6710_s28 + $0xf8] sm:$0xff] %v770_v31 }
  0x34 PF: > { %p4942_p5 = scmp.ge.s32.totalorder %s6555_s26, 1  ;;  %p776_p6 = scmp.lt.s32.totalorder %s6555_s26, 3 }
  0x36   : > { %p777_p7 = pnand %p4942_p5, %p776_p6 }
  0x37   : > { %s783_s29 = sand.u32 (!%p777_p7), 1, %s6547_s2   ;;  %s4944_s4 = sshll.u32 (!%p777_p7), %s6685_s27, 5 }
  0x38   : > { %780 = sbr.rel (%p777_p7) target bundleno = 2181 (0x885), region = 134  ;;  %s4943_s30 = sshll.u32 (!%p777_p7), %s783_s29, 8 }
  0x39   : > { %p858_p8 = scmp.lt.s32.totalorder (!%p777_p7), %s4944_s4, 63  ;;  %s7599_s1 = sld [smem:[#allocation7_spill]] (!%p777_p7) }
  0x3a   : > { %s7600_s25 = sld [smem:[#allocation8_spill]] (!%p777_p7)  ;;  %s7601_s19 = sld [smem:[#allocation9_spill]] (!%p777_p7) }
  0x3b   : > { %p4952_p9 = scmp.ne.s32.totalorder (!%p777_p7), %s6685_s27, 0 }
  0x3f   : > { %s7612_s4 = smov (!%p858_p8, %s4944_s4), 63  ;;  %886 = sbr.rel (%p4952_p9) target bundleno = 81 (0x51), region = 142 }
  0x40   : > { %s4945_s5 = sshll.u32 %s7612_s4, 2  ;;  %s6797_s4 = scalar_lea.vmem [#allocation3], %s4943_s30  ;;  %v6557_v32 = vmov (!%p4952_p9), 0.0  }
  0x41   : > { %s6780_s24 = scalar_lea.vmem %s7599_s1, %s4945_s5  ;;  %s6785_s3 = scalar_lea.vmem %s7600_s25, %s4945_s5  ;;  %887 = vst [vmem:[#allocation2] sm:$0xff] (!%p4952_p9), %v6557_v32  ;;  %888 = vst [vmem:[#allocation2 + $0x8] sm:$0xff] (!%p4952_p9), %v6557_v32 }
  0x42   : > { %s6790_s17 = scalar_lea.vmem %s7601_s19, %s4945_s5  ;;  %s6795_s15 = scalar_lea.vmem %s7577_s20, %s4945_s5  ;;  %889 = vst [vmem:[#allocation2 + $0x10] sm:$0xff] (!%p4952_p9), %v6557_v32  ;;  %890 = vst [vmem:[#allocation2 + $0x18] sm:$0xff] (!%p4952_p9), %v6557_v32 }
  0x43   : > { %891 = vst [vmem:[#allocation2 + $0x20] sm:$0xff] (!%p4952_p9), %v6557_v32  ;;  %892 = vst [vmem:[#allocation2 + $0x28] sm:$0xff] (!%p4952_p9), %v6557_v32 }
  0x44   : > { %893 = vst [vmem:[#allocation2 + $0x30] sm:$0xff] (!%p4952_p9), %v6557_v32  ;;  %894 = vst [vmem:[#allocation2 + $0x38] sm:$0xff] (!%p4952_p9), %v6557_v32 }
  0x45   : > { %895 = vst [vmem:[#allocation2 + $0x40] sm:$0xff] (!%p4952_p9), %v6557_v32  ;;  %896 = vst [vmem:[#allocation2 + $0x48] sm:$0xff] (!%p4952_p9), %v6557_v32 }
  0x46   : > { %897 = vst [vmem:[#allocation2 + $0x50] sm:$0xff] %v6557_v32  ;;  %898 = vst [vmem:[#allocation2 + $0x58] sm:$0xff] %v6557_v32 }
  0x47   : > { %899 = vst [vmem:[#allocation2 + $0x60] sm:$0xff] %v6557_v32  ;;  %900 = vst [vmem:[#allocation2 + $0x68] sm:$0xff] %v6557_v32 }
  0x48   : > { %901 = vst [vmem:[#allocation2 + $0x70] sm:$0xff] %v6557_v32  ;;  %902 = vst [vmem:[#allocation2 + $0x78] sm:$0xff] %v6557_v32 }
  0x49   : > { %903 = vst [vmem:[#allocation2 + $0x80] sm:$0xff] %v6557_v32  ;;  %904 = vst [vmem:[#allocation2 + $0x88] sm:$0xff] %v6557_v32 }
  0x4a   : > { %905 = vst [vmem:[#allocation2 + $0x90] sm:$0xff] %v6557_v32  ;;  %906 = vst [vmem:[#allocation2 + $0x98] sm:$0xff] %v6557_v32 }
  0x4b   : > { %907 = vst [vmem:[#allocation2 + $0xa0] sm:$0xff] %v6557_v32  ;;  %908 = vst [vmem:[#allocation2 + $0xa8] sm:$0xff] %v6557_v32 }
  0x4c   : > { %909 = vst [vmem:[#allocation2 + $0xb0] sm:$0xff] %v6557_v32  ;;  %910 = vst [vmem:[#allocation2 + $0xb8] sm:$0xff] %v6557_v32 }
  0x4d   : > { %911 = vst [vmem:[#allocation2 + $0xc0] sm:$0xff] %v6557_v32  ;;  %912 = vst [vmem:[#allocation2 + $0xc8] sm:$0xff] %v6557_v32 }
  0x4e   : > { %913 = vst [vmem:[#allocation2 + $0xd0] sm:$0xff] %v6557_v32  ;;  %914 = vst [vmem:[#allocation2 + $0xd8] sm:$0xff] %v6557_v32 }
  0x4f   : > { %915 = vst [vmem:[#allocation2 + $0xe0] sm:$0xff] %v6557_v32  ;;  %916 = vst [vmem:[#allocation2 + $0xe8] sm:$0xff] %v6557_v32 }
  0x50   : > { %917 = vst [vmem:[#allocation2 + $0xf0] sm:$0xff] %v6557_v32  ;;  %918 = vst [vmem:[#allocation2 + $0xf8] sm:$0xff] %v6557_v32 }
  0x51 PF: > { %v6347_v33 = vld [vmem:[%s7563_s6] sm:$0xff]   ;;  %v6348_v34 = vld [vmem:[%s7563_s6 + $0x8] sm:$0xff]   ;;  %v6349_v35 = vld [vmem:[%s7563_s6 + $0x10] sm:$0xff]   ;;  %s7602_s5 = sld [smem:[#allocation12_spill]]  ;;  %s7604_s25 = sld [smem:[#allocation14_spill]] }
  0x52   : > { %5777 = vmatprep.subr.bf16.mxu0 %v6347_v33  ;;  %v6350_v36 = vld [vmem:[%s7563_s6 + $0x18] sm:$0xff]   ;;  %v6355_v37 = vld [vmem:[%s6785_s3] sm:$0xff]   ;;  %v6352_v39 = vld [vmem:[%s7563_s6 + $0x28] sm:$0xff]   ;;  %s7605_s22 = sld [smem:[#allocation15_spill]]  ;;  %p5159_p10 = scmp.ne.s32.totalorder %s6685_s27, 1 }
  0x53   : > { %5778 = vmatpush3.bf16.msra.mxu0 %v6347_v33  ;;  %5793 = vmatprep.mubr.bf16.mxu0 %v6355_v37  ;;  %v6351_v38 = vld [vmem:[%s7563_s6 + $0x20] sm:$0xff]   ;;  %v6353_v40 = vld [vmem:[%s7563_s6 + $0x30] sm:$0xff]   ;;  %v6354_v41 = vld [vmem:[%s7563_s6 + $0x38] sm:$0xff]   ;;  %s7606_s1 = sld [smem:[#allocation11_spill]] (!%p5159_p10)  ;;  %s7607_s30 = sld [smem:[#allocation16_spill]] (!%p5159_p10) }
  0x54   : > { %5779 = vmatprep.subr.bf16.mxu0 %v6348_v34  ;;  %v6356_v43 = vld [vmem:[%s6785_s3 + $0x8] sm:$0xff]   ;;  %v6357_v44 = vld [vmem:[%s6785_s3 + $0x10] sm:$0xff]   ;;  %v6358_v47 = vld [vmem:[%s6785_s3 + $0x18] sm:$0xff]  }
  0x55   : > { %v6359_v48 = vld [vmem:[%s6785_s3 + $0x20] sm:$0xff]   ;;  %v6360_v51 = vld [vmem:[%s6785_s3 + $0x28] sm:$0xff]   ;;  %v6361_v52 = vld [vmem:[%s6785_s3 + $0x30] sm:$0xff]  }
  0x56   : > { %v6362_v55 = vld [vmem:[%s6785_s3 + $0x38] sm:$0xff]   ;;  %v6363_v56 = vld [vmem:[%s6785_s3 + $0x40] sm:$0xff]   ;;  %v6364_v59 = vld [vmem:[%s6785_s3 + $0x48] sm:$0xff]  }
  0x57   : > { %5780 = vmatpush3.bf16.msra.mxu0 %v6348_v34  ;;  %v6365_v42 = vld [vmem:[%s7602_s5] sm:$0xff]   ;;  %v6366_v45 = vld [vmem:[%s7602_s5 + $0x8] sm:$0xff]   ;;  %v6369_v46 = vld [vmem:[%s7602_s5 + $0x10] sm:$0xff]  }
  0x58   : > { %5781 = vmatprep.subr.bf16.mxu0 %v6349_v35  ;;  %v6370_v49 = vld [vmem:[%s7602_s5 + $0x18] sm:$0xff]   ;;  %v6373_v50 = vld [vmem:[%s7602_s5 + $0x20] sm:$0xff]   ;;  %v6374_v53 = vld [vmem:[%s7602_s5 + $0x28] sm:$0xff]  }
  0x59   : > { %v6377_v54 = vld [vmem:[%s7602_s5 + $0x30] sm:$0xff]   ;;  %v6378_v57 = vld [vmem:[%s7602_s5 + $0x38] sm:$0xff]   ;;  %v6389_v58 = vld [vmem:[%s7564_s7] sm:$0xff]  }
  0x5a   : > { %v6367_v60 = vld [vmem:[%s6785_s3 + $0x50] sm:$0xff]   ;;  %v6368_v61 = vld [vmem:[%s6785_s3 + $0x58] sm:$0xff]   ;;  %v6371_v62 = vld [vmem:[%s6785_s3 + $0x60] sm:$0xff]  }
  0x5b   : > { %5782 = vmatpush3.bf16.msra.mxu0 %v6349_v35  ;;  %v6372_v63 = vld [vmem:[%s6785_s3 + $0x68] sm:$0xff]   ;;  %v6375_v0 = vld [vmem:[%s6785_s3 + $0x70] sm:$0xff]   ;;  %v6376_v1 = vld [vmem:[%s6785_s3 + $0x78] sm:$0xff]  }
  0x5c   : > { %5783 = vmatprep.subr.bf16.mxu0 %v6350_v36  ;;  %v6379_v2 = vld [vmem:[%s6780_s24] sm:$0xff]   ;;  %v6876_v4 = vld [vmem:[%s7566_s9 + $0x8] sm:$0xff]   ;;  %v6381_v6 = vld [vmem:[%s6780_s24 + $0x10] sm:$0xff]  }
  0x5d   : > { %v6871_v3 = vld [vmem:[%s7566_s9] sm:$0xff]   ;;  %v6380_v5 = vld [vmem:[%s6780_s24 + $0x8] sm:$0xff]   ;;  %v6888_v8 = vld [vmem:[%s7566_s9 + $0x10] sm:$0xff]  }
  0x5e   : > { %6209 = vmatprep.subr.bf16.mxu1 %v6871_v3  ;;  %v6390_v7 = vld [vmem:[%s7564_s7 + $0x8] sm:$0xff]   ;;  %v6393_v9 = vld [vmem:[%s7564_s7 + $0x10] sm:$0xff]   ;;  %v6898_v10 = vld [vmem:[%s7566_s9 + $0x18] sm:$0xff]  }
  0x5f   : > { %5784 = vmatpush3.bf16.msra.mxu0 %v6350_v36  ;;  %6217 = vmatpush3.bf16.msra.mxu1 %v6871_v3  ;;  %v6382_v11 = vld [vmem:[%s6780_s24 + $0x18] sm:$0xff]   ;;  %v6383_v12 = vld [vmem:[%s6780_s24 + $0x20] sm:$0xff]   ;;  %v6920_v16 = vld [vmem:[%s7566_s9 + $0x28] sm:$0xff]  }
  0x60   : > { %5785 = vmatprep.subr.bf16.mxu0 %v6351_v38  ;;  %6210 = vmatprep.subr.bf16.mxu1 %v6876_v4  ;;  %v6394_v13 = vld [vmem:[%s7564_s7 + $0x18] sm:$0xff]   ;;  %v6910_v14 = vld [vmem:[%s7566_s9 + $0x20] sm:$0xff]   ;;  %v6384_v17 = vld [vmem:[%s6780_s24 + $0x28] sm:$0xff]  }
  0x61   : > { %v6397_v15 = vld [vmem:[%s7564_s7 + $0x20] sm:$0xff]   ;;  %v6385_v18 = vld [vmem:[%s6780_s24 + $0x30] sm:$0xff]   ;;  %v6398_v19 = vld [vmem:[%s7564_s7 + $0x28] sm:$0xff]  }
  0x62   : > { %v6401_v20 = vld [vmem:[%s7564_s7 + $0x30] sm:$0xff]   ;;  %v6386_v21 = vld [vmem:[%s6780_s24 + $0x38] sm:$0xff]   ;;  %v6387_v22 = vld [vmem:[%s6780_s24 + $0x40] sm:$0xff]  }
  0x63   : > { %5786 = vmatpush3.bf16.msra.mxu0 %v6351_v38  ;;  %6218 = vmatpush3.bf16.msra.mxu1 %v6876_v4  ;;  %v6402_v23 = vld [vmem:[%s7564_s7 + $0x38] sm:$0xff]   ;;  %v6388_v24 = vld [vmem:[%s6780_s24 + $0x48] sm:$0xff]   ;;  %v6391_v25 = vld [vmem:[%s6780_s24 + $0x50] sm:$0xff]  }
  0x64   : > { %5787 = vmatprep.subr.bf16.mxu0 %v6352_v39  ;;  %6211 = vmatprep.subr.bf16.mxu1 %v6888_v8  ;;  %v6392_v26 = vld [vmem:[%s6780_s24 + $0x58] sm:$0xff]   ;;  %v6395_v27 = vld [vmem:[%s6780_s24 + $0x60] sm:$0xff]   ;;  %v6396_v28 = vld [vmem:[%s6780_s24 + $0x68] sm:$0xff]  }
  0x65   : > { %v6399_v29 = vld [vmem:[%s6780_s24 + $0x70] sm:$0xff]   ;;  %v6400_v30 = vld [vmem:[%s6780_s24 + $0x78] sm:$0xff]   ;;  %v6403_v31 = vld [vmem:[%s6790_s17] sm:$0xff]  }
  0x66   : > { %v6404_v32 = vld [vmem:[%s6790_s17 + $0x8] sm:$0xff]   ;;  %v6405_v33 = vld [vmem:[%s6790_s17 + $0x10] sm:$0xff]   ;;  %v6406_v34 = vld [vmem:[%s6790_s17 + $0x18] sm:$0xff]  }
  0x67   : > { %5788 = vmatpush3.bf16.msra.mxu0 %v6352_v39  ;;  %6219 = vmatpush3.bf16.msra.mxu1 %v6888_v8  ;;  %v6407_v35 = vld [vmem:[%s6790_s17 + $0x20] sm:$0xff]   ;;  %v6408_v36 = vld [vmem:[%s6790_s17 + $0x28] sm:$0xff]   ;;  %v6409_v37 = vld [vmem:[%s6790_s17 + $0x30] sm:$0xff]  }
  0x68   : > { %5789 = vmatprep.subr.bf16.mxu0 %v6353_v40  ;;  %6212 = vmatprep.subr.bf16.mxu1 %v6898_v10  ;;  %v6410_v38 = vld [vmem:[%s6790_s17 + $0x38] sm:$0xff]   ;;  %v6411_v39 = vld [vmem:[%s6790_s17 + $0x40] sm:$0xff]  }
  0x6b   : > { %5790 = vmatpush3.bf16.msra.mxu0 %v6353_v40  ;;  %6220 = vmatpush3.bf16.msra.mxu1 %v6898_v10  ;;  %v6412_v40 = vld [vmem:[%s6790_s17 + $0x48] sm:$0xff]  }
  0x6c   : > { %5791 = vmatprep.subr.bf16.mxu0 %v6354_v41  ;;  %6213 = vmatprep.subr.bf16.mxu1 %v6910_v14 }
  0x6f   : > { %5792 = vmatpush3.bf16.msra.mxu0 %v6354_v41  ;;  %6221 = vmatpush3.bf16.msra.mxu1 %v6910_v14  ;;  %v6413_v41 = vld [vmem:[%s6790_s17 + $0x50] sm:$0xff]  }
  0x70   : > { %5825 = vmatprep.subr.bf16.mxu0 %v6365_v42  ;;  %6214 = vmatprep.subr.bf16.mxu1 %v6920_v16 }
  0x72   : > { %5794 = vmatmul.mubr.bf16.vlgmr.msra.gmra.mrb[0].mxu0 %v6356_v43  ;;  %v6415_v43 = vld [vmem:[%s6790_s17 + $0x60] sm:$0xff]  }
  0x73   : > { %5797 = vmatprep.mubr.bf16.mxu0 %v6357_v44  ;;  %5826 = vmatpush3.bf16.msra.mxu0 %v6365_v42  ;;  %v6414_v42 = vld [vmem:[%s6790_s17 + $0x58] sm:$0xff]   ;;  %v6416_v44 = vld [vmem:[%s6790_s17 + $0x68] sm:$0xff]  }
  0x74   : > { %5827 = vmatprep.subr.bf16.mxu0 %v6366_v45  ;;  %6222 = vmatpush3.bf16.msra.mxu1 %v6920_v16 }
  0x77   : > { %5828 = vmatpush3.bf16.msra.mxu0 %v6366_v45  ;;  %v6417_v45 = vld [vmem:[%s6790_s17 + $0x70] sm:$0xff]  }
  0x78   : > { %5829 = vmatprep.subr.bf16.mxu0 %v6369_v46 }
  0x7a   : > { %5798 = vmatmul.mubr.bf16.gmra.mrb[4].mxu0 %v6358_v47  ;;  %v6425_v47 = vld [vmem:[%s7566_s9 + $0x30] sm:$0xff]  }
  0x7b   : > { %5801 = vmatprep.mubr.bf16.mxu0 %v6359_v48  ;;  %5830 = vmatpush3.bf16.msra.mxu0 %v6369_v46  ;;  %v6418_v46 = vld [vmem:[%s6790_s17 + $0x78] sm:$0xff]   ;;  %s7603_s17 = sld [smem:[#allocation13_spill]] }
  0x7c   : > { %5831 = vmatprep.subr.bf16.mxu0 %v6370_v49  ;;  %6215 = vmatprep.subr.bf16.mxu1 %v6425_v47  ;;  %v6426_v48 = vld [vmem:[%s7566_s9 + $0x38] sm:$0xff]  }
  0x7d   : > { %6223 = vmatpush3.bf16.msra.mxu1 %v6425_v47 }
  0x7e   : > { %6216 = vmatprep.subr.bf16.mxu1 %v6426_v48 }
  0x7f   : > { %5832 = vmatpush3.bf16.msra.mxu0 %v6370_v49  ;;  %v6983_v49 = vld [vmem:[%s7568_s11] sm:$0xff]  }
  0x80   : > { %5833 = vmatprep.subr.bf16.mxu0 %v6373_v50 }
  0x81   : > { %6224 = vmatpush3.bf16.msra.mxu1 %v6426_v48 }
  0x82   : > { %5802 = vmatmul.mubr.bf16.gmra.mrb[8].mxu0 %v6360_v51  ;;  %5969 = vmatprep.subr.bf16.mxu1 %v6983_v49 }
  0x83   : > { %5805 = vmatprep.mubr.bf16.mxu0 %v6361_v52  ;;  %5834 = vmatpush3.bf16.msra.mxu0 %v6373_v50  ;;  %v6989_v50 = vld [vmem:[%s7565_s8] ss:$0 sm:$0xff] }
  0x84   : > { %5835 = vmatprep.subr.bf16.mxu0 %v6374_v53 }
  0x87   : > { %5836 = vmatpush3.bf16.msra.mxu0 %v6374_v53 }
  0x88   : > { %5837 = vmatprep.subr.bf16.mxu0 %v6377_v54 }
  0x8a   : > { %5806 = vmatmul.mubr.bf16.gmra.mrb[12].mxu0 %v6362_v55 }
  0x8b   : > { %5809 = vmatprep.mubr.bf16.mxu0 %v6363_v56  ;;  %5838 = vmatpush3.bf16.msra.mxu0 %v6377_v54 }
  0x8c   : > { %5839 = vmatprep.subr.bf16.mxu0 %v6378_v57 }
  0x8f   : > { %5840 = vmatpush3.bf16.msra.mxu0 %v6378_v57 }
  0x90   : > { %5873 = vmatprep.subr.bf16.mxu0 %v6389_v58 }
  0x92   : > { %5810 = vmatmul.mubr.bf16.gmra.mrb[16].mxu0 %v6364_v59 }
  0x93   : > { %5813 = vmatprep.mubr.bf16.mxu0 %v6367_v60 }
  0x9a   : > { %5814 = vmatmul.mubr.bf16.gmra.mrb[20].mxu0 %v6368_v61 }
  0x9b   : > { %5817 = vmatprep.mubr.bf16.mxu0 %v6371_v62 }
  0xa2   : > { %5818 = vmatmul.mubr.bf16.gmra.mrb[24].mxu0 %v6372_v63 }
  0xa3   : > { %5821 = vmatprep.mubr.bf16.mxu0 %v6375_v0 }
  0xaa   : > { %5822 = vmatmul.mubr.bf16.gmra.mrb[28].mxu0 %v6376_v1 }
  0xab   : > { %5841 = vmatprep.mubr.bf16.mxu0 %v6379_v2 }
  0xb2   : > { %5842 = vmatmul.mubr.bf16.vlgmr.msra.gmra.mrb[0].mxu0 %v6380_v5 }
  0xb3   : > { %5845 = vmatprep.mubr.bf16.mxu0 %v6381_v6  ;;  %5874 = vmatpush3.bf16.msra.mxu0 %v6389_v58 }
  0xb4   : > { %5875 = vmatprep.subr.bf16.mxu0 %v6390_v7 }
  0xb7   : > { %5876 = vmatpush3.bf16.msra.mxu0 %v6390_v7 }
  0xb8   : > { %5877 = vmatprep.subr.bf16.mxu0 %v6393_v9 }
  0xba   : > { %5846 = vmatmul.mubr.bf16.gmra.mrb[4].mxu0 %v6382_v11 }
  0xbb   : > { %5849 = vmatprep.mubr.bf16.mxu0 %v6383_v12  ;;  %5878 = vmatpush3.bf16.msra.mxu0 %v6393_v9 }
  0xbc   : > { %5879 = vmatprep.subr.bf16.mxu0 %v6394_v13 }
  0xbf   : > { %5880 = vmatpush3.bf16.msra.mxu0 %v6394_v13 }
  0xc0   : > { %5881 = vmatprep.subr.bf16.mxu0 %v6397_v15 }
  0xc2   : > { %5850 = vmatmul.mubr.bf16.gmra.mrb[8].mxu0 %v6384_v17 }
  0xc3   : > { %5853 = vmatprep.mubr.bf16.mxu0 %v6385_v18  ;;  %5882 = vmatpush3.bf16.msra.mxu0 %v6397_v15 }
  0xc4   : > { %5883 = vmatprep.subr.bf16.mxu0 %v6398_v19 }
  0xc7   : > { %5884 = vmatpush3.bf16.msra.mxu0 %v6398_v19 }
  0xc8   : > { %5885 = vmatprep.subr.bf16.mxu0 %v6401_v20 }
  0xca   : > { %5854 = vmatmul.mubr.bf16.gmra.mrb[12].mxu0 %v6386_v21 }
  0xcb   : > { %5857 = vmatprep.mubr.bf16.mxu0 %v6387_v22  ;;  %5886 = vmatpush3.bf16.msra.mxu0 %v6401_v20 }
  0xcc   : > { %5887 = vmatprep.subr.bf16.mxu0 %v6402_v23 }
  0xcf   : > { %5888 = vmatpush3.bf16.msra.mxu0 %v6402_v23 }
  0xd0   : > { %5921 = vmatprep.subr.bf16.mxu0 %v6871_v3 }
  0xd2   : > { %5858 = vmatmul.mubr.bf16.gmra.mrb[16].mxu0 %v6388_v24 }
  0xd3   : > { %5861 = vmatprep.mubr.bf16.mxu0 %v6391_v25 }
  0xda   : > { %5862 = vmatmul.mubr.bf16.gmra.mrb[20].mxu0 %v6392_v26 }
  0xdb   : > { %5865 = vmatprep.mubr.bf16.mxu0 %v6395_v27 }
  0xe2   : > { %5866 = vmatmul.mubr.bf16.gmra.mrb[24].mxu0 %v6396_v28 }
  0xe3   : > { %5869 = vmatprep.mubr.bf16.mxu0 %v6399_v29 }
  0xea   : > { %5870 = vmatmul.mubr.bf16.gmra.mrb[28].mxu0 %v6400_v30 }
  0xeb   : > { %5889 = vmatprep.mubr.bf16.mxu0 %v6403_v31 }
  0xf2   : > { %5890 = vmatmul.mubr.bf16.vlgmr.msra.gmra.mrb[0].mxu0 %v6404_v32 }
  0xf3   : > { %5893 = vmatprep.mubr.bf16.mxu0 %v6405_v33  ;;  %5922 = vmatpush3.bf16.msra.mxu0 %v6871_v3 }
  0xf4   : > { %5923 = vmatprep.subr.bf16.mxu0 %v6876_v4 }
  0xf7   : > { %5924 = vmatpush3.bf16.msra.mxu0 %v6876_v4 }
  0xf8   : > { %5925 = vmatprep.subr.bf16.mxu0 %v6888_v8 }
  0xfa   : > { %5894 = vmatmul.mubr.bf16.gmra.mrb[4].mxu0 %v6406_v34 }
  0xfb   : > { %5897 = vmatprep.mubr.bf16.mxu0 %v6407_v35  ;;  %5926 = vmatpush3.bf16.msra.mxu0 %v6888_v8 }
  0xfc   : > { %5927 = vmatprep.subr.bf16.mxu0 %v6898_v10 }
  0xff   : > { %5928 = vmatpush3.bf16.msra.mxu0 %v6898_v10 }
 0x100   : > { %5929 = vmatprep.subr.bf16.mxu0 %v6910_v14 }
 0x102   : > { %5898 = vmatmul.mubr.bf16.gmra.mrb[8].mxu0 %v6408_v36 }
 0x103   : > { %5901 = vmatprep.mubr.bf16.mxu0 %v6409_v37  ;;  %5930 = vmatpush3.bf16.msra.mxu0 %v6910_v14 }
 0x104   : > { %5931 = vmatprep.subr.bf16.mxu0 %v6920_v16 }
 0x107   : > { %5932 = vmatpush3.bf16.msra.mxu0 %v6920_v16 }
 0x108   : > { %5933 = vmatprep.subr.bf16.mxu0 %v6425_v47 }
 0x10a   : > { %5902 = vmatmul.mubr.bf16.gmra.mrb[12].mxu0 %v6410_v38 }
 0x10b   : > { %5905 = vmatprep.mubr.bf16.mxu0 %v6411_v39  ;;  %5934 = vmatpush3.bf16.msra.mxu0 %v6425_v47 }
 0x10c   : > { %5935 = vmatprep.subr.bf16.mxu0 %v6426_v48 }
 0x10f   : > { %5936 = vmatpush3.bf16.msra.mxu0 %v6426_v48 }
 0x112   : > { %5906 = vmatmul.mubr.bf16.gmra.mrb[16].mxu0 %v6412_v40 }
 0x113   : > { %5909 = vmatprep.mubr.bf16.mxu0 %v6413_v41 }
 0x11a   : > { %5910 = vmatmul.mubr.bf16.gmra.mrb[20].mxu0 %v6414_v42 }
 0x11b   : > { %5913 = vmatprep.mubr.bf16.mxu0 %v6415_v43 }
 0x122   : > { %5914 = vmatmul.mubr.bf16.gmra.mrb[24].mxu0 %v6416_v44 }
 0x123   : > { %5917 = vmatprep.mubr.bf16.mxu0 %v6417_v45 }
 0x12a   : > { %5918 = vmatmul.mubr.bf16.gmra.mrb[28].mxu0 %v6418_v46 }
 0x1c5   : > { %v5891_v51 = vpop.f32.mrb[0].mxu0 }
 0x1c6   : > { %v2019_v52 = vadd.f32 %v5891_v51, %v6989_v50  ;;  %v1851_v53 = vpop.f32.mrb[1].mxu0 }
 0x1c7   : > { %v2017_v54 = vadd.f32 %v6989_v50, %v1851_v53  ;;  %v5892_v55 = vpop.f32.mrb[2].mxu0 }
 0x1c8   : > { %v2020_v56 = vadd.f32 %v5892_v55, %v6989_v50  ;;  %v1854_v57 = vpop.f32.mrb[3].mxu0  ;;  %v2051_v59 = vmax.f32 %v2019_v52, 0.0 }
 0x1c9   : > { %v2018_v58 = vadd.f32 %v6989_v50, %v1854_v57  ;;  %v2049_v61 = vmax.f32 %v2017_v54, 0.0 }
 0x1ca   : > { %v2052_v60 = vmax.f32 %v2020_v56, 0.0 }
 0x1cb   : > { %v2050_v62 = vmax.f32 %v2018_v58, 0.0 }
 0x1cc   : > { %v2082_v63 = vpack.c.bf16 %v2052_v60, %v2051_v59 }
 0x1cd   : > { %v2081_v0 = vpack.c.bf16 %v2050_v62, %v2049_v61  ;;  %v5895_v1 = vpop.f32.mrb[4].mxu0  ;;  %v6428_v62 = vld [vmem:[%s7568_s11 + $0x8] sm:$0xff]  }
 0x1ce   : > { %v2023_v2 = vadd.f32 %v5895_v1, %v6989_v50  ;;  %v1867_v3 = vpop.f32.mrb[5].mxu0 }
 0x1cf   : > { %v2021_v4 = vadd.f32 %v6989_v50, %v1867_v3  ;;  %v5896_v5 = vpop.f32.mrb[6].mxu0  ;;  %5937 = vmatprep.mubr.bf16.mxu0 %v2081_v0 }
 0x1d0   : > { %v2024_v6 = vadd.f32 %v5896_v5, %v6989_v50  ;;  %v1870_v7 = vpop.f32.mrb[7].mxu0  ;;  %5938 = vmatmul.mubr.bf16.vlgmr.msra.gmra.mrb[32].mxu0 %v2082_v63  ;;  %v2055_v9 = vmax.f32 %v2023_v2, 0.0 }
 0x1d1   : > { %v2022_v8 = vadd.f32 %v6989_v50, %v1870_v7  ;;  %v2053_v11 = vmax.f32 %v2021_v4, 0.0 }
 0x1d2   : > { %v2056_v10 = vmax.f32 %v2024_v6, 0.0  ;;  %v6429_v6 = vld [vmem:[%s7568_s11 + $0x10] sm:$0xff]  }
 0x1d3   : > { %v2054_v12 = vmax.f32 %v2022_v8, 0.0 }
 0x1d4   : > { %v2084_v13 = vpack.c.bf16 %v2056_v10, %v2055_v9 }
 0x1d5   : > { %v2083_v14 = vpack.c.bf16 %v2054_v12, %v2053_v11  ;;  %v5899_v15 = vpop.f32.mrb[8].mxu0 }
 0x1d6   : > { %v2027_v16 = vadd.f32 %v5899_v15, %v6989_v50  ;;  %v1883_v17 = vpop.f32.mrb[9].mxu0 }
 0x1d7   : > { %v2025_v18 = vadd.f32 %v6989_v50, %v1883_v17  ;;  %v5900_v19 = vpop.f32.mrb[10].mxu0  ;;  %5941 = vmatprep.mubr.bf16.mxu0 %v2083_v14 }
 0x1d8   : > { %v2028_v20 = vadd.f32 %v5900_v19, %v6989_v50  ;;  %v1886_v21 = vpop.f32.mrb[11].mxu0  ;;  %5942 = vmatmul.mubr.bf16.gmra.mrb[36].mxu0 %v2084_v13  ;;  %v2059_v23 = vmax.f32 %v2027_v16, 0.0 }
 0x1d9   : > { %v2026_v22 = vadd.f32 %v6989_v50, %v1886_v21  ;;  %v2057_v25 = vmax.f32 %v2025_v18, 0.0  ;;  %v6431_v21 = vld [vmem:[%s7568_s11 + $0x20] sm:$0xff]  }
 0x1da   : > { %v2060_v24 = vmax.f32 %v2028_v20, 0.0 }
 0x1db   : > { %v2058_v26 = vmax.f32 %v2026_v22, 0.0 }
 0x1dc   : > { %v2086_v27 = vpack.c.bf16 %v2060_v24, %v2059_v23 }
 0x1dd   : > { %v2085_v28 = vpack.c.bf16 %v2058_v26, %v2057_v25  ;;  %v5903_v29 = vpop.f32.mrb[12].mxu0 }
 0x1de   : > { %v2031_v30 = vadd.f32 %v5903_v29, %v6989_v50  ;;  %v1899_v31 = vpop.f32.mrb[13].mxu0  ;;  %v6432_v29 = vld [vmem:[%s7568_s11 + $0x28] sm:$0xff]  }
 0x1df   : > { %v2029_v32 = vadd.f32 %v6989_v50, %v1899_v31  ;;  %v5904_v33 = vpop.f32.mrb[14].mxu0  ;;  %5945 = vmatprep.mubr.bf16.mxu0 %v2085_v28 }
 0x1e0   : > { %v2032_v34 = vadd.f32 %v5904_v33, %v6989_v50  ;;  %v1902_v35 = vpop.f32.mrb[15].mxu0  ;;  %5946 = vmatmul.mubr.bf16.gmra.mrb[40].mxu0 %v2086_v27  ;;  %v2063_v37 = vmax.f32 %v2031_v30, 0.0 }
 0x1e1   : > { %v2030_v36 = vadd.f32 %v6989_v50, %v1902_v35  ;;  %v2061_v39 = vmax.f32 %v2029_v32, 0.0 }
 0x1e2   : > { %v2064_v38 = vmax.f32 %v2032_v34, 0.0 }
 0x1e3   : > { %v2062_v40 = vmax.f32 %v2030_v36, 0.0 }
 0x1e4   : > { %v2088_v41 = vpack.c.bf16 %v2064_v38, %v2063_v37 }
 0x1e5   : > { %v2087_v42 = vpack.c.bf16 %v2062_v40, %v2061_v39  ;;  %v5907_v43 = vpop.f32.mrb[16].mxu0 }
 0x1e6   : > { %v2035_v44 = vadd.f32 %v5907_v43, %v6989_v50  ;;  %v1915_v45 = vpop.f32.mrb[17].mxu0  ;;  %v7051_v43 = vld [vmem:[%s7567_s10] ss:$0 sm:$0xff] }
 0x1e7   : > { %v2033_v46 = vadd.f32 %v6989_v50, %v1915_v45  ;;  %v5908_v47 = vpop.f32.mrb[18].mxu0  ;;  %5949 = vmatprep.mubr.bf16.mxu0 %v2087_v42  ;;  %v6435_v42 = vld [vmem:[%s7571_s14] sm:$0xff]  }
 0x1e8   : > { %v2036_v48 = vadd.f32 %v5908_v47, %v6989_v50  ;;  %v1918_v51 = vpop.f32.mrb[19].mxu0  ;;  %5950 = vmatmul.mubr.bf16.gmra.mrb[44].mxu0 %v2088_v41  ;;  %v2067_v53 = vmax.f32 %v2035_v44, 0.0  ;;  %v6433_v41 = vld [vmem:[%s7568_s11 + $0x30] sm:$0xff]  }
 0x1e9   : > { %v2034_v52 = vadd.f32 %v6989_v50, %v1918_v51  ;;  %v2065_v55 = vmax.f32 %v2033_v46, 0.0 }
 0x1ea   : > { %v2068_v54 = vmax.f32 %v2036_v48, 0.0 }
 0x1eb   : > { %v2066_v56 = vmax.f32 %v2034_v52, 0.0 }
 0x1ec   : > { %v2090_v57 = vpack.c.bf16 %v2068_v54, %v2067_v53 }
 0x1ed   : > { %v5911_v58 = vpop.f32.mrb[20].mxu0  ;;  %v2089_v59 = vpack.c.bf16 %v2066_v56, %v2065_v55 }
 0x1ee   : > { %v2039_v60 = vadd.f32 %v5911_v58, %v6989_v50  ;;  %v1931_v61 = vpop.f32.mrb[21].mxu0 }
 0x1ef   : > { %v2037_v63 = vadd.f32 %v6989_v50, %v1931_v61  ;;  %v5912_v0 = vpop.f32.mrb[22].mxu0  ;;  %5953 = vmatprep.mubr.bf16.mxu1 %v2089_v59 }
 0x1f0   : > { %v2040_v1 = vadd.f32 %v5912_v0, %v6989_v50  ;;  %v1934_v2 = vpop.f32.mrb[23].mxu0  ;;  %5954 = vmatmul.mubr.bf16.vlgmr.msra.gmra.mrb[0].mxu1 %v2090_v57  ;;  %v2071_v4 = vmax.f32 %v2039_v60, 0.0 }
 0x1f1   : > { %v2038_v3 = vadd.f32 %v6989_v50, %v1934_v2  ;;  %5970 = vmatpush3.bf16.msra.mxu1 %v6983_v49  ;;  %v2069_v7 = vmax.f32 %v2037_v63, 0.0  ;;  %v6430_v49 = vld [vmem:[%s7568_s11 + $0x18] sm:$0xff]   ;;  %v6436_v63 = vld [vmem:[%s7571_s14 + $0x8] sm:$0xff]  }
 0x1f2   : > { %v2072_v5 = vmax.f32 %v2040_v1, 0.0  ;;  %5971 = vmatprep.subr.bf16.mxu1 %v6428_v62 }
 0x1f3   : > { %v2070_v8 = vmax.f32 %v2038_v3, 0.0 }
 0x1f4   : > { %v2092_v9 = vpack.c.bf16 %v2072_v5, %v2071_v4 }
 0x1f5   : > { %v2091_v10 = vpack.c.bf16 %v2070_v8, %v2069_v7  ;;  %v5915_v11 = vpop.f32.mrb[24].mxu0  ;;  %5972 = vmatpush3.bf16.msra.mxu1 %v6428_v62  ;;  %v6437_v7 = vld [vmem:[%s7571_s14 + $0x10] sm:$0xff]  }
 0x1f6   : > { %v2043_v12 = vadd.f32 %v5915_v11, %v6989_v50  ;;  %v1947_v13 = vpop.f32.mrb[25].mxu0  ;;  %5973 = vmatprep.subr.bf16.mxu1 %v6429_v6 }
 0x1f7   : > { %v2041_v14 = vadd.f32 %v6989_v50, %v1947_v13  ;;  %v5916_v15 = vpop.f32.mrb[26].mxu0  ;;  %5957 = vmatprep.mubr.bf16.mxu1 %v2091_v10 }
 0x1f8   : > { %v2044_v16 = vadd.f32 %v5916_v15, %v6989_v50  ;;  %v1950_v17 = vpop.f32.mrb[27].mxu0  ;;  %5958 = vmatmul.mubr.bf16.gmra.mrb[4].mxu1 %v2092_v9  ;;  %v2075_v19 = vmax.f32 %v2043_v12, 0.0 }
 0x1f9   : > { %v2042_v18 = vadd.f32 %v6989_v50, %v1950_v17  ;;  %5974 = vmatpush3.bf16.msra.mxu1 %v6429_v6  ;;  %v2073_v22 = vmax.f32 %v2041_v14, 0.0  ;;  %v6438_v14 = vld [vmem:[%s7571_s14 + $0x18] sm:$0xff]  }
 0x1fa   : > { %v2076_v20 = vmax.f32 %v2044_v16, 0.0  ;;  %5975 = vmatprep.subr.bf16.mxu1 %v6430_v49 }
 0x1fb   : > { %v2074_v23 = vmax.f32 %v2042_v18, 0.0 }
 0x1fc   : > { %v2094_v24 = vpack.c.bf16 %v2076_v20, %v2075_v19 }
 0x1fd   : > { %v2093_v25 = vpack.c.bf16 %v2074_v23, %v2073_v22  ;;  %v5919_v26 = vpop.f32.mrb[28].mxu0  ;;  %5976 = vmatpush3.bf16.msra.mxu1 %v6430_v49  ;;  %v6439_v22 = vld [vmem:[%s7571_s14 + $0x20] sm:$0xff]  }
 0x1fe   : > { %v2047_v27 = vadd.f32 %v5919_v26, %v6989_v50  ;;  %v1963_v28 = vpop.f32.mrb[29].mxu0  ;;  %5977 = vmatprep.subr.bf16.mxu1 %v6431_v21 }
 0x1ff   : > { %v2045_v30 = vadd.f32 %v6989_v50, %v1963_v28  ;;  %v5920_v31 = vpop.f32.mrb[30].mxu0  ;;  %5961 = vmatprep.mubr.bf16.mxu1 %v2093_v25 }
 0x200   : > { %v2048_v32 = vadd.f32 %v5920_v31, %v6989_v50  ;;  %v1966_v33 = vpop.f32.mrb[31].mxu0  ;;  %5962 = vmatmul.mubr.bf16.gmra.mrb[8].mxu1 %v2094_v24  ;;  %v2079_v35 = vmax.f32 %v2047_v27, 0.0 }
 0x201   : > { %v2046_v34 = vadd.f32 %v6989_v50, %v1966_v33  ;;  %5978 = vmatpush3.bf16.msra.mxu1 %v6431_v21  ;;  %v2077_v37 = vmax.f32 %v2045_v30, 0.0  ;;  %v6434_v50 = vld [vmem:[%s7568_s11 + $0x38] sm:$0xff]   ;;  %v6440_v30 = vld [vmem:[%s7571_s14 + $0x28] sm:$0xff]  }
 0x202   : > { %v2080_v36 = vmax.f32 %v2048_v32, 0.0  ;;  %5979 = vmatprep.subr.bf16.mxu1 %v6432_v29 }
 0x203   : > { %v2078_v38 = vmax.f32 %v2046_v34, 0.0 }
 0x204   : > { %v2096_v39 = vpack.c.bf16 %v2080_v36, %v2079_v35 }
 0x205   : > { %v2095_v40 = vpack.c.bf16 %v2078_v38, %v2077_v37  ;;  %5980 = vmatpush3.bf16.msra.mxu1 %v6432_v29 }
 0x206   : > { %5981 = vmatprep.subr.bf16.mxu1 %v6433_v41 }
 0x207   : > { %5965 = vmatprep.mubr.bf16.mxu1 %v2095_v40 }
 0x208   : > { %5966 = vmatmul.mubr.bf16.gmra.mrb[12].mxu1 %v2096_v39 }
 0x209   : > { %5982 = vmatpush3.bf16.msra.mxu1 %v6433_v41 }
 0x20a   : > { %5983 = vmatprep.subr.bf16.mxu1 %v6434_v50 }
 0x20d   : > { %5984 = vmatpush3.bf16.msra.mxu1 %v6434_v50 }
 0x20e   : > { %6017 = vmatprep.subr.bf16.mxu1 %v6435_v42 }
 0x2a3   : > { %v5939_v44 = vpop.f32.mrb[32].mxu0 }
 0x2a4   : > { %v2211_v45 = vadd.f32 %v5939_v44, %v7051_v43  ;;  %v2202_v46 = vpop.f32.mrb[33].mxu0 }
 0x2a5   : > { %v2203_v47 = vadd.f32 %v7051_v43, %v2202_v46  ;;  %v5940_v48 = vpop.f32.mrb[34].mxu0 }
 0x2a6   : > { %v2214_v51 = vadd.f32 %v5940_v48, %v7051_v43  ;;  %v2205_v52 = vpop.f32.mrb[35].mxu0  ;;  %v2331_v54 = vmax.f32 %v2211_v45, 0.0 }
 0x2a7   : > { %v2206_v53 = vadd.f32 %v7051_v43, %v2205_v52  ;;  %v2329_v56 = vmax.f32 %v2203_v47, 0.0 }
 0x2a8   : > { %v2332_v55 = vmax.f32 %v2214_v51, 0.0 }
 0x2a9   : > { %v2330_v57 = vmax.f32 %v2206_v53, 0.0 }
 0x2aa   : > { %v2362_v58 = vpack.c.bf16 %v2332_v55, %v2331_v54 }
 0x2ab   : > { %v2361_v59 = vpack.c.bf16 %v2330_v57, %v2329_v56  ;;  %v5943_v60 = vpop.f32.mrb[36].mxu0 }
 0x2ac   : > { %v2227_v61 = vadd.f32 %v5943_v60, %v7051_v43  ;;  %v2218_v62 = vpop.f32.mrb[37].mxu0 }
 0x2ad   : > { %v2219_v0 = vadd.f32 %v7051_v43, %v2218_v62  ;;  %v5944_v1 = vpop.f32.mrb[38].mxu0  ;;  %5985 = vmatprep.mubr.bf16.mxu1 %v2361_v59 }
 0x2ae   : > { %v2230_v2 = vadd.f32 %v5944_v1, %v7051_v43  ;;  %v2221_v3 = vpop.f32.mrb[39].mxu0  ;;  %5986 = vmatmul.mubr.bf16.vlgmr.msra.gmra.mrb[16].mxu1 %v2362_v58  ;;  %v2335_v5 = vmax.f32 %v2227_v61, 0.0 }
 0x2af   : > { %v2222_v4 = vadd.f32 %v7051_v43, %v2221_v3  ;;  %6018 = vmatpush3.bf16.msra.mxu1 %v6435_v42  ;;  %v2333_v8 = vmax.f32 %v2219_v0, 0.0 }
 0x2b0   : > { %v2336_v6 = vmax.f32 %v2230_v2, 0.0  ;;  %6019 = vmatprep.subr.bf16.mxu1 %v6436_v63 }
 0x2b1   : > { %v2334_v9 = vmax.f32 %v2222_v4, 0.0 }
 0x2b2   : > { %v2364_v10 = vpack.c.bf16 %v2336_v6, %v2335_v5 }
 0x2b3   : > { %v2363_v11 = vpack.c.bf16 %v2334_v9, %v2333_v8  ;;  %v5947_v12 = vpop.f32.mrb[40].mxu0  ;;  %6020 = vmatpush3.bf16.msra.mxu1 %v6436_v63 }
 0x2b4   : > { %v2243_v13 = vadd.f32 %v5947_v12, %v7051_v43  ;;  %v2234_v49 = vpop.f32.mrb[41].mxu0  ;;  %6021 = vmatprep.subr.bf16.mxu1 %v6437_v7 }
 0x2b5   : > { %v2235_v15 = vadd.f32 %v7051_v43, %v2234_v49  ;;  %v5948_v16 = vpop.f32.mrb[42].mxu0  ;;  %5989 = vmatprep.mubr.bf16.mxu1 %v2363_v11 }
 0x2b6   : > { %v2246_v17 = vadd.f32 %v5948_v16, %v7051_v43  ;;  %v2237_v18 = vpop.f32.mrb[43].mxu0  ;;  %5990 = vmatmul.mubr.bf16.gmra.mrb[20].mxu1 %v2364_v10  ;;  %v2339_v20 = vmax.f32 %v2243_v13, 0.0 }
 0x2b7   : > { %v2238_v19 = vadd.f32 %v7051_v43, %v2237_v18  ;;  %6022 = vmatpush3.bf16.msra.mxu1 %v6437_v7  ;;  %v2337_v23 = vmax.f32 %v2235_v15, 0.0 }
 0x2b8   : > { %v2340_v21 = vmax.f32 %v2246_v17, 0.0  ;;  %6023 = vmatprep.subr.bf16.mxu1 %v6438_v14 }
 0x2b9   : > { %v2338_v24 = vmax.f32 %v2238_v19, 0.0 }
 0x2ba   : > { %v2366_v25 = vpack.c.bf16 %v2340_v21, %v2339_v20 }
 0x2bb   : > { %v2365_v26 = vpack.c.bf16 %v2338_v24, %v2337_v23  ;;  %v5951_v27 = vpop.f32.mrb[44].mxu0  ;;  %6024 = vmatpush3.bf16.msra.mxu1 %v6438_v14 }
 0x2bc   : > { %v2259_v28 = vadd.f32 %v5951_v27, %v7051_v43  ;;  %v2250_v29 = vpop.f32.mrb[45].mxu0  ;;  %6025 = vmatprep.subr.bf16.mxu1 %v6439_v22 }
 0x2bd   : > { %v2251_v31 = vadd.f32 %v7051_v43, %v2250_v29  ;;  %v5952_v32 = vpop.f32.mrb[46].mxu0  ;;  %5993 = vmatprep.mubr.bf16.mxu1 %v2365_v26 }
 0x2be   : > { %v2262_v33 = vadd.f32 %v5952_v32, %v7051_v43  ;;  %v2253_v34 = vpop.f32.mrb[47].mxu0  ;;  %5994 = vmatmul.mubr.bf16.gmra.mrb[24].mxu1 %v2366_v25  ;;  %v2343_v36 = vmax.f32 %v2259_v28, 0.0 }
 0x2bf   : > { %v2254_v35 = vadd.f32 %v7051_v43, %v2253_v34  ;;  %6026 = vmatpush3.bf16.msra.mxu1 %v6439_v22  ;;  %v2341_v38 = vmax.f32 %v2251_v31, 0.0 }
 0x2c0   : > { %v2344_v37 = vmax.f32 %v2262_v33, 0.0  ;;  %6027 = vmatprep.subr.bf16.mxu1 %v6440_v30 }
 0x2c1   : > { %v2342_v39 = vmax.f32 %v2254_v35, 0.0  ;;  %v6441_v35 = vld [vmem:[%s7571_s14 + $0x30] sm:$0xff]  }
 0x2c2   : > { %v2368_v40 = vpack.c.bf16 %v2344_v37, %v2343_v36  ;;  %v6442_v36 = vld [vmem:[%s7571_s14 + $0x38] sm:$0xff]  }
 0x2c3   : > { %v2367_v41 = vpack.c.bf16 %v2342_v39, %v2341_v38  ;;  %v5955_v50 = vpop.f32.mrb[0].mxu1  ;;  %6028 = vmatpush3.bf16.msra.mxu1 %v6440_v30  ;;  %v7112_v38 = vld [vmem:[%s7569_s12] ss:$0 sm:$0xff] }
 0x2c4   : > { %v2275_v42 = vadd.f32 %v5955_v50, %v7051_v43  ;;  %v2266_v44 = vpop.f32.mrb[1].mxu1  ;;  %6029 = vmatprep.subr.bf16.mxu1 %v6441_v35 }
 0x2c5   : > { %v2267_v45 = vadd.f32 %v7051_v43, %v2266_v44  ;;  %v5956_v46 = vpop.f32.mrb[2].mxu1  ;;  %5997 = vmatprep.mubr.bf16.mxu1 %v2367_v41  ;;  %v6468_v41 = vld [vmem:[%s7573_s16 + $0x8] sm:$0xff]  }
 0x2c6   : > { %v2278_v47 = vadd.f32 %v5956_v46, %v7051_v43  ;;  %v2269_v48 = vpop.f32.mrb[3].mxu1  ;;  %5998 = vmatmul.mubr.bf16.gmra.mrb[28].mxu1 %v2368_v40  ;;  %v2347_v52 = vmax.f32 %v2275_v42, 0.0  ;;  %v6467_v40 = vld [vmem:[%s7573_s16] sm:$0xff]  }
 0x2c7   : > { %v2270_v51 = vadd.f32 %v7051_v43, %v2269_v48  ;;  %v2345_v54 = vmax.f32 %v2267_v45, 0.0  ;;  %6030 = vmatpush3.bf16.msra.mxu1 %v6441_v35  ;;  %6113 = vmatprep.subr.bf16.mxu0 %v6467_v40 }
 0x2c8   : > { %v2348_v53 = vmax.f32 %v2278_v47, 0.0  ;;  %6031 = vmatprep.subr.bf16.mxu1 %v6442_v36  ;;  %6114 = vmatpush3.bf16.msra.mxu0 %v6467_v40 }
 0x2c9   : > { %v2346_v55 = vmax.f32 %v2270_v51, 0.0  ;;  %6115 = vmatprep.subr.bf16.mxu0 %v6468_v41  ;;  %v6469_v51 = vld [vmem:[%s7573_s16 + $0x10] sm:$0xff]  }
 0x2ca   : > { %v2370_v56 = vpack.c.bf16 %v2348_v53, %v2347_v52  ;;  %v6444_v53 = vld [vmem:[%s7570_s13 + $0x8] sm:$0xff]  }
 0x2cb   : > { %v2369_v57 = vpack.c.bf16 %v2346_v55, %v2345_v54  ;;  %v5959_v58 = vpop.f32.mrb[4].mxu1  ;;  %6032 = vmatpush3.bf16.msra.mxu1 %v6442_v36 }
 0x2cc   : > { %v2291_v59 = vadd.f32 %v5959_v58, %v7051_v43  ;;  %v2282_v60 = vpop.f32.mrb[5].mxu1  ;;  %6116 = vmatpush3.bf16.msra.mxu0 %v6468_v41 }
 0x2cd   : > { %v2283_v61 = vadd.f32 %v7051_v43, %v2282_v60  ;;  %v5960_v62 = vpop.f32.mrb[6].mxu1  ;;  %6001 = vmatprep.mubr.bf16.mxu1 %v2369_v57  ;;  %6117 = vmatprep.subr.bf16.mxu0 %v6469_v51 }
 0x2ce   : > { %v2294_v63 = vadd.f32 %v5960_v62, %v7051_v43  ;;  %v2285_v0 = vpop.f32.mrb[7].mxu1  ;;  %6002 = vmatmul.mubr.bf16.gmra.mrb[32].mxu1 %v2370_v56  ;;  %v2351_v2 = vmax.f32 %v2291_v59, 0.0  ;;  %v6470_v56 = vld [vmem:[%s7573_s16 + $0x18] sm:$0xff]  }
 0x2cf   : > { %v2286_v1 = vadd.f32 %v7051_v43, %v2285_v0  ;;  %v2349_v4 = vmax.f32 %v2283_v61, 0.0  ;;  %v6445_v61 = vld [vmem:[%s7570_s13 + $0x10] sm:$0xff]  }
 0x2d0   : > { %v2352_v3 = vmax.f32 %v2294_v63, 0.0  ;;  %6118 = vmatpush3.bf16.msra.mxu0 %v6469_v51 }
 0x2d1   : > { %v2350_v5 = vmax.f32 %v2286_v1, 0.0  ;;  %6119 = vmatprep.subr.bf16.mxu0 %v6470_v56  ;;  %v6471_v1 = vld [vmem:[%s7573_s16 + $0x20] sm:$0xff]  }
 0x2d2   : > { %v2372_v6 = vpack.c.bf16 %v2352_v3, %v2351_v2  ;;  %v6446_v3 = vld [vmem:[%s7570_s13 + $0x18] sm:$0xff]  }
 0x2d3   : > { %v2371_v7 = vpack.c.bf16 %v2350_v5, %v2349_v4  ;;  %v5963_v8 = vpop.f32.mrb[8].mxu1 }
 0x2d4   : > { %v2307_v9 = vadd.f32 %v5963_v8, %v7051_v43  ;;  %v2298_v10 = vpop.f32.mrb[9].mxu1  ;;  %6120 = vmatpush3.bf16.msra.mxu0 %v6470_v56 }
 0x2d5   : > { %v2299_v11 = vadd.f32 %v7051_v43, %v2298_v10  ;;  %v5964_v12 = vpop.f32.mrb[10].mxu1  ;;  %6005 = vmatprep.mubr.bf16.mxu1 %v2371_v7  ;;  %6121 = vmatprep.subr.bf16.mxu0 %v6471_v1 }
 0x2d6   : > { %v2310_v13 = vadd.f32 %v5964_v12, %v7051_v43  ;;  %v2301_v49 = vpop.f32.mrb[11].mxu1  ;;  %6006 = vmatmul.mubr.bf16.gmra.mrb[36].mxu1 %v2372_v6  ;;  %v2355_v15 = vmax.f32 %v2307_v9, 0.0  ;;  %v6472_v6 = vld [vmem:[%s7573_s16 + $0x28] sm:$0xff]  }
 0x2d7   : > { %v2302_v14 = vadd.f32 %v7051_v43, %v2301_v49  ;;  %v2353_v17 = vmax.f32 %v2299_v11, 0.0  ;;  %v6447_v11 = vld [vmem:[%s7570_s13 + $0x20] sm:$0xff]  }
 0x2d8   : > { %v2356_v16 = vmax.f32 %v2310_v13, 0.0  ;;  %6122 = vmatpush3.bf16.msra.mxu0 %v6471_v1 }
 0x2d9   : > { %v2354_v18 = vmax.f32 %v2302_v14, 0.0  ;;  %6123 = vmatprep.subr.bf16.mxu0 %v6472_v6 }
 0x2da   : > { %v2374_v19 = vpack.c.bf16 %v2356_v16, %v2355_v15  ;;  %v6448_v15 = vld [vmem:[%s7570_s13 + $0x28] sm:$0xff]  }
 0x2db   : > { %v2373_v20 = vpack.c.bf16 %v2354_v18, %v2353_v17  ;;  %v5967_v21 = vpop.f32.mrb[12].mxu1 }
 0x2dc   : > { %v2323_v22 = vadd.f32 %v5967_v21, %v7051_v43  ;;  %v2314_v23 = vpop.f32.mrb[13].mxu1  ;;  %6124 = vmatpush3.bf16.msra.mxu0 %v6472_v6  ;;  %v6451_v6 = vld [vmem:[%s6780_s24] sm:$0xff]  }
 0x2dd   : > { %v2315_v24 = vadd.f32 %v7051_v43, %v2314_v23  ;;  %v5968_v25 = vpop.f32.mrb[14].mxu1  ;;  %6009 = vmatprep.mubr.bf16.mxu1 %v2373_v20 }
 0x2de   : > { %v2326_v26 = vadd.f32 %v5968_v25, %v7051_v43  ;;  %v2317_v27 = vpop.f32.mrb[15].mxu1  ;;  %6010 = vmatmul.mubr.bf16.gmra.mrb[40].mxu1 %v2374_v19  ;;  %v2359_v29 = vmax.f32 %v2323_v22, 0.0  ;;  %v6449_v22 = vld [vmem:[%s7570_s13 + $0x30] sm:$0xff]  }
 0x2df   : > { %v2318_v28 = vadd.f32 %v7051_v43, %v2317_v27  ;;  %v2357_v31 = vmax.f32 %v2315_v24, 0.0  ;;  %v6443_v43 = vld [vmem:[%s7570_s13] sm:$0xff]   ;;  %v6450_v27 = vld [vmem:[%s7570_s13 + $0x38] sm:$0xff]  }
 0x2e0   : > { %v2360_v30 = vmax.f32 %v2326_v26, 0.0  ;;  %6065 = vmatprep.subr.bf16.mxu1 %v6443_v43 }
 0x2e1   : > { %v2358_v32 = vmax.f32 %v2318_v28, 0.0 }
 0x2e2   : > { %v2376_v33 = vpack.c.bf16 %v2360_v30, %v2359_v29 }
 0x2e3   : > { %v2375_v34 = vpack.c.bf16 %v2358_v32, %v2357_v31 }
 0x2e5   : > { %6013 = vmatprep.mubr.bf16.mxu1 %v2375_v34 }
 0x2e6   : > { %6014 = vmatmul.mubr.bf16.gmra.mrb[44].mxu1 %v2376_v33 }
 0x381   : > { %v5987_v37 = vpop.f32.mrb[16].mxu1 }
 0x382   : > { %v2482_v39 = vpop.f32.mrb[17].mxu1  ;;  %v2491_v42 = vadd.f32 %v5987_v37, %v7112_v38 }
 0x383   : > { %v5988_v50 = vpop.f32.mrb[18].mxu1  ;;  %v2483_v46 = vadd.f32 %v7112_v38, %v2482_v39 }
 0x384   : > { %v2494_v44 = vadd.f32 %v5988_v50, %v7112_v38  ;;  %v2485_v45 = vpop.f32.mrb[19].mxu1 }
 0x385   : > { %v2486_v47 = vadd.f32 %v7112_v38, %v2485_v45 }
 0x386   : > { %v2610_v48 = vpack.c.bf16 %v2494_v44, %v2491_v42 }
 0x387   : > { %v2609_v52 = vpack.c.bf16 %v2486_v47, %v2483_v46 }
 0x388   : > { %5419 = vst [vmem:[%s6795_s15 + $0x8] sm:$0xff] %v2610_v48  }
 0x389   : > { %5263 = vst [vmem:[%s6795_s15] sm:$0xff] %v2609_v52   ;;  %v5991_v54 = vpop.f32.mrb[20].mxu1  ;;  %6033 = vmatprep.mubr.bf16.mxu1 %v2609_v52 }
 0x38a   : > { %v2498_v55 = vpop.f32.mrb[21].mxu1  ;;  %6034 = vmatmul.mubr.bf16.vlgmr.msra.gmra.mrb[48].mxu1 %v2610_v48  ;;  %v2507_v58 = vadd.f32 %v5991_v54, %v7112_v38 }
 0x38b   : > { %v5992_v57 = vpop.f32.mrb[22].mxu1  ;;  %6066 = vmatpush3.bf16.msra.mxu1 %v6443_v43  ;;  %v2499_v62 = vadd.f32 %v7112_v38, %v2498_v55 }
 0x38c   : > { %v2510_v59 = vadd.f32 %v5992_v57, %v7112_v38  ;;  %v2501_v60 = vpop.f32.mrb[23].mxu1  ;;  %6067 = vmatprep.subr.bf16.mxu1 %v6444_v53 }
 0x38d   : > { %v2502_v63 = vadd.f32 %v7112_v38, %v2501_v60 }
 0x38e   : > { %v2612_v0 = vpack.c.bf16 %v2510_v59, %v2507_v58 }
 0x38f   : > { %v2611_v2 = vpack.c.bf16 %v2502_v63, %v2499_v62  ;;  %6068 = vmatpush3.bf16.msra.mxu1 %v6444_v53 }
 0x390   : > { %5421 = vst [vmem:[%s6795_s15 + $0x18] sm:$0xff] %v2612_v0   ;;  %6069 = vmatprep.subr.bf16.mxu1 %v6445_v61 }
 0x391   : > { %5420 = vst [vmem:[%s6795_s15 + $0x10] sm:$0xff] %v2611_v2   ;;  %v5995_v4 = vpop.f32.mrb[24].mxu1  ;;  %6037 = vmatprep.mubr.bf16.mxu1 %v2611_v2 }
 0x392   : > { %v2514_v5 = vpop.f32.mrb[25].mxu1  ;;  %6038 = vmatmul.mubr.bf16.gmra.mrb[52].mxu1 %v2612_v0  ;;  %v2523_v8 = vadd.f32 %v5995_v4, %v7112_v38 }
 0x393   : > { %v5996_v7 = vpop.f32.mrb[26].mxu1  ;;  %6070 = vmatpush3.bf16.msra.mxu1 %v6445_v61  ;;  %v2515_v12 = vadd.f32 %v7112_v38, %v2514_v5 }
 0x394   : > { %v2526_v9 = vadd.f32 %v5996_v7, %v7112_v38  ;;  %v2517_v10 = vpop.f32.mrb[27].mxu1  ;;  %6071 = vmatprep.subr.bf16.mxu1 %v6446_v3  ;;  %v6452_v7 = vld [vmem:[%s6780_s24 + $0x8] sm:$0xff]  }
 0x395   : > { %v2518_v13 = vadd.f32 %v7112_v38, %v2517_v10  ;;  %v6456_v10 = vld [vmem:[%s6780_s24 + $0x28] sm:$0xff]  }
 0x396   : > { %v2614_v49 = vpack.c.bf16 %v2526_v9, %v2523_v8  ;;  %v6453_v8 = vld [vmem:[%s6780_s24 + $0x10] sm:$0xff]   ;;  %v6454_v9 = vld [vmem:[%s6780_s24 + $0x18] sm:$0xff]  }
 0x397   : > { %v2613_v14 = vpack.c.bf16 %v2518_v13, %v2515_v12  ;;  %6072 = vmatpush3.bf16.msra.mxu1 %v6446_v3  ;;  %v6458_v12 = vld [vmem:[%s6780_s24 + $0x38] sm:$0xff]   ;;  %v6459_v13 = vld [vmem:[%s6780_s24 + $0x40] sm:$0xff]  }
 0x398   : > { %5423 = vst [vmem:[%s6795_s15 + $0x28] sm:$0xff] %v2614_v49   ;;  %6073 = vmatprep.subr.bf16.mxu1 %v6447_v11 }
 0x399   : > { %5422 = vst [vmem:[%s6795_s15 + $0x20] sm:$0xff] %v2613_v14   ;;  %v5999_v16 = vpop.f32.mrb[28].mxu1  ;;  %6041 = vmatprep.mubr.bf16.mxu1 %v2613_v14  ;;  %v6461_v14 = vld [vmem:[%s6780_s24 + $0x50] sm:$0xff]  }
 0x39a   : > { %v2530_v17 = vpop.f32.mrb[29].mxu1  ;;  %6042 = vmatmul.mubr.bf16.gmra.mrb[56].mxu1 %v2614_v49  ;;  %v2539_v19 = vadd.f32 %v5999_v16, %v7112_v38  ;;  %v6460_v49 = vld [vmem:[%s6780_s24 + $0x48] sm:$0xff]   ;;  %v6463_v16 = vld [vmem:[%s6780_s24 + $0x60] sm:$0xff]  }
 0x39b   : > { %v6000_v18 = vpop.f32.mrb[30].mxu1  ;;  %6074 = vmatpush3.bf16.msra.mxu1 %v6447_v11  ;;  %v2531_v23 = vadd.f32 %v7112_v38, %v2530_v17  ;;  %v6457_v11 = vld [vmem:[%s6780_s24 + $0x30] sm:$0xff]   ;;  %v6464_v17 = vld [vmem:[%s6780_s24 + $0x68] sm:$0xff]  }
 0x39c   : > { %v2542_v20 = vadd.f32 %v6000_v18, %v7112_v38  ;;  %v2533_v21 = vpop.f32.mrb[31].mxu1  ;;  %6075 = vmatprep.subr.bf16.mxu1 %v6448_v15  ;;  %v6465_v18 = vld [vmem:[%s6780_s24 + $0x70] sm:$0xff]  }
 0x39d   : > { %v2534_v24 = vadd.f32 %v7112_v38, %v2533_v21  ;;  %v6474_v21 = vld [vmem:[%s7573_s16 + $0x38] sm:$0xff]  }
 0x39e   : > { %v2616_v25 = vpack.c.bf16 %v2542_v20, %v2539_v19  ;;  %v6466_v19 = vld [vmem:[%s6780_s24 + $0x78] sm:$0xff]   ;;  %v6473_v20 = vld [vmem:[%s7573_s16 + $0x30] sm:$0xff]  }
 0x39f   : > { %v2615_v26 = vpack.c.bf16 %v2534_v24, %v2531_v23  ;;  %6076 = vmatpush3.bf16.msra.mxu1 %v6448_v15  ;;  %v6462_v15 = vld [vmem:[%s6780_s24 + $0x58] sm:$0xff]   ;;  %6125 = vmatprep.subr.bf16.mxu0 %v6473_v20  ;;  %v7229_v23 = vld [vmem:[%s7603_s17] ss:$0 sm:$0xff] }
 0x3a0   : > { %5425 = vst [vmem:[%s6795_s15 + $0x38] sm:$0xff] %v2616_v25   ;;  %6077 = vmatprep.subr.bf16.mxu1 %v6449_v22  ;;  %6126 = vmatpush3.bf16.msra.mxu0 %v6473_v20 }
 0x3a1   : > { %5424 = vst [vmem:[%s6795_s15 + $0x30] sm:$0xff] %v2615_v26   ;;  %v6003_v28 = vpop.f32.mrb[32].mxu1  ;;  %6045 = vmatprep.mubr.bf16.mxu1 %v2615_v26  ;;  %6127 = vmatprep.subr.bf16.mxu0 %v6474_v21 }
 0x3a2   : > { %v2546_v29 = vpop.f32.mrb[33].mxu1  ;;  %6046 = vmatmul.mubr.bf16.gmra.mrb[60].mxu1 %v2616_v25  ;;  %v2555_v31 = vadd.f32 %v6003_v28, %v7112_v38 }
 0x3a3   : > { %v6004_v30 = vpop.f32.mrb[34].mxu1  ;;  %6078 = vmatpush3.bf16.msra.mxu1 %v6449_v22  ;;  %v2547_v34 = vadd.f32 %v7112_v38, %v2546_v29  ;;  %v6475_v22 = vld [vmem:[%s7575_s18] sm:$0xff]  }
 0x3a4   : > { %v2558_v32 = vadd.f32 %v6004_v30, %v7112_v38  ;;  %v2549_v33 = vpop.f32.mrb[35].mxu1  ;;  %6079 = vmatprep.subr.bf16.mxu1 %v6450_v27  ;;  %6128 = vmatpush3.bf16.msra.mxu0 %v6474_v21 }
 0x3a5   : > { %v2550_v35 = vadd.f32 %v7112_v38, %v2549_v33  ;;  %6161 = vmatprep.subr.bf16.mxu0 %v6475_v22 }
 0x3a6   : > { %v2618_v36 = vpack.c.bf16 %v2558_v32, %v2555_v31 }
 0x3a7   : > { %v2617_v43 = vpack.c.bf16 %v2550_v35, %v2547_v34  ;;  %6080 = vmatpush3.bf16.msra.mxu1 %v6450_v27 }
 0x3a8   : > { %5427 = vst [vmem:[%s6795_s15 + $0x48] sm:$0xff] %v2618_v36  }
 0x3a9   : > { %5426 = vst [vmem:[%s6795_s15 + $0x40] sm:$0xff] %v2617_v43   ;;  %v6007_v37 = vpop.f32.mrb[36].mxu1  ;;  %6049 = vmatprep.mubr.bf16.mxu1 %v2617_v43 }
 0x3aa   : > { %v2562_v39 = vpop.f32.mrb[37].mxu1  ;;  %6050 = vmatmul.mubr.bf16.gmra.mrb[64].mxu1 %v2618_v36  ;;  %v2571_v41 = vadd.f32 %v6007_v37, %v7112_v38 }
 0x3ab   : > { %v6008_v40 = vpop.f32.mrb[38].mxu1  ;;  %v2563_v44 = vadd.f32 %v7112_v38, %v2562_v39 }
 0x3ac   : > { %v2574_v50 = vadd.f32 %v6008_v40, %v7112_v38  ;;  %v2565_v42 = vpop.f32.mrb[39].mxu1 }
 0x3ad   : > { %v2566_v45 = vadd.f32 %v7112_v38, %v2565_v42 }
 0x3ae   : > { %v2620_v46 = vpack.c.bf16 %v2574_v50, %v2571_v41  ;;  %v6476_v41 = vld [vmem:[%s7575_s18 + $0x8] sm:$0xff]  }
 0x3af   : > { %v2619_v47 = vpack.c.bf16 %v2566_v45, %v2563_v44 }
 0x3b0   : > { %5429 = vst [vmem:[%s6795_s15 + $0x58] sm:$0xff] %v2620_v46  }
 0x3b1   : > { %5428 = vst [vmem:[%s6795_s15 + $0x50] sm:$0xff] %v2619_v47   ;;  %v6011_v48 = vpop.f32.mrb[40].mxu1  ;;  %6053 = vmatprep.mubr.bf16.mxu1 %v2619_v47 }
 0x3b2   : > { %v2578_v51 = vpop.f32.mrb[41].mxu1  ;;  %6054 = vmatmul.mubr.bf16.gmra.mrb[68].mxu1 %v2620_v46  ;;  %v2587_v53 = vadd.f32 %v6011_v48, %v7112_v38 }
 0x3b3   : > { %v6012_v52 = vpop.f32.mrb[42].mxu1  ;;  %v2579_v56 = vadd.f32 %v7112_v38, %v2578_v51  ;;  %v6477_v51 = vld [vmem:[%s7575_s18 + $0x10] sm:$0xff]  }
 0x3b4   : > { %v2590_v54 = vadd.f32 %v6012_v52, %v7112_v38  ;;  %v2581_v55 = vpop.f32.mrb[43].mxu1 }
 0x3b5   : > { %v2582_v57 = vadd.f32 %v7112_v38, %v2581_v55 }
 0x3b6   : > { %v2622_v58 = vpack.c.bf16 %v2590_v54, %v2587_v53 }
 0x3b7   : > { %v2621_v59 = vpack.c.bf16 %v2582_v57, %v2579_v56 }
 0x3b8   : > { %5431 = vst [vmem:[%s6795_s15 + $0x68] sm:$0xff] %v2622_v58  }
 0x3b9   : > { %5430 = vst [vmem:[%s6795_s15 + $0x60] sm:$0xff] %v2621_v59   ;;  %v6015_v60 = vpop.f32.mrb[44].mxu1  ;;  %6057 = vmatprep.mubr.bf16.mxu1 %v2621_v59  ;;  %v6478_v59 = vld [vmem:[%s7575_s18 + $0x18] sm:$0xff]  }
 0x3ba   : > { %v2594_v61 = vpop.f32.mrb[45].mxu1  ;;  %6058 = vmatmul.mubr.bf16.gmra.mrb[72].mxu1 %v2622_v58  ;;  %v2603_v63 = vadd.f32 %v6015_v60, %v7112_v38 }
 0x3bb   : > { %v6016_v62 = vpop.f32.mrb[46].mxu1  ;;  %v2595_v2 = vadd.f32 %v7112_v38, %v2594_v61 }
 0x3bc   : > { %v2606_v0 = vadd.f32 %v6016_v62, %v7112_v38  ;;  %v2597_v1 = vpop.f32.mrb[47].mxu1 }
 0x3bd   : > { %v2598_v3 = vadd.f32 %v7112_v38, %v2597_v1  ;;  %v6455_v38 = vld [vmem:[%s6780_s24 + $0x20] sm:$0xff]  }
 0x3be   : > { %v2624_v4 = vpack.c.bf16 %v2606_v0, %v2603_v63 }
 0x3bf   : > { %v2623_v5 = vpack.c.bf16 %v2598_v3, %v2595_v2  ;;  %v6479_v3 = vld [vmem:[%s7575_s18 + $0x20] sm:$0xff]  }
 0x3c0   : > { %5433 = vst [vmem:[%s6795_s15 + $0x78] sm:$0xff] %v2624_v4  }
 0x3c1   : > { %5432 = vst [vmem:[%s6795_s15 + $0x70] sm:$0xff] %v2623_v5   ;;  %6061 = vmatprep.mubr.bf16.mxu1 %v2623_v5 }
 0x3c2   : > { %6062 = vmatmul.mubr.bf16.gmra.mrb[76].mxu1 %v2624_v4 }
 0x3c3   : > { %6081 = vmatprep.mubr.bf16.mxu1 %v6451_v6 }
 0x3ca   : > { %6082 = vmatmul.mubr.bf16.vlgmr.msra.gmra.mrb[48].mxu1 %v6452_v7 }
 0x3cb   : > { %6085 = vmatprep.mubr.bf16.mxu1 %v6453_v8 }
 0x3d2   : > { %6086 = vmatmul.mubr.bf16.gmra.mrb[52].mxu1 %v6454_v9 }
 0x3d3   : > { %6089 = vmatprep.mubr.bf16.mxu1 %v6455_v38 }
 0x3da   : > { %6090 = vmatmul.mubr.bf16.gmra.mrb[56].mxu1 %v6456_v10  ;;  %v6480_v10 = vld [vmem:[%s7575_s18 + $0x28] sm:$0xff]  }
 0x3db   : > { %6093 = vmatprep.mubr.bf16.mxu1 %v6457_v11 }
 0x3e2   : > { %6094 = vmatmul.mubr.bf16.gmra.mrb[60].mxu1 %v6458_v12 }
 0x3e3   : > { %6097 = vmatprep.mubr.bf16.mxu1 %v6459_v13 }
 0x3ea   : > { %6098 = vmatmul.mubr.bf16.gmra.mrb[64].mxu1 %v6460_v49 }
 0x3eb   : > { %6101 = vmatprep.mubr.bf16.mxu1 %v6461_v14 }
 0x3f2   : > { %6102 = vmatmul.mubr.bf16.gmra.mrb[68].mxu1 %v6462_v15 }
 0x3f3   : > { %6105 = vmatprep.mubr.bf16.mxu1 %v6463_v16 }
 0x3fa   : > { %6106 = vmatmul.mubr.bf16.gmra.mrb[72].mxu1 %v6464_v17 }
 0x3fb   : > { %6109 = vmatprep.mubr.bf16.mxu1 %v6465_v18 }
 0x402   : > { %6110 = vmatmul.mubr.bf16.gmra.mrb[76].mxu1 %v6466_v19 }
 0x49d   : > { %v6083_v24 = vpop.f32.mrb[48].mxu1 }
 0x49e   : > { %v3356_v25 = vadd.f32 %v6083_v24, %v7229_v23  ;;  %v3220_v26 = vpop.f32.mrb[49].mxu1 }
 0x49f   : > { %v3354_v27 = vadd.f32 %v7229_v23, %v3220_v26  ;;  %v6084_v28 = vpop.f32.mrb[50].mxu1 }
 0x4a0   : > { %v3357_v29 = vadd.f32 %v6084_v28, %v7229_v23  ;;  %v3223_v30 = vpop.f32.mrb[51].mxu1  ;;  %v3388_v32 = vmax.f32 %v3356_v25, 0.0 }
 0x4a1   : > { %v3355_v31 = vadd.f32 %v7229_v23, %v3223_v30  ;;  %v3386_v34 = vmax.f32 %v3354_v27, 0.0 }
 0x4a2   : > { %v3389_v33 = vmax.f32 %v3357_v29, 0.0 }
 0x4a3   : > { %v3387_v35 = vmax.f32 %v3355_v31, 0.0 }
 0x4a4   : > { %v3419_v36 = vpack.c.bf16 %v3389_v33, %v3388_v32 }
 0x4a5   : > { %v3418_v43 = vpack.c.bf16 %v3387_v35, %v3386_v34  ;;  %v6087_v37 = vpop.f32.mrb[52].mxu1 }
 0x4a6   : > { %v3360_v39 = vadd.f32 %v6087_v37, %v7229_v23  ;;  %v3236_v40 = vpop.f32.mrb[53].mxu1 }
 0x4a7   : > { %v3358_v50 = vadd.f32 %v7229_v23, %v3236_v40  ;;  %v6088_v42 = vpop.f32.mrb[54].mxu1  ;;  %6129 = vmatprep.mubr.bf16.mxu0 %v3418_v43 }
 0x4a8   : > { %v3361_v44 = vadd.f32 %v6088_v42, %v7229_v23  ;;  %v3239_v45 = vpop.f32.mrb[55].mxu1  ;;  %6130 = vmatmul.mubr.bf16.vlgmr.msra.gmra.mrb[48].mxu0 %v3419_v36  ;;  %v3392_v47 = vmax.f32 %v3360_v39, 0.0 }
 0x4a9   : > { %v3359_v46 = vadd.f32 %v7229_v23, %v3239_v45  ;;  %6162 = vmatpush3.bf16.msra.mxu0 %v6475_v22  ;;  %v3390_v52 = vmax.f32 %v3358_v50, 0.0 }
 0x4aa   : > { %v3393_v48 = vmax.f32 %v3361_v44, 0.0  ;;  %6163 = vmatprep.subr.bf16.mxu0 %v6476_v41 }
 0x4ab   : > { %v3391_v53 = vmax.f32 %v3359_v46, 0.0 }
 0x4ac   : > { %v3421_v54 = vpack.c.bf16 %v3393_v48, %v3392_v47 }
 0x4ad   : > { %v3420_v55 = vpack.c.bf16 %v3391_v53, %v3390_v52  ;;  %v6091_v56 = vpop.f32.mrb[56].mxu1  ;;  %6164 = vmatpush3.bf16.msra.mxu0 %v6476_v41 }
 0x4ae   : > { %v3364_v57 = vadd.f32 %v6091_v56, %v7229_v23  ;;  %v3252_v58 = vpop.f32.mrb[57].mxu1  ;;  %6165 = vmatprep.subr.bf16.mxu0 %v6477_v51 }
 0x4af   : > { %v3362_v60 = vadd.f32 %v7229_v23, %v3252_v58  ;;  %v6092_v61 = vpop.f32.mrb[58].mxu1  ;;  %6133 = vmatprep.mubr.bf16.mxu0 %v3420_v55 }
 0x4b0   : > { %v3365_v62 = vadd.f32 %v6092_v61, %v7229_v23  ;;  %v3255_v63 = vpop.f32.mrb[59].mxu1  ;;  %6134 = vmatmul.mubr.bf16.gmra.mrb[52].mxu0 %v3421_v54  ;;  %v3396_v1 = vmax.f32 %v3364_v57, 0.0 }
 0x4b1   : > { %v3363_v0 = vadd.f32 %v7229_v23, %v3255_v63  ;;  %6166 = vmatpush3.bf16.msra.mxu0 %v6477_v51  ;;  %v3394_v4 = vmax.f32 %v3362_v60, 0.0 }
 0x4b2   : > { %v3397_v2 = vmax.f32 %v3365_v62, 0.0  ;;  %6167 = vmatprep.subr.bf16.mxu0 %v6478_v59 }
 0x4b3   : > { %v3395_v5 = vmax.f32 %v3363_v0, 0.0 }
 0x4b4   : > { %v3423_v6 = vpack.c.bf16 %v3397_v2, %v3396_v1 }
 0x4b5   : > { %v3422_v7 = vpack.c.bf16 %v3395_v5, %v3394_v4  ;;  %v6095_v8 = vpop.f32.mrb[60].mxu1  ;;  %6168 = vmatpush3.bf16.msra.mxu0 %v6478_v59 }
 0x4b6   : > { %v3368_v9 = vadd.f32 %v6095_v8, %v7229_v23  ;;  %v3268_v38 = vpop.f32.mrb[61].mxu1  ;;  %6169 = vmatprep.subr.bf16.mxu0 %v6479_v3 }
 0x4b7   : > { %v3366_v11 = vadd.f32 %v7229_v23, %v3268_v38  ;;  %v6096_v12 = vpop.f32.mrb[62].mxu1  ;;  %6137 = vmatprep.mubr.bf16.mxu0 %v3422_v7 }
 0x4b8   : > { %v3369_v13 = vadd.f32 %v6096_v12, %v7229_v23  ;;  %v3271_v49 = vpop.f32.mrb[63].mxu1  ;;  %6138 = vmatmul.mubr.bf16.gmra.mrb[56].mxu0 %v3423_v6  ;;  %v3400_v15 = vmax.f32 %v3368_v9, 0.0 }
 0x4b9   : > { %v3367_v14 = vadd.f32 %v7229_v23, %v3271_v49  ;;  %6170 = vmatpush3.bf16.msra.mxu0 %v6479_v3  ;;  %v3398_v17 = vmax.f32 %v3366_v11, 0.0 }
 0x4ba   : > { %v3401_v16 = vmax.f32 %v3369_v13, 0.0  ;;  %6171 = vmatprep.subr.bf16.mxu0 %v6480_v10 }
 0x4bb   : > { %v3399_v18 = vmax.f32 %v3367_v14, 0.0  ;;  %v6481_v14 = vld [vmem:[%s7575_s18 + $0x30] sm:$0xff]  }
 0x4bc   : > { %v3425_v19 = vpack.c.bf16 %v3401_v16, %v3400_v15  ;;  %v6482_v15 = vld [vmem:[%s7575_s18 + $0x38] sm:$0xff]  }
 0x4bd   : > { %v3424_v20 = vpack.c.bf16 %v3399_v18, %v3398_v17  ;;  %v6099_v21 = vpop.f32.mrb[64].mxu1  ;;  %6172 = vmatpush3.bf16.msra.mxu0 %v6480_v10 }
 0x4be   : > { %v3372_v22 = vadd.f32 %v6099_v21, %v7229_v23  ;;  %v3284_v24 = vpop.f32.mrb[65].mxu1  ;;  %6173 = vmatprep.subr.bf16.mxu0 %v6481_v14 }
 0x4bf   : > { %v3370_v25 = vadd.f32 %v7229_v23, %v3284_v24  ;;  %v6100_v26 = vpop.f32.mrb[66].mxu1  ;;  %6141 = vmatprep.mubr.bf16.mxu0 %v3424_v20 }
 0x4c0   : > { %v3373_v27 = vadd.f32 %v6100_v26, %v7229_v23  ;;  %v3287_v28 = vpop.f32.mrb[67].mxu1  ;;  %6142 = vmatmul.mubr.bf16.gmra.mrb[60].mxu0 %v3425_v19  ;;  %v3404_v30 = vmax.f32 %v3372_v22, 0.0 }
 0x4c1   : > { %v3371_v29 = vadd.f32 %v7229_v23, %v3287_v28  ;;  %v3402_v32 = vmax.f32 %v3370_v25, 0.0  ;;  %6174 = vmatpush3.bf16.msra.mxu0 %v6481_v14 }
 0x4c2   : > { %v3405_v31 = vmax.f32 %v3373_v27, 0.0  ;;  %6175 = vmatprep.subr.bf16.mxu0 %v6482_v15 }
 0x4c3   : > { %v3403_v33 = vmax.f32 %v3371_v29, 0.0 }
 0x4c4   : > { %v3427_v34 = vpack.c.bf16 %v3405_v31, %v3404_v30 }
 0x4c5   : > { %v3426_v35 = vpack.c.bf16 %v3403_v33, %v3402_v32  ;;  %v6103_v36 = vpop.f32.mrb[68].mxu1  ;;  %6176 = vmatpush3.bf16.msra.mxu0 %v6482_v15 }
 0x4c6   : > { %v3376_v43 = vadd.f32 %v6103_v36, %v7229_v23  ;;  %v3300_v37 = vpop.f32.mrb[69].mxu1 }
 0x4c7   : > { %v3374_v39 = vadd.f32 %v7229_v23, %v3300_v37  ;;  %v6104_v40 = vpop.f32.mrb[70].mxu1  ;;  %6145 = vmatprep.mubr.bf16.mxu0 %v3426_v35 }
 0x4c8   : > { %v3377_v41 = vadd.f32 %v6104_v40, %v7229_v23  ;;  %v3303_v50 = vpop.f32.mrb[71].mxu1  ;;  %6146 = vmatmul.mubr.bf16.gmra.mrb[64].mxu0 %v3427_v34  ;;  %v3408_v44 = vmax.f32 %v3376_v43, 0.0 }
 0x4c9   : > { %v3375_v42 = vadd.f32 %v7229_v23, %v3303_v50  ;;  %v3406_v46 = vmax.f32 %v3374_v39, 0.0 }
 0x4ca   : > { %v3409_v45 = vmax.f32 %v3377_v41, 0.0 }
 0x4cb   : > { %v3407_v47 = vmax.f32 %v3375_v42, 0.0 }
 0x4cc   : > { %v3429_v48 = vpack.c.bf16 %v3409_v45, %v3408_v44 }
 0x4cd   : > { %v3428_v51 = vpack.c.bf16 %v3407_v47, %v3406_v46  ;;  %v6107_v52 = vpop.f32.mrb[72].mxu1 }
 0x4ce   : > { %v3380_v53 = vadd.f32 %v6107_v52, %v7229_v23  ;;  %v3316_v54 = vpop.f32.mrb[73].mxu1 }
 0x4cf   : > { %v3378_v55 = vadd.f32 %v7229_v23, %v3316_v54  ;;  %v6108_v56 = vpop.f32.mrb[74].mxu1  ;;  %6149 = vmatprep.mubr.bf16.mxu0 %v3428_v51 }
 0x4d0   : > { %v3381_v57 = vadd.f32 %v6108_v56, %v7229_v23  ;;  %v3319_v58 = vpop.f32.mrb[75].mxu1  ;;  %6150 = vmatmul.mubr.bf16.gmra.mrb[68].mxu0 %v3429_v48  ;;  %v3412_v60 = vmax.f32 %v3380_v53, 0.0 }
 0x4d1   : > { %v3379_v59 = vadd.f32 %v7229_v23, %v3319_v58  ;;  %v3410_v62 = vmax.f32 %v3378_v55, 0.0 }
 0x4d2   : > { %v3413_v61 = vmax.f32 %v3381_v57, 0.0 }
 0x4d3   : > { %v3411_v63 = vmax.f32 %v3379_v59, 0.0 }
 0x4d4   : > { %v3431_v0 = vpack.c.bf16 %v3413_v61, %v3412_v60 }
 0x4d5   : > { %v3430_v1 = vpack.c.bf16 %v3411_v63, %v3410_v62  ;;  %v6111_v2 = vpop.f32.mrb[76].mxu1 }
 0x4d6   : > { %v3384_v3 = vadd.f32 %v6111_v2, %v7229_v23  ;;  %v3332_v4 = vpop.f32.mrb[77].mxu1 }
 0x4d7   : > { %v3382_v5 = vadd.f32 %v7229_v23, %v3332_v4  ;;  %v6112_v6 = vpop.f32.mrb[78].mxu1  ;;  %6153 = vmatprep.mubr.bf16.mxu0 %v3430_v1 }
 0x4d8   : > { %v3385_v7 = vadd.f32 %v6112_v6, %v7229_v23  ;;  %v3335_v8 = vpop.f32.mrb[79].mxu1  ;;  %6154 = vmatmul.mubr.bf16.gmra.mrb[72].mxu0 %v3431_v0  ;;  %v3416_v38 = vmax.f32 %v3384_v3, 0.0 }
 0x4d9   : > { %v3383_v9 = vadd.f32 %v7229_v23, %v3335_v8  ;;  %v3414_v11 = vmax.f32 %v3382_v5, 0.0  ;;  %v7287_v23 = vld [vmem:[%s7604_s25] ss:$0 sm:$0xff] }
 0x4da   : > { %v3417_v10 = vmax.f32 %v3385_v7, 0.0 }
 0x4db   : > { %v3415_v12 = vmax.f32 %v3383_v9, 0.0 }
 0x4dc   : > { %v3433_v13 = vpack.c.bf16 %v3417_v10, %v3416_v38 }
 0x4dd   : > { %v3432_v49 = vpack.c.bf16 %v3415_v12, %v3414_v11 }
 0x4df   : > { %6157 = vmatprep.mubr.bf16.mxu0 %v3432_v49 }
 0x4e0   : > { %6158 = vmatmul.mubr.bf16.gmra.mrb[76].mxu0 %v3433_v13 }
 0x57b   : > { %v6131_v16 = vpop.f32.mrb[48].mxu0 }
 0x57c   : > { %v3548_v17 = vadd.f32 %v6131_v16, %v7287_v23  ;;  %v3539_v18 = vpop.f32.mrb[49].mxu0 }
 0x57d   : > { %v3540_v19 = vadd.f32 %v7287_v23, %v3539_v18  ;;  %v6132_v20 = vpop.f32.mrb[50].mxu0 }
 0x57e   : > { %v3551_v21 = vadd.f32 %v6132_v20, %v7287_v23  ;;  %v3542_v22 = vpop.f32.mrb[51].mxu0  ;;  %v3668_v25 = vmax.f32 %v3548_v17, 0.0 }
 0x57f   : > { %v3543_v24 = vadd.f32 %v7287_v23, %v3542_v22  ;;  %v3666_v27 = vmax.f32 %v3540_v19, 0.0 }
 0x580   : > { %v3669_v26 = vmax.f32 %v3551_v21, 0.0 }
 0x581   : > { %v3667_v28 = vmax.f32 %v3543_v24, 0.0 }
 0x582   : > { %v3699_v29 = vpack.c.bf16 %v3669_v26, %v3668_v25 }
 0x583   : > { %v3698_v30 = vpack.c.bf16 %v3667_v28, %v3666_v27  ;;  %v6135_v31 = vpop.f32.mrb[52].mxu0 }
 0x584   : > { %v3564_v32 = vadd.f32 %v6135_v31, %v7287_v23  ;;  %v3555_v33 = vpop.f32.mrb[53].mxu0 }
 0x585   : > { %v3556_v34 = vadd.f32 %v7287_v23, %v3555_v33  ;;  %v6136_v35 = vpop.f32.mrb[54].mxu0  ;;  %6177 = vmatprep.mubr.bf16.mxu0 %v3698_v30 }
 0x586   : > { %v3567_v36 = vadd.f32 %v6136_v35, %v7287_v23  ;;  %v3558_v43 = vpop.f32.mrb[55].mxu0  ;;  %6178 = vmatmul.mubr.bf16.vlgmr.msra.gmra.mrb[80].mxu0 %v3699_v29  ;;  %v3672_v39 = vmax.f32 %v3564_v32, 0.0 }
 0x587   : > { %v3559_v37 = vadd.f32 %v7287_v23, %v3558_v43  ;;  %v3670_v41 = vmax.f32 %v3556_v34, 0.0 }
 0x588   : > { %v3673_v40 = vmax.f32 %v3567_v36, 0.0 }
 0x589   : > { %v3671_v50 = vmax.f32 %v3559_v37, 0.0 }
 0x58a   : > { %v3701_v42 = vpack.c.bf16 %v3673_v40, %v3672_v39 }
 0x58b   : > { %v3700_v44 = vpack.c.bf16 %v3671_v50, %v3670_v41  ;;  %v6139_v45 = vpop.f32.mrb[56].mxu0 }
 0x58c   : > { %v3580_v46 = vadd.f32 %v6139_v45, %v7287_v23  ;;  %v3571_v47 = vpop.f32.mrb[57].mxu0 }
 0x58d   : > { %v3572_v48 = vadd.f32 %v7287_v23, %v3571_v47  ;;  %v6140_v51 = vpop.f32.mrb[58].mxu0  ;;  %6181 = vmatprep.mubr.bf16.mxu0 %v3700_v44 }
 0x58e   : > { %v3583_v52 = vadd.f32 %v6140_v51, %v7287_v23  ;;  %v3574_v53 = vpop.f32.mrb[59].mxu0  ;;  %6182 = vmatmul.mubr.bf16.gmra.mrb[84].mxu0 %v3701_v42  ;;  %v3676_v55 = vmax.f32 %v3580_v46, 0.0 }
 0x58f   : > { %v3575_v54 = vadd.f32 %v7287_v23, %v3574_v53  ;;  %v3674_v57 = vmax.f32 %v3572_v48, 0.0 }
 0x590   : > { %v3677_v56 = vmax.f32 %v3583_v52, 0.0 }
 0x591   : > { %v3675_v58 = vmax.f32 %v3575_v54, 0.0 }
 0x592   : > { %v3703_v59 = vpack.c.bf16 %v3677_v56, %v3676_v55 }
 0x593   : > { %v3702_v60 = vpack.c.bf16 %v3675_v58, %v3674_v57  ;;  %v6143_v61 = vpop.f32.mrb[60].mxu0 }
 0x594   : > { %v3596_v62 = vadd.f32 %v6143_v61, %v7287_v23  ;;  %v3587_v63 = vpop.f32.mrb[61].mxu0 }
 0x595   : > { %v3588_v0 = vadd.f32 %v7287_v23, %v3587_v63  ;;  %v6144_v1 = vpop.f32.mrb[62].mxu0  ;;  %6185 = vmatprep.mubr.bf16.mxu0 %v3702_v60 }
 0x596   : > { %v3599_v2 = vadd.f32 %v6144_v1, %v7287_v23  ;;  %v3590_v3 = vpop.f32.mrb[63].mxu0  ;;  %6186 = vmatmul.mubr.bf16.gmra.mrb[88].mxu0 %v3703_v59  ;;  %v3680_v5 = vmax.f32 %v3596_v62, 0.0 }
 0x597   : > { %v3591_v4 = vadd.f32 %v7287_v23, %v3590_v3  ;;  %v3678_v7 = vmax.f32 %v3588_v0, 0.0 }
 0x598   : > { %v3681_v6 = vmax.f32 %v3599_v2, 0.0 }
 0x599   : > { %v3679_v8 = vmax.f32 %v3591_v4, 0.0  ;;  %v6485_v4 = vld [vmem:[%s6797_s4 + $0x4] ss:$8 sps:$4 sm:$0xff]  }
 0x59a   : > { %v3705_v9 = vpack.c.bf16 %v3681_v6, %v3680_v5  ;;  %4218 = vmatprep.mubr.bf16.mxu1 %v6485_v4  ;;  %v7325_v6 = vld [vmem:[%s7605_s22] ss:$0 sm:$0xff] }
 0x59b   : > { %v3704_v38 = vpack.c.bf16 %v3679_v8, %v3678_v7  ;;  %v6147_v10 = vpop.f32.mrb[64].mxu0 }
 0x59c   : > { %v3612_v11 = vadd.f32 %v6147_v10, %v7287_v23  ;;  %v3603_v12 = vpop.f32.mrb[65].mxu0 }
 0x59d   : > { %v3604_v13 = vadd.f32 %v7287_v23, %v3603_v12  ;;  %v6148_v49 = vpop.f32.mrb[66].mxu0  ;;  %6189 = vmatprep.mubr.bf16.mxu0 %v3704_v38 }
 0x59e   : > { %v3615_v14 = vadd.f32 %v6148_v49, %v7287_v23  ;;  %v3606_v15 = vpop.f32.mrb[67].mxu0  ;;  %6190 = vmatmul.mubr.bf16.gmra.mrb[92].mxu0 %v3705_v9  ;;  %v3684_v17 = vmax.f32 %v3612_v11, 0.0 }
 0x59f   : > { %v3607_v16 = vadd.f32 %v7287_v23, %v3606_v15  ;;  %v3682_v19 = vmax.f32 %v3604_v13, 0.0 }
 0x5a0   : > { %v3685_v18 = vmax.f32 %v3615_v14, 0.0 }
 0x5a1   : > { %v3683_v20 = vmax.f32 %v3607_v16, 0.0 }
 0x5a2   : > { %v3707_v21 = vpack.c.bf16 %v3685_v18, %v3684_v17 }
 0x5a3   : > { %v3706_v22 = vpack.c.bf16 %v3683_v20, %v3682_v19  ;;  %v6151_v24 = vpop.f32.mrb[68].mxu0 }
 0x5a4   : > { %v3628_v25 = vadd.f32 %v6151_v24, %v7287_v23  ;;  %v3619_v26 = vpop.f32.mrb[69].mxu0 }
 0x5a5   : > { %v3620_v27 = vadd.f32 %v7287_v23, %v3619_v26  ;;  %v6152_v28 = vpop.f32.mrb[70].mxu0  ;;  %6193 = vmatprep.mubr.bf16.mxu0 %v3706_v22 }
 0x5a6   : > { %v3631_v29 = vadd.f32 %v6152_v28, %v7287_v23  ;;  %v3622_v30 = vpop.f32.mrb[71].mxu0  ;;  %6194 = vmatmul.mubr.bf16.gmra.mrb[96].mxu0 %v3707_v21  ;;  %v3688_v32 = vmax.f32 %v3628_v25, 0.0 }
 0x5a7   : > { %v3623_v31 = vadd.f32 %v7287_v23, %v3622_v30  ;;  %v3686_v34 = vmax.f32 %v3620_v27, 0.0 }
 0x5a8   : > { %v3689_v33 = vmax.f32 %v3631_v29, 0.0 }
 0x5a9   : > { %v3687_v35 = vmax.f32 %v3623_v31, 0.0 }
 0x5aa   : > { %v3709_v36 = vpack.c.bf16 %v3689_v33, %v3688_v32 }
 0x5ab   : > { %v3708_v43 = vpack.c.bf16 %v3687_v35, %v3686_v34  ;;  %v6155_v37 = vpop.f32.mrb[72].mxu0 }
 0x5ac   : > { %v3644_v39 = vadd.f32 %v6155_v37, %v7287_v23  ;;  %v3635_v40 = vpop.f32.mrb[73].mxu0 }
 0x5ad   : > { %v3636_v41 = vadd.f32 %v7287_v23, %v3635_v40  ;;  %v6156_v50 = vpop.f32.mrb[74].mxu0  ;;  %6197 = vmatprep.mubr.bf16.mxu0 %v3708_v43 }
 0x5ae   : > { %v3647_v42 = vadd.f32 %v6156_v50, %v7287_v23  ;;  %v3638_v44 = vpop.f32.mrb[75].mxu0  ;;  %6198 = vmatmul.mubr.bf16.gmra.mrb[100].mxu0 %v3709_v36  ;;  %v3692_v46 = vmax.f32 %v3644_v39, 0.0 }
 0x5af   : > { %v3639_v45 = vadd.f32 %v7287_v23, %v3638_v44  ;;  %v3690_v48 = vmax.f32 %v3636_v41, 0.0 }
 0x5b0   : > { %v3693_v47 = vmax.f32 %v3647_v42, 0.0 }
 0x5b1   : > { %v3691_v51 = vmax.f32 %v3639_v45, 0.0 }
 0x5b2   : > { %v3711_v52 = vpack.c.bf16 %v3693_v47, %v3692_v46 }
 0x5b3   : > { %v3710_v53 = vpack.c.bf16 %v3691_v51, %v3690_v48  ;;  %v6159_v54 = vpop.f32.mrb[76].mxu0 }
 0x5b4   : > { %v3660_v55 = vadd.f32 %v6159_v54, %v7287_v23  ;;  %v3651_v56 = vpop.f32.mrb[77].mxu0 }
 0x5b5   : > { %v3652_v57 = vadd.f32 %v7287_v23, %v3651_v56  ;;  %v6160_v58 = vpop.f32.mrb[78].mxu0  ;;  %6201 = vmatprep.mubr.bf16.mxu0 %v3710_v53 }
 0x5b6   : > { %v3663_v59 = vadd.f32 %v6160_v58, %v7287_v23  ;;  %v3654_v60 = vpop.f32.mrb[79].mxu0  ;;  %6202 = vmatmul.mubr.bf16.gmra.mrb[104].mxu0 %v3711_v52  ;;  %v3696_v62 = vmax.f32 %v3660_v55, 0.0 }
 0x5b7   : > { %v3655_v61 = vadd.f32 %v7287_v23, %v3654_v60  ;;  %v3694_v0 = vmax.f32 %v3652_v57, 0.0 }
 0x5b8   : > { %v3697_v63 = vmax.f32 %v3663_v59, 0.0 }
 0x5b9   : > { %v3695_v1 = vmax.f32 %v3655_v61, 0.0 }
 0x5ba   : > { %v3713_v2 = vpack.c.bf16 %v3697_v63, %v3696_v62 }
 0x5bb   : > { %v3712_v3 = vpack.c.bf16 %v3695_v1, %v3694_v0 }
 0x5bd   : > { %6205 = vmatprep.mubr.bf16.mxu0 %v3712_v3 }
 0x5be   : > { %6206 = vmatmul.mubr.bf16.gmra.mrb[108].mxu0 %v3713_v2 }
 0x659   : > { %v6179_v5 = vpop.f32.mrb[80].mxu0 }
 0x65a   : > { %v3819_v7 = vpop.f32.mrb[81].mxu0  ;;  %v3828_v23 = vadd.f32 %v6179_v5, %v7325_v6 }
 0x65b   : > { %v6180_v8 = vpop.f32.mrb[82].mxu0  ;;  %v3820_v10 = vadd.f32 %v7325_v6, %v3819_v7 }
 0x65c   : > { %v3831_v9 = vadd.f32 %v6180_v8, %v7325_v6  ;;  %v3822_v38 = vpop.f32.mrb[83].mxu0 }
 0x65d   : > { %v3823_v11 = vadd.f32 %v7325_v6, %v3822_v38 }
 0x65e   : > { %v3947_v12 = vpack.c.bf16 %v3831_v9, %v3828_v23 }
 0x65f   : > { %v3946_v13 = vpack.c.bf16 %v3823_v11, %v3820_v10 }
 0x661   : > { %v6183_v49 = vpop.f32.mrb[84].mxu0 }
 0x662   : > { %v3835_v14 = vpop.f32.mrb[85].mxu0  ;;  %v7332_v16 = vadd.f32 %v6183_v49, %v7325_v6 }
 0x663   : > { %v6184_v15 = vpop.f32.mrb[86].mxu0  ;;  %v3836_v19 = vadd.f32 %v7325_v6, %v3835_v14 }
 0x664   : > { %v3847_v17 = vadd.f32 %v6184_v15, %v7325_v6  ;;  %v3838_v18 = vpop.f32.mrb[87].mxu0 }
 0x665   : > { %v3839_v20 = vadd.f32 %v7325_v6, %v3838_v18 }
 0x666   : > { %v3949_v21 = vpack.c.bf16 %v3847_v17, %v7332_v16 }
 0x667   : > { %v3948_v22 = vpack.c.bf16 %v3839_v20, %v3836_v19  ;;  %v6483_v20 = vld [vmem:[%s6797_s4] ss:$8 sps:$4 sm:$0xff]  }
 0x669   : > { %v6187_v24 = vpop.f32.mrb[88].mxu0 }
 0x66a   : > { %v3851_v25 = vpop.f32.mrb[89].mxu0  ;;  %v7339_v27 = vadd.f32 %v6187_v24, %v7325_v6  ;;  %v6491_v24 = vld [vmem:[%s6797_s4 + $0x20] ss:$8 sps:$4 sm:$0xff]  }
 0x66b   : > { %v6188_v26 = vpop.f32.mrb[90].mxu0  ;;  %v3852_v30 = vadd.f32 %v7325_v6, %v3851_v25  ;;  %v6492_v25 = vld [vmem:[%s6797_s4 + $0x34] ss:$8 sps:$4 sm:$0xff]  }
 0x66c   : > { %v7342_v28 = vadd.f32 %v6188_v26, %v7325_v6  ;;  %v3854_v29 = vpop.f32.mrb[91].mxu0  ;;  %v6494_v26 = vld [vmem:[%s6797_s4 + $0x30] ss:$8 sps:$4 sm:$0xff]  }
 0x66d   : > { %v3855_v31 = vadd.f32 %v7325_v6, %v3854_v29  ;;  %v6498_v29 = vld [vmem:[%s6797_s4 + $0x54] ss:$8 sps:$4 sm:$0xff]  }
 0x66e   : > { %v3951_v32 = vpack.c.bf16 %v7342_v28, %v7339_v27  ;;  %v6495_v27 = vld [vmem:[%s6797_s4 + $0x44] ss:$8 sps:$4 sm:$0xff]   ;;  %v6497_v28 = vld [vmem:[%s6797_s4 + $0x40] ss:$8 sps:$4 sm:$0xff]  }
 0x66f   : > { %v3950_v33 = vpack.c.bf16 %v3855_v31, %v3852_v30  ;;  %v6500_v30 = vld [vmem:[%s6797_s4 + $0x50] ss:$8 sps:$4 sm:$0xff]   ;;  %v6501_v31 = vld [vmem:[%s6797_s4 + $0x64] ss:$8 sps:$4 sm:$0xff]  }
 0x671   : > { %v6191_v34 = vpop.f32.mrb[92].mxu0 }
 0x672   : > { %v3867_v35 = vpop.f32.mrb[93].mxu0  ;;  %v7349_v43 = vadd.f32 %v6191_v34, %v7325_v6  ;;  %v6506_v34 = vld [vmem:[%s6797_s4 + $0x70] ss:$8 sps:$4 sm:$0xff]  }
 0x673   : > { %v6192_v36 = vpop.f32.mrb[94].mxu0  ;;  %v3868_v40 = vadd.f32 %v7325_v6, %v3867_v35  ;;  %v6507_v35 = vld [vmem:[%s6797_s4 + $0x84] ss:$8 sps:$4 sm:$0xff]  }
 0x674   : > { %v3879_v37 = vadd.f32 %v6192_v36, %v7325_v6  ;;  %v3870_v39 = vpop.f32.mrb[95].mxu0  ;;  %v6509_v36 = vld [vmem:[%s6797_s4 + $0x80] ss:$8 sps:$4 sm:$0xff]  }
 0x675   : > { %v3871_v41 = vadd.f32 %v7325_v6, %v3870_v39  ;;  %v6513_v39 = vld [vmem:[%s6797_s4 + $0xa4] ss:$8 sps:$4 sm:$0xff]  }
 0x676   : > { %v3953_v50 = vpack.c.bf16 %v3879_v37, %v7349_v43  ;;  %v6510_v43 = vld [vmem:[%s6797_s4 + $0x94] ss:$8 sps:$4 sm:$0xff]   ;;  %v6512_v37 = vld [vmem:[%s6797_s4 + $0x90] ss:$8 sps:$4 sm:$0xff]  }
 0x677   : > { %v3952_v42 = vpack.c.bf16 %v3871_v41, %v3868_v40  ;;  %v6515_v40 = vld [vmem:[%s6797_s4 + $0xa0] ss:$8 sps:$4 sm:$0xff]   ;;  %v6516_v41 = vld [vmem:[%s6797_s4 + $0xb4] ss:$8 sps:$4 sm:$0xff]  }
 0x679   : > { %v6195_v44 = vpop.f32.mrb[96].mxu0 }
 0x67a   : > { %v3883_v45 = vpop.f32.mrb[97].mxu0  ;;  %v3892_v47 = vadd.f32 %v6195_v44, %v7325_v6  ;;  %v6521_v44 = vld [vmem:[%s6797_s4 + $0xc0] ss:$8 sps:$4 sm:$0xff]  }
 0x67b   : > { %v6196_v46 = vpop.f32.mrb[98].mxu0  ;;  %v3884_v52 = vadd.f32 %v7325_v6, %v3883_v45  ;;  %v6522_v45 = vld [vmem:[%s6797_s4 + $0xd4] ss:$8 sps:$4 sm:$0xff]  }
 0x67c   : > { %v3895_v48 = vadd.f32 %v6196_v46, %v7325_v6  ;;  %v3886_v51 = vpop.f32.mrb[99].mxu0  ;;  %v6524_v46 = vld [vmem:[%s6797_s4 + $0xd0] ss:$8 sps:$4 sm:$0xff]  }
 0x67d   : > { %v3887_v53 = vadd.f32 %v7325_v6, %v3886_v51  ;;  %v6528_v51 = vld [vmem:[%s6797_s4 + $0xf4] ss:$8 sps:$4 sm:$0xff]  }
 0x67e   : > { %v3955_v54 = vpack.c.bf16 %v3895_v48, %v3892_v47  ;;  %v6525_v47 = vld [vmem:[%s6797_s4 + $0xe4] ss:$8 sps:$4 sm:$0xff]   ;;  %v6527_v48 = vld [vmem:[%s6797_s4 + $0xe0] ss:$8 sps:$4 sm:$0xff]  }
 0x67f   : > { %v3954_v55 = vpack.c.bf16 %v3887_v53, %v3884_v52  ;;  %v6530_v52 = vld [vmem:[%s6797_s4 + $0xf0] ss:$8 sps:$4 sm:$0xff]  }
 0x681   : > { %v6199_v56 = vpop.f32.mrb[100].mxu0  ;;  %5665 = vmatprep.subr.bf16.mxu1 %v3954_v55 }
 0x682   : > { %v3899_v57 = vpop.f32.mrb[101].mxu0  ;;  %5666 = vmatpush3.bf16.msra.mxu1 %v3946_v13  ;;  %v3908_v59 = vadd.f32 %v6199_v56, %v7325_v6 }
 0x683   : > { %v6200_v58 = vpop.f32.mrb[102].mxu0  ;;  %5667 = vmatprep.subr.bf16.mxu1 %v3955_v54  ;;  %v3900_v62 = vadd.f32 %v7325_v6, %v3899_v57  ;;  %v3962_v54 = vld [vmem:[#allocation2] sm:$0xff] }
 0x684   : > { %v3911_v60 = vadd.f32 %v6200_v58, %v7325_v6  ;;  %v3902_v61 = vpop.f32.mrb[103].mxu0  ;;  %v3963_v58 = vld [vmem:[#allocation2 + $0x8] sm:$0xff] }
 0x685   : > { %v3903_v63 = vadd.f32 %v7325_v6, %v3902_v61 }
 0x686   : > { %v3957_v0 = vpack.c.bf16 %v3911_v60, %v3908_v59  ;;  %5668 = vmatpush3.bf16.msra.mxu1 %v3947_v12 }
 0x687   : > { %v3956_v1 = vpack.c.bf16 %v3903_v63, %v3900_v62 }
 0x689   : > { %v6203_v2 = vpop.f32.mrb[104].mxu0  ;;  %5669 = vmatprep.subr.bf16.mxu1 %v3956_v1 }
 0x68a   : > { %v3915_v3 = vpop.f32.mrb[105].mxu0  ;;  %5670 = vmatpush3.bf16.msra.mxu1 %v3948_v22  ;;  %v3924_v5 = vadd.f32 %v6203_v2, %v7325_v6  ;;  %v6488_v22 = vld [vmem:[%s6797_s4 + $0x10] ss:$8 sps:$4 sm:$0xff]  }
 0x68b   : > { %v6204_v4 = vpop.f32.mrb[106].mxu0  ;;  %5671 = vmatprep.subr.bf16.mxu1 %v3957_v0  ;;  %v3916_v23 = vadd.f32 %v7325_v6, %v3915_v3  ;;  %v3964_v0 = vld [vmem:[#allocation2 + $0x10] sm:$0xff] }
 0x68c   : > { %v3927_v7 = vadd.f32 %v6204_v4, %v7325_v6  ;;  %v3918_v8 = vpop.f32.mrb[107].mxu0  ;;  %v3965_v4 = vld [vmem:[#allocation2 + $0x18] sm:$0xff] }
 0x68d   : > { %v3919_v9 = vadd.f32 %v7325_v6, %v3918_v8 }
 0x68e   : > { %v3959_v38 = vpack.c.bf16 %v3927_v7, %v3924_v5  ;;  %5672 = vmatpush3.bf16.msra.mxu1 %v3949_v21  ;;  %v6486_v21 = vld [vmem:[%s6797_s4 + $0x14] ss:$8 sps:$4 sm:$0xff]  }
 0x68f   : > { %v3958_v10 = vpack.c.bf16 %v3919_v9, %v3916_v23 }
 0x691   : > { %v6207_v11 = vpop.f32.mrb[108].mxu0  ;;  %5673 = vmatprep.subr.bf16.mxu1 %v3958_v10 }
 0x692   : > { %v3931_v12 = vpop.f32.mrb[109].mxu0  ;;  %5674 = vmatpush3.bf16.msra.mxu1 %v3950_v33  ;;  %v3940_v49 = vadd.f32 %v6207_v11, %v7325_v6  ;;  %v6504_v33 = vld [vmem:[%s6797_s4 + $0x74] ss:$8 sps:$4 sm:$0xff]  }
 0x693   : > { %v6208_v13 = vpop.f32.mrb[110].mxu0  ;;  %5675 = vmatprep.subr.bf16.mxu1 %v3959_v38  ;;  %v3932_v16 = vadd.f32 %v7325_v6, %v3931_v12  ;;  %v3966_v38 = vld [vmem:[#allocation2 + $0x20] sm:$0xff] }
 0x694   : > { %v3943_v14 = vadd.f32 %v6208_v13, %v7325_v6  ;;  %v3934_v15 = vpop.f32.mrb[111].mxu0  ;;  %v3967_v13 = vld [vmem:[#allocation2 + $0x28] sm:$0xff] }
 0x695   : > { %v3935_v17 = vadd.f32 %v7325_v6, %v3934_v15  ;;  %v6489_v6 = vld [vmem:[%s6797_s4 + $0x24] ss:$8 sps:$4 sm:$0xff]  }
 0x696   : > { %v3961_v18 = vpack.c.bf16 %v3943_v14, %v3940_v49  ;;  %5676 = vmatpush3.bf16.msra.mxu1 %v3951_v32  ;;  %v6503_v32 = vld [vmem:[%s6797_s4 + $0x60] ss:$8 sps:$4 sm:$0xff]  }
 0x697   : > { %v3960_v19 = vpack.c.bf16 %v3935_v17, %v3932_v16 }
 0x699   : > { %5677 = vmatprep.subr.bf16.mxu1 %v3960_v19 }
 0x69a   : > { %5678 = vmatpush3.bf16.msra.mxu1 %v3952_v42  ;;  %v6519_v42 = vld [vmem:[%s6797_s4 + $0xc4] ss:$8 sps:$4 sm:$0xff]  }
 0x69b   : > { %5679 = vmatprep.subr.bf16.mxu1 %v3961_v18  ;;  %v3968_v18 = vld [vmem:[#allocation2 + $0x30] sm:$0xff] }
 0x69e   : > { %5680 = vmatpush3.bf16.msra.mxu1 %v3953_v50  ;;  %v6518_v50 = vld [vmem:[%s6797_s4 + $0xb0] ss:$8 sps:$4 sm:$0xff]  }
 0x6a1   : > { %4219 = vmatmul.mubr.bf16.vlgmr.msra.gmra.mrb[80].mxu1 %v6483_v20 }
 0x6a2   : > { %4226 = vmatprep.mubr.bf16.mxu1 %v6486_v21 }
 0x6a9   : > { %4227 = vmatmul.mubr.bf16.gmra.mrb[84].mxu1 %v6488_v22  ;;  %v3969_v22 = vld [vmem:[#allocation2 + $0x38] sm:$0xff] }
 0x6aa   : > { %4234 = vmatprep.mubr.bf16.mxu1 %v6489_v6 }
 0x6b1   : > { %4235 = vmatmul.mubr.bf16.gmra.mrb[88].mxu1 %v6491_v24 }
 0x6b2   : > { %4242 = vmatprep.mubr.bf16.mxu1 %v6492_v25 }
 0x6b9   : > { %4243 = vmatmul.mubr.bf16.gmra.mrb[92].mxu1 %v6494_v26 }
 0x6ba   : > { %4250 = vmatprep.mubr.bf16.mxu1 %v6495_v27 }
 0x6c1   : > { %4251 = vmatmul.mubr.bf16.gmra.mrb[96].mxu1 %v6497_v28  ;;  %v3970_v28 = vld [vmem:[#allocation2 + $0x40] sm:$0xff] }
 0x6c2   : > { %4258 = vmatprep.mubr.bf16.mxu1 %v6498_v29 }
 0x6c9   : > { %4259 = vmatmul.mubr.bf16.gmra.mrb[100].mxu1 %v6500_v30 }
 0x6ca   : > { %4266 = vmatprep.mubr.bf16.mxu1 %v6501_v31 }
 0x6d1   : > { %4267 = vmatmul.mubr.bf16.gmra.mrb[104].mxu1 %v6503_v32  ;;  %v3971_v32 = vld [vmem:[#allocation2 + $0x48] sm:$0xff] }
 0x6d2   : > { %4274 = vmatprep.mubr.bf16.mxu1 %v6504_v33 }
 0x6d9   : > { %4275 = vmatmul.mubr.bf16.gmra.mrb[108].mxu1 %v6506_v34 }
 0x6da   : > { %4282 = vmatprep.mubr.bf16.mxu1 %v6507_v35 }
 0x6e1   : > { %4283 = vmatmul.mubr.bf16.gmra.mrb[112].mxu1 %v6509_v36 }
 0x6e2   : > { %4290 = vmatprep.mubr.bf16.mxu1 %v6510_v43 }
 0x6e9   : > { %4291 = vmatmul.mubr.bf16.gmra.mrb[116].mxu1 %v6512_v37  ;;  %v3972_v37 = vld [vmem:[#allocation2 + $0x50] sm:$0xff] }
 0x6ea   : > { %4298 = vmatprep.mubr.bf16.mxu1 %v6513_v39 }
 0x6f1   : > { %4299 = vmatmul.mubr.bf16.gmra.mrb[120].mxu1 %v6515_v40 }
 0x6f2   : > { %4306 = vmatprep.mubr.bf16.mxu1 %v6516_v41 }
 0x6f9   : > { %4307 = vmatmul.mubr.bf16.gmra.mrb[124].mxu1 %v6518_v50  ;;  %v3973_v50 = vld [vmem:[#allocation2 + $0x58] sm:$0xff] }
 0x6fa   : > { %4314 = vmatprep.mubr.bf16.mxu1 %v6519_v42 }
 0x701   : > { %4315 = vmatmul.mubr.bf16.gmra.mrb[128].mxu1 %v6521_v44 }
 0x702   : > { %4322 = vmatprep.mubr.bf16.mxu1 %v6522_v45 }
 0x709   : > { %4323 = vmatmul.mubr.bf16.gmra.mrb[132].mxu1 %v6524_v46 }
 0x70a   : > { %4330 = vmatprep.mubr.bf16.mxu1 %v6525_v47 }
 0x711   : > { %4331 = vmatmul.mubr.bf16.gmra.mrb[136].mxu1 %v6527_v48  ;;  %v3974_v48 = vld [vmem:[#allocation2 + $0x60] sm:$0xff] }
 0x712   : > { %4338 = vmatprep.mubr.bf16.mxu1 %v6528_v51 }
 0x719   : > { %4339 = vmatmul.mubr.bf16.gmra.mrb[140].mxu1 %v6530_v52 }
 0x774   : > { %v5681_v53 = vpop.f32.mrb[80].mxu1 }
 0x775   : > { %v5682_v55 = vpop.f32.mrb[81].mxu1 }
 0x776   : > { %v5683_v56 = vadd.f32 %v5682_v55, %v5681_v53  ;;  %v5684_v57 = vpop.f32.mrb[82].mxu1 }
 0x777   : > { %v5685_v59 = vpop.f32.mrb[83].mxu1 }
 0x778   : > { %v4347_v60 = vadd.f32 %v5683_v56, %v3962_v54  ;;  %v5686_v61 = vadd.f32 %v5685_v59, %v5684_v57  ;;  %v3975_v54 = vld [vmem:[#allocation2 + $0x68] sm:$0xff] }
 0x77a   : > { %4379 = vst [vmem:[#allocation2] sm:$0xff] %v4347_v60  ;;  %v4348_v62 = vadd.f32 %v5686_v61, %v3963_v58  ;;  %v3976_v60 = vld [vmem:[#allocation2 + $0x70] sm:$0xff] }
 0x77c   : > { %4380 = vst [vmem:[#allocation2 + $0x8] sm:$0xff] %v4348_v62  ;;  %v5687_v63 = vpop.f32.mrb[84].mxu1 }
 0x77d   : > { %v5688_v1 = vpop.f32.mrb[85].mxu1 }
 0x77e   : > { %v5689_v2 = vadd.f32 %v5688_v1, %v5687_v63  ;;  %v5690_v3 = vpop.f32.mrb[86].mxu1 }
 0x77f   : > { %v5691_v5 = vpop.f32.mrb[87].mxu1 }
 0x780   : > { %v4349_v7 = vadd.f32 %v5689_v2, %v3964_v0  ;;  %v5692_v8 = vadd.f32 %v5691_v5, %v5690_v3  ;;  %v3977_v0 = vld [vmem:[#allocation2 + $0x78] sm:$0xff] }
 0x782   : > { %4381 = vst [vmem:[#allocation2 + $0x10] sm:$0xff] %v4349_v7  ;;  %v4350_v23 = vadd.f32 %v5692_v8, %v3965_v4  ;;  %v3978_v7 = vld [vmem:[#allocation2 + $0x80] sm:$0xff] }
 0x784   : > { %4382 = vst [vmem:[#allocation2 + $0x18] sm:$0xff] %v4350_v23  ;;  %v5693_v9 = vpop.f32.mrb[88].mxu1 }
 0x785   : > { %v5694_v10 = vpop.f32.mrb[89].mxu1 }
 0x786   : > { %v5695_v11 = vadd.f32 %v5694_v10, %v5693_v9  ;;  %v5696_v12 = vpop.f32.mrb[90].mxu1 }
 0x787   : > { %v5697_v49 = vpop.f32.mrb[91].mxu1 }
 0x788   : > { %v4351_v14 = vadd.f32 %v5695_v11, %v3966_v38  ;;  %v5698_v15 = vadd.f32 %v5697_v49, %v5696_v12  ;;  %v3979_v38 = vld [vmem:[#allocation2 + $0x88] sm:$0xff] }
 0x78a   : > { %4383 = vst [vmem:[#allocation2 + $0x20] sm:$0xff] %v4351_v14  ;;  %v4352_v16 = vadd.f32 %v5698_v15, %v3967_v13  ;;  %v3980_v14 = vld [vmem:[#allocation2 + $0x90] sm:$0xff] }
 0x78c   : > { %4384 = vst [vmem:[#allocation2 + $0x28] sm:$0xff] %v4352_v16  ;;  %v5699_v17 = vpop.f32.mrb[92].mxu1 }
 0x78d   : > { %v5700_v19 = vpop.f32.mrb[93].mxu1 }
 0x78e   : > { %v5701_v20 = vadd.f32 %v5700_v19, %v5699_v17  ;;  %v5702_v21 = vpop.f32.mrb[94].mxu1 }
 0x78f   : > { %v5703_v6 = vpop.f32.mrb[95].mxu1 }
 0x790   : > { %v4353_v24 = vadd.f32 %v5701_v20, %v3968_v18  ;;  %v5704_v25 = vadd.f32 %v5703_v6, %v5702_v21  ;;  %v3981_v18 = vld [vmem:[#allocation2 + $0x98] sm:$0xff] }
 0x792   : > { %4385 = vst [vmem:[#allocation2 + $0x30] sm:$0xff] %v4353_v24  ;;  %v4354_v26 = vadd.f32 %v5704_v25, %v3969_v22  ;;  %v3982_v24 = vld [vmem:[#allocation2 + $0xa0] sm:$0xff] }
 0x794   : > { %4386 = vst [vmem:[#allocation2 + $0x38] sm:$0xff] %v4354_v26  ;;  %v5705_v27 = vpop.f32.mrb[96].mxu1 }
 0x795   : > { %v5706_v29 = vpop.f32.mrb[97].mxu1 }
 0x796   : > { %v5707_v30 = vadd.f32 %v5706_v29, %v5705_v27  ;;  %v5708_v31 = vpop.f32.mrb[98].mxu1 }
 0x797   : > { %v5709_v33 = vpop.f32.mrb[99].mxu1 }
 0x798   : > { %v4355_v34 = vadd.f32 %v5707_v30, %v3970_v28  ;;  %v5710_v35 = vadd.f32 %v5709_v33, %v5708_v31  ;;  %v3983_v28 = vld [vmem:[#allocation2 + $0xa8] sm:$0xff] }
 0x79a   : > { %4387 = vst [vmem:[#allocation2 + $0x40] sm:$0xff] %v4355_v34  ;;  %v4356_v36 = vadd.f32 %v5710_v35, %v3971_v32  ;;  %v3984_v34 = vld [vmem:[#allocation2 + $0xb0] sm:$0xff] }
 0x79c   : > { %4388 = vst [vmem:[#allocation2 + $0x48] sm:$0xff] %v4356_v36  ;;  %v5711_v43 = vpop.f32.mrb[100].mxu1 }
 0x79d   : > { %v5712_v39 = vpop.f32.mrb[101].mxu1 }
 0x79e   : > { %v5713_v40 = vadd.f32 %v5712_v39, %v5711_v43  ;;  %v5714_v41 = vpop.f32.mrb[102].mxu1 }
 0x79f   : > { %v5715_v42 = vpop.f32.mrb[103].mxu1 }
 0x7a0   : > { %v4357_v44 = vadd.f32 %v5713_v40, %v3972_v37  ;;  %v5716_v45 = vadd.f32 %v5715_v42, %v5714_v41  ;;  %v3985_v37 = vld [vmem:[#allocation2 + $0xb8] sm:$0xff] }
 0x7a2   : > { %4389 = vst [vmem:[#allocation2 + $0x50] sm:$0xff] %v4357_v44  ;;  %v4358_v46 = vadd.f32 %v5716_v45, %v3973_v50  ;;  %v3986_v44 = vld [vmem:[#allocation2 + $0xc0] sm:$0xff] }
 0x7a4   : > { %4390 = vst [vmem:[#allocation2 + $0x58] sm:$0xff] %v4358_v46  ;;  %v5717_v47 = vpop.f32.mrb[104].mxu1 }
 0x7a5   : > { %v5718_v51 = vpop.f32.mrb[105].mxu1 }
 0x7a6   : > { %v5719_v52 = vadd.f32 %v5718_v51, %v5717_v47  ;;  %v5720_v53 = vpop.f32.mrb[106].mxu1 }
 0x7a7   : > { %v5721_v55 = vpop.f32.mrb[107].mxu1 }
 0x7a8   : > { %v4359_v56 = vadd.f32 %v5719_v52, %v3974_v48  ;;  %v5722_v57 = vadd.f32 %v5721_v55, %v5720_v53  ;;  %v3987_v48 = vld [vmem:[#allocation2 + $0xc8] sm:$0xff] }
 0x7aa   : > { %4391 = vst [vmem:[#allocation2 + $0x60] sm:$0xff] %v4359_v56  ;;  %v4360_v58 = vadd.f32 %v5722_v57, %v3975_v54  ;;  %v3988_v56 = vld [vmem:[#allocation2 + $0xd0] sm:$0xff] }
 0x7ac   : > { %4392 = vst [vmem:[#allocation2 + $0x68] sm:$0xff] %v4360_v58  ;;  %v5723_v59 = vpop.f32.mrb[108].mxu1 }
 0x7ad   : > { %v5724_v61 = vpop.f32.mrb[109].mxu1 }
 0x7ae   : > { %v5725_v62 = vadd.f32 %v5724_v61, %v5723_v59  ;;  %v5726_v63 = vpop.f32.mrb[110].mxu1 }
 0x7af   : > { %v5727_v1 = vpop.f32.mrb[111].mxu1 }
 0x7b0   : > { %v4361_v2 = vadd.f32 %v5725_v62, %v3976_v60  ;;  %v5728_v3 = vadd.f32 %v5727_v1, %v5726_v63  ;;  %v3989_v60 = vld [vmem:[#allocation2 + $0xd8] sm:$0xff] }
 0x7b2   : > { %4393 = vst [vmem:[#allocation2 + $0x70] sm:$0xff] %v4361_v2  ;;  %v4362_v4 = vadd.f32 %v5728_v3, %v3977_v0  ;;  %v3990_v2 = vld [vmem:[#allocation2 + $0xe0] sm:$0xff] }
 0x7b4   : > { %4394 = vst [vmem:[#allocation2 + $0x78] sm:$0xff] %v4362_v4  ;;  %v5729_v5 = vpop.f32.mrb[112].mxu1 }
 0x7b5   : > { %v5730_v8 = vpop.f32.mrb[113].mxu1 }
 0x7b6   : > { %v5731_v23 = vadd.f32 %v5730_v8, %v5729_v5  ;;  %v5732_v9 = vpop.f32.mrb[114].mxu1 }
 0x7b7   : > { %v5733_v10 = vpop.f32.mrb[115].mxu1 }
 0x7b8   : > { %v4363_v11 = vadd.f32 %v5731_v23, %v3978_v7  ;;  %v5734_v12 = vadd.f32 %v5733_v10, %v5732_v9  ;;  %v3991_v7 = vld [vmem:[#allocation2 + $0xe8] sm:$0xff] }
 0x7ba   : > { %4395 = vst [vmem:[#allocation2 + $0x80] sm:$0xff] %v4363_v11  ;;  %v4364_v13 = vadd.f32 %v5734_v12, %v3979_v38  ;;  %v3992_v11 = vld [vmem:[#allocation2 + $0xf0] sm:$0xff] }
 0x7bc   : > { %4396 = vst [vmem:[#allocation2 + $0x88] sm:$0xff] %v4364_v13  ;;  %v5735_v49 = vpop.f32.mrb[116].mxu1 }
 0x7bd   : > { %v5736_v15 = vpop.f32.mrb[117].mxu1 }
 0x7be   : > { %v5737_v16 = vadd.f32 %v5736_v15, %v5735_v49  ;;  %v5738_v17 = vpop.f32.mrb[118].mxu1 }
 0x7bf   : > { %v5739_v19 = vpop.f32.mrb[119].mxu1 }
 0x7c0   : > { %v4365_v20 = vadd.f32 %v5737_v16, %v3980_v14  ;;  %v5740_v21 = vadd.f32 %v5739_v19, %v5738_v17  ;;  %v3993_v14 = vld [vmem:[#allocation2 + $0xf8] sm:$0xff]  ;;  %v4449_v19 = vld [vmem:[%s7606_s1 + $0x10] sm:$0xff] (!%p5159_p10) }
 0x7c2   : > { %4397 = vst [vmem:[#allocation2 + $0x90] sm:$0xff] %v4365_v20  ;;  %v4366_v22 = vadd.f32 %v5740_v21, %v3981_v18  ;;  %v4447_v20 = vld [vmem:[%s7606_s1] sm:$0xff] (!%p5159_p10)  ;;  %v6558_v21 = vmov (!%p5159_p10), 0  }
 0x7c3   : > { %6532 = vset.pattern.permute.xlu1 (!%p5159_p10), %v6558_v21  ;;  %6531 = vset.pattern.permute.xlu0 (!%p5159_p10), %v6558_v21 }
 0x7c4   : > { %4398 = vst [vmem:[#allocation2 + $0x98] sm:$0xff] %v4366_v22  ;;  %v5741_v6 = vpop.f32.mrb[120].mxu1  ;;  %4491 = vperm.xlu1 (!%p5159_p10), %6532, %v4449_v19   ;;  %4481 = vperm.xlu0 (!%p5159_p10), %6531, %v4447_v20   ;;  %v4450_v22 = vld [vmem:[%s7606_s1 + $0x18] sm:$0xff] (!%p5159_p10) }
 0x7c5   : > { %v5742_v25 = vpop.f32.mrb[121].mxu1 }
 0x7c6   : > { %v5743_v26 = vadd.f32 %v5742_v25, %v5741_v6  ;;  %v5744_v27 = vpop.f32.mrb[122].mxu1  ;;  %v4448_v6 = vld [vmem:[%s7606_s1 + $0x8] sm:$0xff] (!%p5159_p10)  ;;  %v4451_v25 = vld [vmem:[%s7606_s1 + $0x20] sm:$0xff] (!%p5159_p10) }
 0x7c7   : > { %v5745_v29 = vpop.f32.mrb[123].mxu1 }
 0x7c8   : > { %v4367_v30 = vadd.f32 %v5743_v26, %v3982_v24  ;;  %v5746_v31 = vadd.f32 %v5745_v29, %v5744_v27  ;;  %4496 = vperm.xlu1 (!%p5159_p10), %6532, %v4450_v22   ;;  %4486 = vperm.xlu0 (!%p5159_p10), %6531, %v4448_v6   ;;  %v4452_v24 = vld [vmem:[%s7606_s1 + $0x28] sm:$0xff] (!%p5159_p10)  ;;  %v4454_v26 = vld [vmem:[%s7606_s1 + $0x38] sm:$0xff] (!%p5159_p10)  ;;  %v4453_v27 = vld [vmem:[%s7606_s1 + $0x30] sm:$0xff] (!%p5159_p10) }
 0x7c9   : > { %v4455_v29 = vld [vmem:[%s7606_s1 + $0x40] sm:$0xff] (!%p5159_p10)  ;;  %v4426_v22 = vld [vmem:[#allocation2 + $0x58] sm:$0xff] (!%p5159_p10)  ;;  %v4425_v6 = vld [vmem:[#allocation2 + $0x50] sm:$0xff] (!%p5159_p10) }
 0x7ca   : > { %4399 = vst [vmem:[#allocation2 + $0xa0] sm:$0xff] %v4367_v30  ;;  %v4368_v32 = vadd.f32 %v5746_v31, %v3983_v28  ;;  %v4456_v28 = vld [vmem:[%s7606_s1 + $0x48] sm:$0xff] (!%p5159_p10)  ;;  %v4458_v30 = vld [vmem:[%s7606_s1 + $0x58] sm:$0xff] (!%p5159_p10)  ;;  %v4457_v31 = vld [vmem:[%s7606_s1 + $0x50] sm:$0xff] (!%p5159_p10) }
 0x7cc   : > { %4400 = vst [vmem:[#allocation2 + $0xa8] sm:$0xff] %v4368_v32  ;;  %v5747_v33 = vpop.f32.mrb[124].mxu1  ;;  %4506 = vperm.xlu1 (!%p5159_p10), %6532, %v4452_v24   ;;  %4501 = vperm.xlu0 (!%p5159_p10), %6531, %v4451_v25   ;;  %v4460_v32 = vld [vmem:[%s7606_s1 + $0x68] sm:$0xff] (!%p5159_p10) }
 0x7cd   : > { %v5748_v35 = vpop.f32.mrb[125].mxu1 }
 0x7ce   : > { %v5749_v36 = vadd.f32 %v5748_v35, %v5747_v33  ;;  %v5750_v43 = vpop.f32.mrb[126].mxu1  ;;  %v4459_v33 = vld [vmem:[%s7606_s1 + $0x60] sm:$0xff] (!%p5159_p10)  ;;  %v4461_v35 = vld [vmem:[%s7606_s1 + $0x70] sm:$0xff] (!%p5159_p10) }
 0x7cf   : > { %v5751_v39 = vpop.f32.mrb[127].mxu1 }
 0x7d0   : > { %v4369_v40 = vadd.f32 %v5749_v36, %v3984_v34  ;;  %v5752_v41 = vadd.f32 %v5751_v39, %v5750_v43  ;;  %4516 = vperm.xlu1 (!%p5159_p10), %6532, %v4454_v26   ;;  %4511 = vperm.xlu0 (!%p5159_p10), %6531, %v4453_v27   ;;  %v4462_v34 = vld [vmem:[%s7606_s1 + $0x78] sm:$0xff] (!%p5159_p10)  ;;  %v4464_v36 = vld [vmem:[%s7606_s1 + $0x88] sm:$0xff] (!%p5159_p10)  ;;  %v4463_v43 = vld [vmem:[%s7606_s1 + $0x80] sm:$0xff] (!%p5159_p10) }
 0x7d1   : > { %v4465_v39 = vld [vmem:[%s7606_s1 + $0x90] sm:$0xff] (!%p5159_p10) }
 0x7d2   : > { %4401 = vst [vmem:[#allocation2 + $0xb0] sm:$0xff] %v4369_v40  ;;  %v4370_v50 = vadd.f32 %v5752_v41, %v3985_v37  ;;  %v4466_v37 = vld [vmem:[%s7606_s1 + $0x98] sm:$0xff] (!%p5159_p10)  ;;  %v4468_v40 = vld [vmem:[%s7606_s1 + $0xa8] sm:$0xff] (!%p5159_p10)  ;;  %v4467_v41 = vld [vmem:[%s7606_s1 + $0xa0] sm:$0xff] (!%p5159_p10) }
 0x7d4   : > { %4402 = vst [vmem:[#allocation2 + $0xb8] sm:$0xff] %v4370_v50  ;;  %v5753_v42 = vpop.f32.mrb[128].mxu1  ;;  %4526 = vperm.xlu1 (!%p5159_p10), %6532, %v4456_v28   ;;  %4521 = vperm.xlu0 (!%p5159_p10), %6531, %v4455_v29   ;;  %v4470_v50 = vld [vmem:[%s7606_s1 + $0xb8] sm:$0xff] (!%p5159_p10)  ;;  %v4428_v29 = vld [vmem:[#allocation2 + $0x68] sm:$0xff] (!%p5159_p10) }
 0x7d5   : > { %v5754_v45 = vpop.f32.mrb[129].mxu1 }
 0x7d6   : > { %v5755_v46 = vadd.f32 %v5754_v45, %v5753_v42  ;;  %v5756_v47 = vpop.f32.mrb[130].mxu1  ;;  %v4469_v42 = vld [vmem:[%s7606_s1 + $0xb0] sm:$0xff] (!%p5159_p10)  ;;  %v4471_v45 = vld [vmem:[%s7606_s1 + $0xc0] sm:$0xff] (!%p5159_p10) }
 0x7d7   : > { %v5757_v51 = vpop.f32.mrb[131].mxu1 }
 0x7d8   : > { %v4371_v52 = vadd.f32 %v5755_v46, %v3986_v44  ;;  %v5758_v53 = vadd.f32 %v5757_v51, %v5756_v47  ;;  %4536 = vperm.xlu1 (!%p5159_p10), %6532, %v4458_v30   ;;  %4531 = vperm.xlu0 (!%p5159_p10), %6531, %v4457_v31   ;;  %v4472_v44 = vld [vmem:[%s7606_s1 + $0xc8] sm:$0xff] (!%p5159_p10)  ;;  %v4474_v46 = vld [vmem:[%s7606_s1 + $0xd8] sm:$0xff] (!%p5159_p10)  ;;  %v4473_v47 = vld [vmem:[%s7606_s1 + $0xd0] sm:$0xff] (!%p5159_p10) }
 0x7d9   : > { %v4475_v51 = vld [vmem:[%s7606_s1 + $0xe0] sm:$0xff] (!%p5159_p10) }
 0x7da   : > { %4403 = vst [vmem:[#allocation2 + $0xc0] sm:$0xff] %v4371_v52  ;;  %v4372_v54 = vadd.f32 %v5758_v53, %v3987_v48  ;;  %v4476_v48 = vld [vmem:[%s7606_s1 + $0xe8] sm:$0xff] (!%p5159_p10)  ;;  %v4478_v52 = vld [vmem:[%s7606_s1 + $0xf8] sm:$0xff] (!%p5159_p10)  ;;  %v4477_v53 = vld [vmem:[%s7606_s1 + $0xf0] sm:$0xff] (!%p5159_p10) }
 0x7db   : > { %v4427_v30 = vld [vmem:[#allocation2 + $0x60] sm:$0xff] (!%p5159_p10) }
 0x7dc   : > { %4404 = vst [vmem:[#allocation2 + $0xc8] sm:$0xff] %v4372_v54  ;;  %v5759_v55 = vpop.f32.mrb[132].mxu1  ;;  %4546 = vperm.xlu1 (!%p5159_p10), %6532, %v4460_v32   ;;  %4541 = vperm.xlu0 (!%p5159_p10), %6531, %v4459_v33  }
 0x7dd   : > { %v5760_v57 = vpop.f32.mrb[133].mxu1 }
 0x7de   : > { %v5761_v58 = vadd.f32 %v5760_v57, %v5759_v55  ;;  %v5762_v59 = vpop.f32.mrb[134].mxu1  ;;  %v4415_v57 = vld [vmem:[#allocation2] sm:$0xff] (!%p5159_p10) }
 0x7df   : > { %v5763_v61 = vpop.f32.mrb[135].mxu1 }
 0x7e0   : > { %v4373_v62 = vadd.f32 %v5761_v58, %v3988_v56  ;;  %v5764_v63 = vadd.f32 %v5763_v61, %v5762_v59  ;;  %4556 = vperm.xlu1 (!%p5159_p10), %6532, %v4462_v34   ;;  %4551 = vperm.xlu0 (!%p5159_p10), %6531, %v4461_v35   ;;  %v4417_v56 = vld [vmem:[#allocation2 + $0x10] sm:$0xff] (!%p5159_p10)  ;;  %v4418_v58 = vld [vmem:[#allocation2 + $0x18] sm:$0xff] (!%p5159_p10)  ;;  %v4416_v59 = vld [vmem:[#allocation2 + $0x8] sm:$0xff] (!%p5159_p10) }
 0x7e2   : > { %4405 = vst [vmem:[#allocation2 + $0xd0] sm:$0xff] %v4373_v62  ;;  %v4374_v0 = vadd.f32 %v5764_v63, %v3989_v60 }
 0x7e4   : > { %4406 = vst [vmem:[#allocation2 + $0xd8] sm:$0xff] %v4374_v0  ;;  %v5765_v1 = vpop.f32.mrb[136].mxu1  ;;  %4566 = vperm.xlu1 (!%p5159_p10), %6532, %v4464_v36   ;;  %4561 = vperm.xlu0 (!%p5159_p10), %6531, %v4463_v43   ;;  %v4430_v36 = vld [vmem:[#allocation2 + $0x78] sm:$0xff] (!%p5159_p10)  ;;  %v4429_v43 = vld [vmem:[#allocation2 + $0x70] sm:$0xff] (!%p5159_p10) }
 0x7e5   : > { %v5766_v3 = vpop.f32.mrb[137].mxu1 }
 0x7e6   : > { %v5767_v4 = vadd.f32 %v5766_v3, %v5765_v1  ;;  %v5768_v5 = vpop.f32.mrb[138].mxu1  ;;  %v4419_v3 = vld [vmem:[#allocation2 + $0x20] sm:$0xff] (!%p5159_p10) }
 0x7e7   : > { %v5769_v8 = vpop.f32.mrb[139].mxu1 }
 0x7e8   : > { %v4375_v23 = vadd.f32 %v5767_v4, %v3990_v2  ;;  %v5770_v9 = vadd.f32 %v5769_v8, %v5768_v5  ;;  %4576 = vperm.xlu1 (!%p5159_p10), %6532, %v4466_v37   ;;  %4571 = vperm.xlu0 (!%p5159_p10), %6531, %v4465_v39   ;;  %v4420_v2 = vld [vmem:[#allocation2 + $0x28] sm:$0xff] (!%p5159_p10) }
 0x7ea   : > { %4407 = vst [vmem:[#allocation2 + $0xe0] sm:$0xff] %v4375_v23  ;;  %v4376_v38 = vadd.f32 %v5770_v9, %v3991_v7 }
 0x7ec   : > { %4408 = vst [vmem:[#allocation2 + $0xe8] sm:$0xff] %v4376_v38  ;;  %v5771_v10 = vpop.f32.mrb[140].mxu1  ;;  %4586 = vperm.xlu1 (!%p5159_p10), %6532, %v4468_v40   ;;  %4581 = vperm.xlu0 (!%p5159_p10), %6531, %v4467_v41   ;;  %v4422_v38 = vld [vmem:[#allocation2 + $0x38] sm:$0xff] (!%p5159_p10) }
 0x7ed   : > { %v5772_v12 = vpop.f32.mrb[141].mxu1 }
 0x7ee   : > { %v5773_v13 = vadd.f32 %v5772_v12, %v5771_v10  ;;  %v5774_v49 = vpop.f32.mrb[142].mxu1  ;;  %4414 = sbr.rel (%p5159_p10) target bundleno = 2181 (0x885), region = 146  ;;  %v4421_v10 = vld [vmem:[#allocation2 + $0x30] sm:$0xff] (!%p5159_p10) }
 0x7ef   : > { %v5775_v15 = vpop.f32.mrb[143].mxu1 }
 0x7f0   : > { %v4377_v16 = vadd.f32 %v5773_v13, %v3992_v11  ;;  %v5776_v17 = vadd.f32 %v5775_v15, %v5774_v49  ;;  %4596 = vperm.xlu1 (!%p5159_p10), %6532, %v4470_v50   ;;  %4591 = vperm.xlu0 (!%p5159_p10), %6531, %v4469_v42   ;;  %v4424_v15 = vld [vmem:[#allocation2 + $0x48] sm:$0xff] (!%p5159_p10) }
 0x7f1   : > { %v4432_v42 = vld [vmem:[#allocation2 + $0x88] sm:$0xff] (!%p5159_p10) }
 0x7f2   : > { %4409 = vst [vmem:[#allocation2 + $0xf0] sm:$0xff] %v4377_v16  ;;  %v4378_v18 = vadd.f32 %v5776_v17, %v3993_v14  ;;  %v4423_v16 = vld [vmem:[#allocation2 + $0x40] sm:$0xff] (!%p5159_p10) }
 0x7f4   : > { %4410 = vst [vmem:[#allocation2 + $0xf8] sm:$0xff] %v4378_v18  ;;  %4606 = vperm.xlu1 (!%p5159_p10), %6532, %v4472_v44   ;;  %4601 = vperm.xlu0 (!%p5159_p10), %6531, %v4471_v45   ;;  %v4431_v44 = vld [vmem:[#allocation2 + $0x80] sm:$0xff] (!%p5159_p10) }
 0x7f8   : > { %4616 = vperm.xlu1 %6532, %v4474_v46   ;;  %4611 = vperm.xlu0 %6531, %v4473_v47  }
 0x7fc   : > { %4626 = vperm.xlu1 %6532, %v4476_v48   ;;  %4621 = vperm.xlu0 %6531, %v4475_v51  }
 0x800   : > { %4636 = vperm.xlu1 %6532, %v4478_v52   ;;  %4631 = vperm.xlu0 %6531, %v4477_v53   ;;  %v4434_v52 = vld [vmem:[#allocation2 + $0x98] sm:$0xff]  ;;  %v4433_v53 = vld [vmem:[#allocation2 + $0x90] sm:$0xff] }
 0x843   : > { %v4492_v54 = vpop.permute.xlu1 %4491  ;;  %v4482_v55 = vpop.permute.xlu0 %4481 }
 0x844   : > { %v4641_v62 = vmul.f32 %v4492_v54, %v4417_v56  ;;  %v4639_v63 = vmul.f32 %v4482_v55, %v4415_v57 }
 0x847   : > { %v4497_v60 = vpop.permute.xlu1 %4496  ;;  %v4487_v61 = vpop.permute.xlu0 %4486 }
 0x848   : > { %v4642_v0 = vmul.f32 %v4497_v60, %v4418_v58  ;;  %v4640_v1 = vmul.f32 %v4487_v61, %v4416_v59  ;;  %v4436_v59 = vld [vmem:[#allocation2 + $0xa8] sm:$0xff]  ;;  %v4435_v60 = vld [vmem:[#allocation2 + $0xa0] sm:$0xff] }
 0x84a   : > { %v5347_v4 = vpack.c.bf16 %v4642_v0, %v4641_v62  ;;  %v5342_v5 = vpack.c.bf16 %v4640_v1, %v4639_v63 }
 0x84b   : > { %v4507_v7 = vpop.permute.xlu1 %4506  ;;  %v4502_v8 = vpop.permute.xlu0 %4501 }
 0x84c   : > { %5434 = vst [vmem:[%s7607_s30 + $0x8] sm:$0xff] %v5347_v4   ;;  %5343 = vst [vmem:[%s7607_s30] sm:$0xff] %v5342_v5   ;;  %v4644_v23 = vmul.f32 %v4507_v7, %v4420_v2  ;;  %v4643_v9 = vmul.f32 %v4502_v8, %v4419_v3  ;;  %v4438_v2 = vld [vmem:[#allocation2 + $0xb8] sm:$0xff]  ;;  %v4437_v3 = vld [vmem:[#allocation2 + $0xb0] sm:$0xff] }
 0x84e   : > { %v5352_v11 = vpack.c.bf16 %v4644_v23, %v4643_v9  ;;  %v4440_v9 = vld [vmem:[#allocation2 + $0xc8] sm:$0xff] }
 0x84f   : > { %v4517_v12 = vpop.permute.xlu1 %4516  ;;  %v4512_v13 = vpop.permute.xlu0 %4511 }
 0x850   : > { %5435 = vst [vmem:[%s7607_s30 + $0x10] sm:$0xff] %v5352_v11   ;;  %v4646_v49 = vmul.f32 %v4517_v12, %v4422_v38  ;;  %v4645_v14 = vmul.f32 %v4512_v13, %v4421_v10  ;;  %v4439_v38 = vld [vmem:[#allocation2 + $0xc0] sm:$0xff] }
 0x852   : > { %v5357_v17 = vpack.c.bf16 %v4646_v49, %v4645_v14  ;;  %v4442_v14 = vld [vmem:[#allocation2 + $0xd8] sm:$0xff] }
 0x853   : > { %v4527_v18 = vpop.permute.xlu1 %4526  ;;  %v4522_v19 = vpop.permute.xlu0 %4521 }
 0x854   : > { %5436 = vst [vmem:[%s7607_s30 + $0x18] sm:$0xff] %v5357_v17   ;;  %v4648_v20 = vmul.f32 %v4527_v18, %v4424_v15  ;;  %v4647_v21 = vmul.f32 %v4522_v19, %v4423_v16  ;;  %v4441_v15 = vld [vmem:[#allocation2 + $0xd0] sm:$0xff] }
 0x856   : > { %v5362_v24 = vpack.c.bf16 %v4648_v20, %v4647_v21  ;;  %v4444_v21 = vld [vmem:[#allocation2 + $0xe8] sm:$0xff] }
 0x857   : > { %v4537_v25 = vpop.permute.xlu1 %4536  ;;  %v4532_v26 = vpop.permute.xlu0 %4531 }
 0x858   : > { %5437 = vst [vmem:[%s7607_s30 + $0x20] sm:$0xff] %v5362_v24   ;;  %v4650_v27 = vmul.f32 %v4537_v25, %v4426_v22  ;;  %v4649_v28 = vmul.f32 %v4532_v26, %v4425_v6  ;;  %v4443_v22 = vld [vmem:[#allocation2 + $0xe0] sm:$0xff] }
 0x85a   : > { %v5367_v31 = vpack.c.bf16 %v4650_v27, %v4649_v28  ;;  %v4446_v28 = vld [vmem:[#allocation2 + $0xf8] sm:$0xff] }
 0x85b   : > { %v4547_v32 = vpop.permute.xlu1 %4546  ;;  %v4542_v33 = vpop.permute.xlu0 %4541 }
 0x85c   : > { %5438 = vst [vmem:[%s7607_s30 + $0x28] sm:$0xff] %v5367_v31   ;;  %v4652_v34 = vmul.f32 %v4547_v32, %v4428_v29  ;;  %v4651_v35 = vmul.f32 %v4542_v33, %v4427_v30  ;;  %v4445_v29 = vld [vmem:[#allocation2 + $0xf0] sm:$0xff] }
 0x85e   : > { %v5372_v37 = vpack.c.bf16 %v4652_v34, %v4651_v35 }
 0x85f   : > { %v4557_v39 = vpop.permute.xlu1 %4556  ;;  %v4552_v40 = vpop.permute.xlu0 %4551 }
 0x860   : > { %5439 = vst [vmem:[%s7607_s30 + $0x30] sm:$0xff] %v5372_v37   ;;  %v4654_v41 = vmul.f32 %v4557_v39, %v4430_v36  ;;  %v4653_v50 = vmul.f32 %v4552_v40, %v4429_v43 }
 0x862   : > { %v5377_v45 = vpack.c.bf16 %v4654_v41, %v4653_v50 }
 0x863   : > { %v4567_v46 = vpop.permute.xlu1 %4566  ;;  %v4562_v47 = vpop.permute.xlu0 %4561 }
 0x864   : > { %5440 = vst [vmem:[%s7607_s30 + $0x38] sm:$0xff] %v5377_v45   ;;  %v4656_v48 = vmul.f32 %v4567_v46, %v4432_v42  ;;  %v4655_v51 = vmul.f32 %v4562_v47, %v4431_v44 }
 0x866   : > { %v5382_v54 = vpack.c.bf16 %v4656_v48, %v4655_v51 }
 0x867   : > { %v4577_v55 = vpop.permute.xlu1 %4576  ;;  %v4572_v56 = vpop.permute.xlu0 %4571 }
 0x868   : > { %5441 = vst [vmem:[%s7607_s30 + $0x40] sm:$0xff] %v5382_v54   ;;  %v4658_v57 = vmul.f32 %v4577_v55, %v4434_v52  ;;  %v4657_v58 = vmul.f32 %v4572_v56, %v4433_v53 }
 0x86a   : > { %v5387_v61 = vpack.c.bf16 %v4658_v57, %v4657_v58 }
 0x86b   : > { %v4587_v62 = vpop.permute.xlu1 %4586  ;;  %v4582_v63 = vpop.permute.xlu0 %4581 }
 0x86c   : > { %5442 = vst [vmem:[%s7607_s30 + $0x48] sm:$0xff] %v5387_v61   ;;  %v4660_v0 = vmul.f32 %v4587_v62, %v4436_v59  ;;  %v4659_v1 = vmul.f32 %v4582_v63, %v4435_v60 }
 0x86e   : > { %v5392_v4 = vpack.c.bf16 %v4660_v0, %v4659_v1 }
 0x86f   : > { %v4597_v5 = vpop.permute.xlu1 %4596  ;;  %v4592_v7 = vpop.permute.xlu0 %4591 }
 0x870   : > { %5443 = vst [vmem:[%s7607_s30 + $0x50] sm:$0xff] %v5392_v4   ;;  %v4662_v8 = vmul.f32 %v4597_v5, %v4438_v2  ;;  %v4661_v23 = vmul.f32 %v4592_v7, %v4437_v3 }
 0x872   : > { %v5397_v10 = vpack.c.bf16 %v4662_v8, %v4661_v23 }
 0x873   : > { %v4607_v11 = vpop.permute.xlu1 %4606  ;;  %v4602_v12 = vpop.permute.xlu0 %4601 }
 0x874   : > { %5444 = vst [vmem:[%s7607_s30 + $0x58] sm:$0xff] %v5397_v10   ;;  %v4664_v13 = vmul.f32 %v4607_v11, %v4440_v9  ;;  %v4663_v49 = vmul.f32 %v4602_v12, %v4439_v38 }
 0x876   : > { %v5402_v16 = vpack.c.bf16 %v4664_v13, %v4663_v49 }
 0x877   : > { %v4617_v17 = vpop.permute.xlu1 %4616  ;;  %v4612_v18 = vpop.permute.xlu0 %4611 }
 0x878   : > { %5445 = vst [vmem:[%s7607_s30 + $0x60] sm:$0xff] %v5402_v16   ;;  %v4666_v19 = vmul.f32 %v4617_v17, %v4442_v14  ;;  %v4665_v20 = vmul.f32 %v4612_v18, %v4441_v15 }
 0x87a   : > { %v5407_v6 = vpack.c.bf16 %v4666_v19, %v4665_v20 }
 0x87b   : > { %v4627_v24 = vpop.permute.xlu1 %4626  ;;  %v4622_v25 = vpop.permute.xlu0 %4621 }
 0x87c   : > { %5446 = vst [vmem:[%s7607_s30 + $0x68] sm:$0xff] %v5407_v6   ;;  %v4668_v26 = vmul.f32 %v4627_v24, %v4444_v21  ;;  %v4667_v27 = vmul.f32 %v4622_v25, %v4443_v22 }
 0x87e   : > { %v5412_v30 = vpack.c.bf16 %v4668_v26, %v4667_v27 }
 0x87f   : > { %v4637_v31 = vpop.permute.xlu1 %4636  ;;  %v4632_v32 = vpop.permute.xlu0 %4631 }
 0x880   : > { %5447 = vst [vmem:[%s7607_s30 + $0x70] sm:$0xff] %v5412_v30   ;;  %v4670_v33 = vmul.f32 %v4637_v31, %v4446_v28  ;;  %v4669_v34 = vmul.f32 %v4632_v32, %v4445_v29 }
 0x882   : > { %v5417_v35 = vpack.c.bf16 %v4670_v33, %v4669_v34 }
 0x884   : > { %5448 = vst [vmem:[%s7607_s30 + $0x78] sm:$0xff] %v5417_v35  }
 0x885 PF: > { %s7608_s26 = sld [smem:[#allocation5_spill]]  ;;  %s7609_s2 = sld [smem:[#allocation4_spill]] }
 0x886   : > { %s7610_s25 = sld [smem:[#allocation6_spill]] }
 0x88b   : > { %p29_p11 = scmp.ge.s32.totalorder %s7608_s26, 4  }
 0x88d   :  { %31 = sbr.rel (!%p29_p11) target bundleno = 13 (0xd), region = 198 }

</bundles_post_ra>
